<compile_context>
chip_gen: v7x
topology: tpu7x:2x2x1
jax: 0.10.0
libtpu: 0.0.40
codegen_flags: <defaults>
</compile_context>

<pallas_src>
import functools

import numpy as np
import jax
import jax.numpy as jnp
from jax.experimental import pallas as pl
from jax.experimental.pallas import tpu as pltpu


_LAYER_CHANNELS = [(3, 64), (64, 128), (128, 256), (256, 512), (512, 1)]
_LAYER_STRIDE_PAD = [(2, 1), (2, 1), (2, 1), (2, 1), (1, 1)]
_NEG_SLOPE = 0.2


def _selection_matrix_t(hi, wi, stride, pad):
    """Transposed spatial-selection matrix S^T for one 1x1-conv layer.

    Shape (hi*wi, ho*wo); column j has a single 1 at the source pixel of
    output pixel j, or is all-zero when output pixel j reads zero padding.
    Row-major spatial flattening on both sides.
    """
    ho = (hi + 2 * pad - 1) // stride + 1
    wo = (wi + 2 * pad - 1) // stride + 1
    s_t = np.zeros((hi * wi, ho * wo), np.float32)
    for r in range(ho):
        sr = stride * r - pad
        if not (0 <= sr < hi):
            continue
        for c in range(wo):
            sc = stride * c - pad
            if not (0 <= sc < wi):
                continue
            s_t[sr * wi + sc, r * wo + c] = 1.0
    return s_t, ho, wo


def _fused_disc_kernel(x_ref, s1_ref, s2_ref, s3_ref, s4_ref, s5_ref,
                       w1_ref, b1_ref, w2_ref, b2_ref, w3_ref, b3_ref,
                       w4_ref, b4_ref, w5_ref, b5_ref, o_ref, *, slope):
    """One batch image: all 5 conv1x1+LeakyReLU layers, channel-major (C, M)."""
    def lrelu(z):
        return jnp.where(z >= 0, z, slope * z)

    def mxu(a, b):
        return jnp.dot(a, b, preferred_element_type=jnp.float32)

    x = x_ref[0]                                   # (3, H*W), lane-dense
    w1 = w1_ref[...]                               # (64, 3)

    # Layer 1 channel mix on the VPU: Cin=3 -> 3 broadcast FMAs (no K=3 MXU pass).
    a = (w1[:, 0:1] * x[0:1, :]
         + w1[:, 1:2] * x[1:2, :]
         + w1[:, 2:3] * x[2:3, :])                 # (64, H*W)
    # Spatial pad+stride folded in as a matmul with constant 0/1 S^T.
    y = lrelu(mxu(a, s1_ref[...]) + b1_ref[...])   # (64, M1)

    # Layers 2..4: spatial select (matmul vs S^T) then channel matmul on MXU.
    y = lrelu(mxu(w2_ref[...], mxu(y, s2_ref[...])) + b2_ref[...])   # (128, M2)
    y = lrelu(mxu(w3_ref[...], mxu(y, s3_ref[...])) + b3_ref[...])   # (256, M3)
    y = lrelu(mxu(w4_ref[...], mxu(y, s4_ref[...])) + b4_ref[...])   # (512, M4)

    # Layer 5 (Cout=1): result is a single lane-dense (1, M5) row.
    y = lrelu(mxu(w5_ref[...], mxu(y, s5_ref[...])) + b5_ref[...])   # (1, M5)
    o_ref[0] = y


def prepare_params(raw_params):
    """One-time layout prep: (Cout,Cin,1,1) -> (Cout,Cin); (Cout,) -> (Cout,1)."""
    prepped = []
    for w4d, b in raw_params:
        cout, cin = w4d.shape[0], w4d.shape[1]
        prepped.append((w4d.reshape(cout, cin).astype(jnp.float32),
                        b.reshape(cout, 1).astype(jnp.float32)))
    return prepped


def discrimiter_net_forward(x_nchw, prepped_params):
    n, cin, h, w = x_nchw.shape
    assert cin == _LAYER_CHANNELS[0][0]

    # Static spatial plumbing -> constant selection matrices (trace-time numpy).
    sel_t = []
    hi, wi = h, w
    for stride, pad in _LAYER_STRIDE_PAD:
        s_t, hi, wi = _selection_matrix_t(hi, wi, stride, pad)
        sel_t.append(jnp.asarray(s_t))
    ho_out, wo_out = hi, wi
    m_out = ho_out * wo_out

    # Channel-major per-image input: NCHW only needs a reshape (no transpose).
    x_cm = x_nchw.reshape(n, cin, h * w).astype(jnp.float32)

    wb_flat = [t for wb in prepped_params for t in wb]   # w1,b1,...,w5,b5

    def full2d(arr):
        return pl.BlockSpec(arr.shape, lambda b: (0, 0))  # resident across grid

    out = pl.pallas_call(
        functools.partial(_fused_disc_kernel, slope=_NEG_SLOPE),
        out_shape=jax.ShapeDtypeStruct((n, 1, m_out), jnp.float32),
        grid_spec=pltpu.PrefetchScalarGridSpec(
            num_scalar_prefetch=0,
            grid=(n,),  # one program per batch image
            in_specs=([pl.BlockSpec((1, cin, h * w), lambda b: (b, 0, 0))]
                      + [full2d(s) for s in sel_t]
                      + [full2d(t) for t in wb_flat]),
            out_specs=pl.BlockSpec((1, 1, m_out), lambda b: (b, 0, 0)),
        ),
        compiler_params=pltpu.CompilerParams(
            dimension_semantics=("parallel",)),   # batch across TCs (v7x megacore)
    )(x_cm, *sel_t, *wb_flat)

    return out.reshape(n, 1, ho_out, wo_out)      # already NCHW (Cout == 1)


def init_params(key):
    # Deterministic init mimicking PyTorch Conv2d default:
    # U(-1/sqrt(fan_in), 1/sqrt(fan_in)), fan_in = Cin * 1 * 1.
    params = []
    for li, (cin, cout) in enumerate(_LAYER_CHANNELS):
        kw_, kb_ = jax.random.split(jax.random.fold_in(key, li))
        bound = 1.0 / float(cin) ** 0.5
        wgt = jax.random.uniform(kw_, (cout, cin, 1, 1), jnp.float32, -bound, bound)
        b = jax.random.uniform(kb_, (cout,), jnp.float32, -bound, bound)
        params.append((wgt, b))
    return params


def _reference_forward(x_nchw, raw_params):
    """Plain-JAX reference: zero-pad + strided subsample + 1x1 conv + LeakyReLU."""
    x = jnp.transpose(x_nchw, (0, 2, 3, 1))       # NHWC
    for (w4d, b), (stride, pad) in zip(raw_params, _LAYER_STRIDE_PAD):
        xp = jnp.pad(x, ((0, 0), (pad, pad), (pad, pad), (0, 0)))
        xs = xp[:, ::stride, ::stride, :]
        cout, cin = w4d.shape[0], w4d.shape[1]
        y = jnp.einsum('nhwc,oc->nhwo', xs, w4d.reshape(cout, cin),
                       precision=jax.lax.Precision.HIGHEST) + b
        x = jnp.where(y >= 0, y, _NEG_SLOPE * y)
    return jnp.transpose(x, (0, 3, 1, 2))         # NCHW


if __name__ == "__main__":
    key = jax.random.PRNGKey(0)
    raw_params = init_params(jax.random.fold_in(key, 1))
    x = jax.random.normal(jax.random.fold_in(key, 2), (2, 3, 16, 16), jnp.float32)

    prepped = prepare_params(raw_params)          # one-time layout prep
    y = jax.jit(discrimiter_net_forward)(x, prepped)
    y = jax.block_until_ready(y)

    # 16 -> 9 -> 6 -> 4 -> 3 (stride-2, pad-1, 1x1) -> 5 (stride-1, pad-1, 1x1)
    assert y.shape == (2, 1, 5, 5), y.shape
    assert y.dtype == jnp.float32

    y_ref = jax.block_until_ready(jax.jit(_reference_forward)(x, raw_params))
    err = float(jnp.max(jnp.abs(y - y_ref)))
    assert jnp.allclose(y, y_ref, rtol=2e-3, atol=2e-3), err

    print("KERNEL_OK")
</pallas_src>

<mosaic_0001>
module attributes {stable_mosaic.version = 11 : i64} {
  func.func @_fused_disc_kernel(%arg0: i32, %arg1: memref<1x3x256xf32, #tpu.memory_space<vmem>>, %arg2: memref<256x81xf32, #tpu.memory_space<vmem>>, %arg3: memref<81x36xf32, #tpu.memory_space<vmem>>, %arg4: memref<36x16xf32, #tpu.memory_space<vmem>>, %arg5: memref<16x9xf32, #tpu.memory_space<vmem>>, %arg6: memref<9x25xf32, #tpu.memory_space<vmem>>, %arg7: memref<64x3xf32, #tpu.memory_space<vmem>>, %arg8: memref<64x1xf32, #tpu.memory_space<vmem>>, %arg9: memref<128x64xf32, #tpu.memory_space<vmem>>, %arg10: memref<128x1xf32, #tpu.memory_space<vmem>>, %arg11: memref<256x128xf32, #tpu.memory_space<vmem>>, %arg12: memref<256x1xf32, #tpu.memory_space<vmem>>, %arg13: memref<512x256xf32, #tpu.memory_space<vmem>>, %arg14: memref<512x1xf32, #tpu.memory_space<vmem>>, %arg15: memref<1x512xf32, #tpu.memory_space<vmem>>, %arg16: memref<1x1xf32, #tpu.memory_space<vmem>>, %arg17: memref<1x1x25xf32, #tpu.memory_space<vmem>>) attributes {dimension_semantics = [#tpu.dimension_semantics<parallel>], iteration_bounds = array<i64: 2>, scalar_prefetch = 0 : i64, scratch_operands = 0 : i64, tpu.core_type = #tpu.core_type<tc>, window_params = [{transform_indices = @transform_0, window_bounds = array<i64: 1, 3, 256>}, {pipeline_mode = #tpu.pipeline_mode<synchronous>, transform_indices = @transform_1, window_bounds = array<i64: 256, 81>}, {pipeline_mode = #tpu.pipeline_mode<synchronous>, transform_indices = @transform_2, window_bounds = array<i64: 81, 36>}, {pipeline_mode = #tpu.pipeline_mode<synchronous>, transform_indices = @transform_3, window_bounds = array<i64: 36, 16>}, {pipeline_mode = #tpu.pipeline_mode<synchronous>, transform_indices = @transform_4, window_bounds = array<i64: 16, 9>}, {pipeline_mode = #tpu.pipeline_mode<synchronous>, transform_indices = @transform_5, window_bounds = array<i64: 9, 25>}, {pipeline_mode = #tpu.pipeline_mode<synchronous>, transform_indices = @transform_6, window_bounds = array<i64: 64, 3>}, {pipeline_mode = #tpu.pipeline_mode<synchronous>, transform_indices = @transform_7, window_bounds = array<i64: 64, 1>}, {pipeline_mode = #tpu.pipeline_mode<synchronous>, transform_indices = @transform_8, window_bounds = array<i64: 128, 64>}, {pipeline_mode = #tpu.pipeline_mode<synchronous>, transform_indices = @transform_9, window_bounds = array<i64: 128, 1>}, {pipeline_mode = #tpu.pipeline_mode<synchronous>, transform_indices = @transform_10, window_bounds = array<i64: 256, 128>}, {pipeline_mode = #tpu.pipeline_mode<synchronous>, transform_indices = @transform_11, window_bounds = array<i64: 256, 1>}, {pipeline_mode = #tpu.pipeline_mode<synchronous>, transform_indices = @transform_12, window_bounds = array<i64: 512, 256>}, {pipeline_mode = #tpu.pipeline_mode<synchronous>, transform_indices = @transform_13, window_bounds = array<i64: 512, 1>}, {pipeline_mode = #tpu.pipeline_mode<synchronous>, transform_indices = @transform_14, window_bounds = array<i64: 1, 512>}, {pipeline_mode = #tpu.pipeline_mode<synchronous>, transform_indices = @transform_15, window_bounds = array<i64: 1, 1>}, {transform_indices = @transform_16, window_bounds = array<i64: 1, 1, 25>}]} {
    %c0 = arith.constant 0 : index
    %c0_0 = arith.constant 0 : index
    %c0_1 = arith.constant 0 : index
    %0 = vector.load %arg1[%c0, %c0_0, %c0_1] : memref<1x3x256xf32, #tpu.memory_space<vmem>>, vector<1x3x256xf32>
    %1 = vector.shape_cast %0 : vector<1x3x256xf32> to vector<3x256xf32>
    %c0_2 = arith.constant 0 : index
    %c0_3 = arith.constant 0 : index
    %2 = vector.load %arg7[%c0_2, %c0_3] : memref<64x3xf32, #tpu.memory_space<vmem>>, vector<64x3xf32>
    %3 = vector.extract_strided_slice %2 {offsets = [0, 0], sizes = [64, 1], strides = [1, 1]} : vector<64x3xf32> to vector<64x1xf32>
    %4 = vector.extract_strided_slice %1 {offsets = [0, 0], sizes = [1, 256], strides = [1, 1]} : vector<3x256xf32> to vector<1x256xf32>
    %5 = vector.broadcast %3 : vector<64x1xf32> to vector<64x256xf32>
    %6 = vector.broadcast %4 : vector<1x256xf32> to vector<64x256xf32>
    %7 = arith.mulf %5, %6 : vector<64x256xf32>
    %8 = vector.extract_strided_slice %2 {offsets = [0, 1], sizes = [64, 1], strides = [1, 1]} : vector<64x3xf32> to vector<64x1xf32>
    %9 = vector.extract_strided_slice %1 {offsets = [1, 0], sizes = [1, 256], strides = [1, 1]} : vector<3x256xf32> to vector<1x256xf32>
    %10 = vector.broadcast %8 : vector<64x1xf32> to vector<64x256xf32>
    %11 = vector.broadcast %9 : vector<1x256xf32> to vector<64x256xf32>
    %12 = arith.mulf %10, %11 : vector<64x256xf32>
    %13 = arith.addf %7, %12 : vector<64x256xf32>
    %14 = vector.extract_strided_slice %2 {offsets = [0, 2], sizes = [64, 1], strides = [1, 1]} : vector<64x3xf32> to vector<64x1xf32>
    %15 = vector.extract_strided_slice %1 {offsets = [2, 0], sizes = [1, 256], strides = [1, 1]} : vector<3x256xf32> to vector<1x256xf32>
    %16 = vector.broadcast %14 : vector<64x1xf32> to vector<64x256xf32>
    %17 = vector.broadcast %15 : vector<1x256xf32> to vector<64x256xf32>
    %18 = arith.mulf %16, %17 : vector<64x256xf32>
    %19 = arith.addf %13, %18 : vector<64x256xf32>
    %c0_4 = arith.constant 0 : index
    %c0_5 = arith.constant 0 : index
    %20 = vector.load %arg2[%c0_4, %c0_5] : memref<256x81xf32, #tpu.memory_space<vmem>>, vector<256x81xf32>
    %cst = arith.constant dense<0.000000e+00> : vector<64x81xf32>
    %21 = tpu.matmul %19, %20, %cst {dimension_numbers = #tpu.dot_dimension_numbers<[1], [0], [0], [1], [0, 0, 1, 1], [], []>} : vector<64x256xf32>, vector<256x81xf32>, vector<64x81xf32> -> vector<64x81xf32>
    %c0_6 = arith.constant 0 : index
    %c0_7 = arith.constant 0 : index
    %22 = vector.load %arg8[%c0_6, %c0_7] : memref<64x1xf32, #tpu.memory_space<vmem>>, vector<64x1xf32>
    %23 = vector.broadcast %22 : vector<64x1xf32> to vector<64x81xf32>
    %24 = arith.addf %21, %23 : vector<64x81xf32>
    %cst_8 = arith.constant 0.000000e+00 : f32
    %25 = vector.broadcast %cst_8 : f32 to vector<64x81xf32>
    %26 = arith.cmpf oge, %24, %25 : vector<64x81xf32>
    %cst_9 = arith.constant 2.000000e-01 : f32
    %27 = vector.broadcast %cst_9 : f32 to vector<64x81xf32>
    %28 = arith.mulf %27, %24 : vector<64x81xf32>
    %29 = arith.select %26, %24, %28 : vector<64x81xi1>, vector<64x81xf32>
    %c0_10 = arith.constant 0 : index
    %c0_11 = arith.constant 0 : index
    %30 = vector.load %arg9[%c0_10, %c0_11] : memref<128x64xf32, #tpu.memory_space<vmem>>, vector<128x64xf32>
    %c0_12 = arith.constant 0 : index
    %c0_13 = arith.constant 0 : index
    %31 = vector.load %arg3[%c0_12, %c0_13] : memref<81x36xf32, #tpu.memory_space<vmem>>, vector<81x36xf32>
    %cst_14 = arith.constant dense<0.000000e+00> : vector<64x36xf32>
    %32 = tpu.matmul %29, %31, %cst_14 {dimension_numbers = #tpu.dot_dimension_numbers<[1], [0], [0], [1], [0, 0, 1, 1], [], []>} : vector<64x81xf32>, vector<81x36xf32>, vector<64x36xf32> -> vector<64x36xf32>
    %cst_15 = arith.constant dense<0.000000e+00> : vector<128x36xf32>
    %33 = tpu.matmul %30, %32, %cst_15 {dimension_numbers = #tpu.dot_dimension_numbers<[1], [0], [0], [1], [0, 0, 1, 1], [], []>} : vector<128x64xf32>, vector<64x36xf32>, vector<128x36xf32> -> vector<128x36xf32>
    %c0_16 = arith.constant 0 : index
    %c0_17 = arith.constant 0 : index
    %34 = vector.load %arg10[%c0_16, %c0_17] : memref<128x1xf32, #tpu.memory_space<vmem>>, vector<128x1xf32>
    %35 = vector.broadcast %34 : vector<128x1xf32> to vector<128x36xf32>
    %36 = arith.addf %33, %35 : vector<128x36xf32>
    %cst_18 = arith.constant 0.000000e+00 : f32
    %37 = vector.broadcast %cst_18 : f32 to vector<128x36xf32>
    %38 = arith.cmpf oge, %36, %37 : vector<128x36xf32>
    %cst_19 = arith.constant 2.000000e-01 : f32
    %39 = vector.broadcast %cst_19 : f32 to vector<128x36xf32>
    %40 = arith.mulf %39, %36 : vector<128x36xf32>
    %41 = arith.select %38, %36, %40 : vector<128x36xi1>, vector<128x36xf32>
    %c0_20 = arith.constant 0 : index
    %c0_21 = arith.constant 0 : index
    %42 = vector.load %arg11[%c0_20, %c0_21] : memref<256x128xf32, #tpu.memory_space<vmem>>, vector<256x128xf32>
    %c0_22 = arith.constant 0 : index
    %c0_23 = arith.constant 0 : index
    %43 = vector.load %arg4[%c0_22, %c0_23] : memref<36x16xf32, #tpu.memory_space<vmem>>, vector<36x16xf32>
    %cst_24 = arith.constant dense<0.000000e+00> : vector<128x16xf32>
    %44 = tpu.matmul %41, %43, %cst_24 {dimension_numbers = #tpu.dot_dimension_numbers<[1], [0], [0], [1], [0, 0, 1, 1], [], []>} : vector<128x36xf32>, vector<36x16xf32>, vector<128x16xf32> -> vector<128x16xf32>
    %cst_25 = arith.constant dense<0.000000e+00> : vector<256x16xf32>
    %45 = tpu.matmul %42, %44, %cst_25 {dimension_numbers = #tpu.dot_dimension_numbers<[1], [0], [0], [1], [0, 0, 1, 1], [], []>} : vector<256x128xf32>, vector<128x16xf32>, vector<256x16xf32> -> vector<256x16xf32>
    %c0_26 = arith.constant 0 : index
    %c0_27 = arith.constant 0 : index
    %46 = vector.load %arg12[%c0_26, %c0_27] : memref<256x1xf32, #tpu.memory_space<vmem>>, vector<256x1xf32>
    %47 = vector.broadcast %46 : vector<256x1xf32> to vector<256x16xf32>
    %48 = arith.addf %45, %47 : vector<256x16xf32>
    %cst_28 = arith.constant 0.000000e+00 : f32
    %49 = vector.broadcast %cst_28 : f32 to vector<256x16xf32>
    %50 = arith.cmpf oge, %48, %49 : vector<256x16xf32>
    %cst_29 = arith.constant 2.000000e-01 : f32
    %51 = vector.broadcast %cst_29 : f32 to vector<256x16xf32>
    %52 = arith.mulf %51, %48 : vector<256x16xf32>
    %53 = arith.select %50, %48, %52 : vector<256x16xi1>, vector<256x16xf32>
    %c0_30 = arith.constant 0 : index
    %c0_31 = arith.constant 0 : index
    %54 = vector.load %arg13[%c0_30, %c0_31] : memref<512x256xf32, #tpu.memory_space<vmem>>, vector<512x256xf32>
    %c0_32 = arith.constant 0 : index
    %c0_33 = arith.constant 0 : index
    %55 = vector.load %arg5[%c0_32, %c0_33] : memref<16x9xf32, #tpu.memory_space<vmem>>, vector<16x9xf32>
    %cst_34 = arith.constant dense<0.000000e+00> : vector<256x9xf32>
    %56 = tpu.matmul %53, %55, %cst_34 {dimension_numbers = #tpu.dot_dimension_numbers<[1], [0], [0], [1], [0, 0, 1, 1], [], []>} : vector<256x16xf32>, vector<16x9xf32>, vector<256x9xf32> -> vector<256x9xf32>
    %cst_35 = arith.constant dense<0.000000e+00> : vector<512x9xf32>
    %57 = tpu.matmul %54, %56, %cst_35 {dimension_numbers = #tpu.dot_dimension_numbers<[1], [0], [0], [1], [0, 0, 1, 1], [], []>} : vector<512x256xf32>, vector<256x9xf32>, vector<512x9xf32> -> vector<512x9xf32>
    %c0_36 = arith.constant 0 : index
    %c0_37 = arith.constant 0 : index
    %58 = vector.load %arg14[%c0_36, %c0_37] : memref<512x1xf32, #tpu.memory_space<vmem>>, vector<512x1xf32>
    %59 = vector.broadcast %58 : vector<512x1xf32> to vector<512x9xf32>
    %60 = arith.addf %57, %59 : vector<512x9xf32>
    %cst_38 = arith.constant 0.000000e+00 : f32
    %61 = vector.broadcast %cst_38 : f32 to vector<512x9xf32>
    %62 = arith.cmpf oge, %60, %61 : vector<512x9xf32>
    %cst_39 = arith.constant 2.000000e-01 : f32
    %63 = vector.broadcast %cst_39 : f32 to vector<512x9xf32>
    %64 = arith.mulf %63, %60 : vector<512x9xf32>
    %65 = arith.select %62, %60, %64 : vector<512x9xi1>, vector<512x9xf32>
    %c0_40 = arith.constant 0 : index
    %c0_41 = arith.constant 0 : index
    %66 = vector.load %arg15[%c0_40, %c0_41] : memref<1x512xf32, #tpu.memory_space<vmem>>, vector<1x512xf32>
    %c0_42 = arith.constant 0 : index
    %c0_43 = arith.constant 0 : index
    %67 = vector.load %arg6[%c0_42, %c0_43] : memref<9x25xf32, #tpu.memory_space<vmem>>, vector<9x25xf32>
    %cst_44 = arith.constant dense<0.000000e+00> : vector<512x25xf32>
    %68 = tpu.matmul %65, %67, %cst_44 {dimension_numbers = #tpu.dot_dimension_numbers<[1], [0], [0], [1], [0, 0, 1, 1], [], []>} : vector<512x9xf32>, vector<9x25xf32>, vector<512x25xf32> -> vector<512x25xf32>
    %cst_45 = arith.constant dense<0.000000e+00> : vector<1x25xf32>
    %69 = tpu.matmul %66, %68, %cst_45 {dimension_numbers = #tpu.dot_dimension_numbers<[1], [0], [0], [1], [0, 0, 1, 1], [], []>} : vector<1x512xf32>, vector<512x25xf32>, vector<1x25xf32> -> vector<1x25xf32>
    %c0_46 = arith.constant 0 : index
    %c0_47 = arith.constant 0 : index
    %70 = vector.load %arg16[%c0_46, %c0_47] : memref<1x1xf32, #tpu.memory_space<vmem>>, vector<1x1xf32>
    %71 = vector.broadcast %70 : vector<1x1xf32> to vector<1x25xf32>
    %72 = arith.addf %69, %71 : vector<1x25xf32>
    %cst_48 = arith.constant 0.000000e+00 : f32
    %73 = vector.broadcast %cst_48 : f32 to vector<1x25xf32>
    %74 = arith.cmpf oge, %72, %73 : vector<1x25xf32>
    %cst_49 = arith.constant 2.000000e-01 : f32
    %75 = vector.broadcast %cst_49 : f32 to vector<1x25xf32>
    %76 = arith.mulf %75, %72 : vector<1x25xf32>
    %77 = arith.select %74, %72, %76 : vector<1x25xi1>, vector<1x25xf32>
    %c0_50 = arith.constant 0 : index
    %c0_51 = arith.constant 0 : index
    %c0_52 = arith.constant 0 : index
    %78 = vector.load %arg17[%c0_50, %c0_51, %c0_52] : memref<1x1x25xf32, #tpu.memory_space<vmem>>, vector<1x1x25xf32>
    %79 = vector.shape_cast %78 : vector<1x1x25xf32> to vector<1x25xf32>
    %80 = vector.shape_cast %77 : vector<1x25xf32> to vector<1x1x25xf32>
    tpu.vector_store %arg17[%c0_50, %c0_51, %c0_52], %80 {strides = array<i32>} : memref<1x1x25xf32, #tpu.memory_space<vmem>>, vector<1x1x25xf32>,
    return
  }
  func.func @transform_0(%arg0: i32) -> (i32, i32, i32) {
    %c0_i32 = arith.constant 0 : i32
    %c0_i32_0 = arith.constant 0 : i32
    %c0_i32_1 = arith.constant 0 : i32
    return %arg0, %c0_i32, %c0_i32_0 : i32, i32, i32
  }
  func.func @transform_1(%arg0: i32) -> (i32, i32) {
    %c0_i32 = arith.constant 0 : i32
    %c0_i32_0 = arith.constant 0 : i32
    %c0_i32_1 = arith.constant 0 : i32
    return %c0_i32, %c0_i32_0 : i32, i32
  }
  func.func @transform_2(%arg0: i32) -> (i32, i32) {
    %c0_i32 = arith.constant 0 : i32
    %c0_i32_0 = arith.constant 0 : i32
    %c0_i32_1 = arith.constant 0 : i32
    return %c0_i32, %c0_i32_0 : i32, i32
  }
  func.func @transform_3(%arg0: i32) -> (i32, i32) {
    %c0_i32 = arith.constant 0 : i32
    %c0_i32_0 = arith.constant 0 : i32
    %c0_i32_1 = arith.constant 0 : i32
    return %c0_i32, %c0_i32_0 : i32, i32
  }
  func.func @transform_4(%arg0: i32) -> (i32, i32) {
    %c0_i32 = arith.constant 0 : i32
    %c0_i32_0 = arith.constant 0 : i32
    %c0_i32_1 = arith.constant 0 : i32
    return %c0_i32, %c0_i32_0 : i32, i32
  }
  func.func @transform_5(%arg0: i32) -> (i32, i32) {
    %c0_i32 = arith.constant 0 : i32
    %c0_i32_0 = arith.constant 0 : i32
    %c0_i32_1 = arith.constant 0 : i32
    return %c0_i32, %c0_i32_0 : i32, i32
  }
  func.func @transform_6(%arg0: i32) -> (i32, i32) {
    %c0_i32 = arith.constant 0 : i32
    %c0_i32_0 = arith.constant 0 : i32
    %c0_i32_1 = arith.constant 0 : i32
    return %c0_i32, %c0_i32_0 : i32, i32
  }
  func.func @transform_7(%arg0: i32) -> (i32, i32) {
    %c0_i32 = arith.constant 0 : i32
    %c0_i32_0 = arith.constant 0 : i32
    %c0_i32_1 = arith.constant 0 : i32
    return %c0_i32, %c0_i32_0 : i32, i32
  }
  func.func @transform_8(%arg0: i32) -> (i32, i32) {
    %c0_i32 = arith.constant 0 : i32
    %c0_i32_0 = arith.constant 0 : i32
    %c0_i32_1 = arith.constant 0 : i32
    return %c0_i32, %c0_i32_0 : i32, i32
  }
  func.func @transform_9(%arg0: i32) -> (i32, i32) {
    %c0_i32 = arith.constant 0 : i32
    %c0_i32_0 = arith.constant 0 : i32
    %c0_i32_1 = arith.constant 0 : i32
    return %c0_i32, %c0_i32_0 : i32, i32
  }
  func.func @transform_10(%arg0: i32) -> (i32, i32) {
    %c0_i32 = arith.constant 0 : i32
    %c0_i32_0 = arith.constant 0 : i32
    %c0_i32_1 = arith.constant 0 : i32
    return %c0_i32, %c0_i32_0 : i32, i32
  }
  func.func @transform_11(%arg0: i32) -> (i32, i32) {
    %c0_i32 = arith.constant 0 : i32
    %c0_i32_0 = arith.constant 0 : i32
    %c0_i32_1 = arith.constant 0 : i32
    return %c0_i32, %c0_i32_0 : i32, i32
  }
  func.func @transform_12(%arg0: i32) -> (i32, i32) {
    %c0_i32 = arith.constant 0 : i32
    %c0_i32_0 = arith.constant 0 : i32
    %c0_i32_1 = arith.constant 0 : i32
    return %c0_i32, %c0_i32_0 : i32, i32
  }
  func.func @transform_13(%arg0: i32) -> (i32, i32) {
    %c0_i32 = arith.constant 0 : i32
    %c0_i32_0 = arith.constant 0 : i32
    %c0_i32_1 = arith.constant 0 : i32
    return %c0_i32, %c0_i32_0 : i32, i32
  }
  func.func @transform_14(%arg0: i32) -> (i32, i32) {
    %c0_i32 = arith.constant 0 : i32
    %c0_i32_0 = arith.constant 0 : i32
    %c0_i32_1 = arith.constant 0 : i32
    return %c0_i32, %c0_i32_0 : i32, i32
  }
  func.func @transform_15(%arg0: i32) -> (i32, i32) {
    %c0_i32 = arith.constant 0 : i32
    %c0_i32_0 = arith.constant 0 : i32
    %c0_i32_1 = arith.constant 0 : i32
    return %c0_i32, %c0_i32_0 : i32, i32
  }
  func.func @transform_16(%arg0: i32) -> (i32, i32, i32) {
    %c0_i32 = arith.constant 0 : i32
    %c0_i32_0 = arith.constant 0 : i32
    %c0_i32_1 = arith.constant 0 : i32
    return %arg0, %c0_i32, %c0_i32_0 : i32, i32, i32
  }
}

</mosaic_0001>

<bundles_post_ra>
// kernel: discrimiter_net_forward.1
= control target key start
LH: loop header
LB: loop body
LE: loop exit
PB: predicated region body
PF: predicated region fallthrough
CT: control target
= control target key end

     0   :  { %s7443_s0 = inlined_call_operand.vmem [shape: f32[2,3,256], index: 0, kind: input, shape index: {}]   ;;  %s7444_s1 = inlined_call_operand.hbm [shape: f32[256,81], index: 1, kind: input, shape index: {}]   ;;  %s7445_s2 = inlined_call_operand.vmem [shape: f32[81,36], index: 2, kind: input, shape index: {}]   ;;  %s7446_s3 = inlined_call_operand.hbm [shape: f32[36,16], index: 3, kind: input, shape index: {}]   ;;  %s7447_s4 = inlined_call_operand.vmem [shape: f32[16,9], index: 4, kind: input, shape index: {}]   ;;  %s7448_s5 = inlined_call_operand.hbm [shape: f32[9,25], index: 5, kind: input, shape index: {}]   ;;  %s7449_s6 = inlined_call_operand.vmem [shape: f32[64,3], index: 6, kind: input, shape index: {}]   ;;  %s7450_s7 = inlined_call_operand.vmem [shape: f32[64,1], index: 7, kind: input, shape index: {}]   ;;  %s7451_s8 = inlined_call_operand.vmem [shape: f32[128,64], index: 8, kind: input, shape index: {}]   ;;  %s7452_s9 = inlined_call_operand.vmem [shape: f32[128,1], index: 9, kind: input, shape index: {}]   ;;  %s7453_s10 = inlined_call_operand.vmem [shape: f32[256,128], index: 10, kind: input, shape index: {}]   ;;  %s7454_s11 = inlined_call_operand.vmem [shape: f32[256,1], index: 11, kind: input, shape index: {}]   ;;  %s7455_s12 = inlined_call_operand.vmem [shape: f32[512,256], index: 12, kind: input, shape index: {}]   ;;  %s7456_s13 = inlined_call_operand.vmem [shape: f32[512,1], index: 13, kind: input, shape index: {}]   ;;  %s7457_s14 = inlined_call_operand.hbm [shape: f32[1,512], index: 14, kind: input, shape index: {}]   ;;  %s7458_s15 = inlined_call_operand.<no memory space> [shape: f32[1,1], index: 15, kind: input, shape index: {}]   ;;  %s7459_s16 = inlined_call_operand.vmem [shape: f32[2,1,25], index: 16, kind: output, shape index: {}]  }
   0x1   :  { %7465 = sst [smem:[#allocation14_spill]] %s7443_s0  ;;  %v21_v0 = vstv %s7458_s15 }
   0x2   :  { %7466 = sst [smem:[#allocation15_spill]] %s7447_s4  ;;  %22 = vst [vmem:[#allocation2] sm:$0x1] %v21_v0 }
   0x3   :  { %7467 = sst [smem:[#allocation16_spill]] %s7455_s12 }
   0x4   :  { %7468 = sst [smem:[#allocation17_spill]] %s7459_s16 }
   0x5   :  { %23 = vsyncpa [#allocation4], 0 }
   0x6   :  { %24 = vsyncpa [#allocation6], 0 }
   0x7   :  { %25 = vsyncpa [#allocation9], 0  ;;  %s5947_s23 = smov 0  }
   0x8 LB: > { %7469 = sst [smem:[#allocation13_spill]] %s5846_s23  ;;  %s5953_s24 = sadd.s32 4294967295, %s5846_s23   ;;  %s5846_s23 = sphi %s5947_s23, %s31_s23  }
   0x9   : > { %p4544_p0 = scmp.ge.s32.totalorder %s5846_s23, 1  ;;  %p403_p1 = scmp.lt.s32.totalorder %s5846_s23, 3 }
   0xa   : > { %p7463_p2 = scmp.eq.s32.totalorder %s5953_s24, 0  ;;  %s5848_s25 = smov [#allocation5]  }
   0xb   : > { %p5958_p3 = pnand %p4544_p0, %p403_p1  ;;  %s431_s26 = sshll.u32 %s5848_s25, 4  ;;  %s5962_s26 = int_to_ptr.vmem [resolvable:$true] %s431_s26 }
   0xc   : > { %s5849_s27 = smov [#allocation3]   ;;  %s5850_s30 = smov [#allocation7]  }
   0xd   : > { %s7470_s15 = scalar_select %p5958_p3, 1, 0 }
   0xe   : > { %p5655_p4 = pneg %p5958_p3  ;;  %s415_s28 = sshll.u32 %s5849_s27, 4  ;;  %s5966_s28 = int_to_ptr.vmem [resolvable:$true] %s415_s28 }
   0xf   : > { %s447_s0 = sshll.u32 %s5850_s30, 4  ;;  %s5851_s17 = smov [#allocation8]   ;;  %s5974_s0 = int_to_ptr.vmem [resolvable:$true] %s447_s0 }
  0x10   : > { %p5970_p5 = pnand %p7463_p2, %p5655_p4  ;;  %s5976_s18 = sshll.u32 %s5851_s17, 4  ;;  %s486_s18 = int_to_ptr.vmem [resolvable:$true] %s5976_s18 }
  0x11   : > { %s5716_s21 = scalar_lea.hbm %s7446_s3, 640 }
  0x12   : > { %p5717_p6 = scmp.ne.s32.totalorder %s7446_s3, %s5716_s21  ;;  %p5986_p7 = pneg %p5970_p5 }
  0x13   : > { %p5723_p10 = scmp.lt.u32.totalorder %s5716_s21, %s7446_s3 }
  0x14   : > { %p5719_p8 = pnand %p5986_p7, %p5717_p6 }
  0x16   : > { %p5720_p9 = pneg %p5719_p8 }
  0x18   : > { %p5725_p11 = pnand %p5723_p10, %p5720_p9 }
  0x1a   : > { %5728 = shalt.err (!%p5725_p11)
}
  0x1b   : > { %s5729_s19 = scalar_lea.vmem %s5962_s26, 640  ;;  %p5737_p1 = scmp.lt.s32.totalorder %s5962_s26, %s5962_s26 }
  0x1c   : > { %p5730_p12 = scmp.ne.s32.totalorder %s5962_s26, %s5729_s19  ;;  %p5738_p4 = scmp.lt.s32.totalorder %s5729_s19, %s5729_s19 }
  0x1e   : > { %p5732_p13 = pnand %p5730_p12, %p5986_p7  ;;  %p5739_p6 = por %p5738_p4, %p5737_p1 }
  0x20   : > { %p5733_p0 = pneg %p5732_p13 }
  0x22   : > { %p5740_p8 = pnand %p5739_p6, %p5733_p0 }
  0x24   : > { %5743 = shalt.err (!%p5740_p8)
}
  0x25   : > { %s5852_s20 = smov 128   ;;  %s5853_s21 = smov 8  }
  0x26   : > { %5661 = dma.hbm_to_vmem [thread:$0]  (!%p5970_p5), %s7446_s3, 640, %s5962_s26, [#allocation6], %s5852_s20, %s5852_s20, %s5853_s21  }
  0x27   : > { %s5744_s19 = scalar_lea.hbm %s7444_s1, 4096 }
  0x28   : > { %p5745_p9 = scmp.ne.s32.totalorder %s7444_s1, %s5744_s19  ;;  %p5751_p12 = scmp.lt.u32.totalorder %s5744_s19, %s7444_s1 }
  0x2a   : > { %p5747_p10 = pnand %p5745_p9, %p5986_p7 }
  0x2c   : > { %p5748_p11 = pneg %p5747_p10 }
  0x2e   : > { %p5753_p13 = pnand %p5751_p12, %p5748_p11 }
  0x30   : > { %5756 = shalt.err (!%p5753_p13)
}
  0x31   : > { %s5757_s26 = scalar_lea.vmem %s5966_s28, 4096  ;;  %p5765_p6 = scmp.lt.s32.totalorder %s5966_s28, %s5966_s28 }
  0x32   : > { %p5758_p0 = scmp.ne.s32.totalorder %s5966_s28, %s5757_s26  ;;  %p5766_p8 = scmp.lt.s32.totalorder %s5757_s26, %s5757_s26 }
  0x34   : > { %p5760_p1 = pnand %p5758_p0, %p5986_p7  ;;  %p5767_p9 = por %p5766_p8, %p5765_p6 }
  0x36   : > { %p5761_p4 = pneg %p5760_p1 }
  0x38   : > { %p5768_p10 = pnand %p5767_p9, %p5761_p4 }
  0x3a   : > { %5771 = shalt.err (!%p5768_p10)
}
  0x3b   : > { %5658 = dma.hbm_to_vmem [thread:$0]  (!%p5970_p5), %s7444_s1, 4096, %s5966_s28, [#allocation4], %s5852_s20, %s5852_s20, %s5853_s21  }
  0x3c   : > { %s5772_s22 = scalar_lea.hbm %s7448_s5, 256 }
  0x3d   : > { %p5773_p11 = scmp.ne.s32.totalorder %s7448_s5, %s5772_s22  ;;  %p5779_p0 = scmp.lt.u32.totalorder %s5772_s22, %s7448_s5 }
  0x3f   : > { %p5775_p12 = pnand %p5773_p11, %p5986_p7 }
  0x41   : > { %p5776_p13 = pneg %p5775_p12 }
  0x43   : > { %p5781_p1 = pnand %p5779_p0, %p5776_p13 }
  0x45   : > { %5784 = shalt.err (!%p5781_p1)
}
  0x46   : > { %s5785_s28 = scalar_lea.vmem %s5974_s0, 256  ;;  %p5793_p9 = scmp.lt.s32.totalorder %s5974_s0, %s5974_s0 }
  0x47   : > { %p5786_p4 = scmp.ne.s32.totalorder %s5974_s0, %s5785_s28  ;;  %p5794_p10 = scmp.lt.s32.totalorder %s5785_s28, %s5785_s28 }
  0x49   : > { %p5788_p6 = pnand %p5786_p4, %p5986_p7  ;;  %p5795_p11 = por %p5794_p10, %p5793_p9 }
  0x4b   : > { %p5789_p8 = pneg %p5788_p6 }
  0x4d   : > { %p5796_p12 = pnand %p5795_p11, %p5789_p8 }
  0x4f   : > { %5799 = shalt.err (!%p5796_p12)
}
  0x50   : > { %5664 = dma.hbm_to_vmem [thread:$0]  (!%p5970_p5), %s7448_s5, 256, %s5974_s0, [#allocation6], %s5852_s20, %s5852_s20, %s5853_s21  }
  0x51   : > { %s5800_s23 = scalar_lea.hbm %s7457_s14, 64 }
  0x52   : > { %p5801_p13 = scmp.ne.s32.totalorder %s7457_s14, %s5800_s23  ;;  %p5807_p4 = scmp.lt.u32.totalorder %s5800_s23, %s7457_s14 }
  0x54   : > { %p5803_p0 = pnand %p5801_p13, %p5986_p7 }
  0x56   : > { %p5804_p1 = pneg %p5803_p0 }
  0x58   : > { %p5809_p6 = pnand %p5807_p4, %p5804_p1 }
  0x5a   : > { %5812 = shalt.err (!%p5809_p6)
}
  0x5b   : > { %s5813_s19 = scalar_lea.vmem %s486_s18, 64  ;;  %p5821_p11 = scmp.lt.s32.totalorder %s486_s18, %s486_s18 }
  0x5c   : > { %p5814_p8 = scmp.ne.s32.totalorder %s486_s18, %s5813_s19  ;;  %p5822_p12 = scmp.lt.s32.totalorder %s5813_s19, %s5813_s19 }
  0x5e   : > { %p5816_p9 = pnand %p5814_p8, %p5986_p7  ;;  %p5823_p2 = por %p5822_p12, %p5821_p11 }
  0x60   : > { %p5817_p10 = pneg %p5816_p9 }
  0x62   : > { %p5824_p3 = pnand %p5823_p2, %p5817_p10 }
  0x64   : > { %5827 = shalt.err (!%p5824_p3)
}
  0x65   : > { %5667 = dma.hbm_to_vmem [thread:$0]  (!%p5970_p5), %s7457_s14, 64, %s486_s18, [#allocation9]  }
  0x66   : > { %p7473_p13 = scmp.ne.s32.totalorder %s7470_s15, 0 }
  0x67   : > { %p7474_p0 = scmp.eq.s32.totalorder (!%p7473_p13), %s5953_s24, 0 }
  0x68   : > { %509 = sbr.rel (%p7473_p13) target bundleno = 2599 (0xa27), region = 84 }
  0x6f   : > { %5833 = dma.done.wait (%p7474_p0), [#allocation4], 4096   ;;  %p7475_p7 = pmov %p7474_p0 }
  0x70   : > { %p7476_p1 = pmov %p7474_p0 }
  0x71   : > { %5835 = vsyncadd (%p7475_p7), [#allocation4], 4294963200 }
  0x72   : > { %5837 = dma.done.wait (%p7476_p1), [#allocation6], 896   ;;  %p7477_p2 = pmov %p7474_p0 }
  0x73   : > { %p7478_p3 = pmov %p7474_p0 }
  0x74   : > { %5839 = vsyncadd (%p7477_p2), [#allocation6], 4294966400 }
  0x75   : > { %5841 = dma.done.wait (%p7478_p3), [#allocation9], 64   ;;  %p7479_p5 = pmov %p7474_p0 }
  0x76   : > { %v5854_v1 = vmov 2   ;;  %v5855_v2 = vmov 0   ;;  %v578_v3 = vld [vmem:[%s7449_s6] sm:$0xff]  ;;  %v579_v4 = vld [vmem:[%s7449_s6 + $0x8] sm:$0xff]  ;;  %v580_v5 = vld [vmem:[%s7449_s6 + $0x10] sm:$0xff]  ;;  %v5856_v6 = vmov 1  }
  0x77   : > { %5843 = vsyncadd (%p7479_p5), [#allocation9], 4294967232  ;;  %5696 = vset.pattern.permute.xlu1 %v5854_v1  ;;  %5695 = vset.pattern.permute.xlu0 %v5855_v2  ;;  %v841_v7 = vld [vmem:[#allocation3 + $0x80] sm:$0xff]  ;;  %v842_v8 = vld [vmem:[#allocation3 + $0x88] sm:$0xff]  ;;  %p569_p4 = scmp.lt.s32.totalorder %s5953_s24, 1  ;;  %s7480_s28 = sld [smem:[#allocation14_spill]] }
  0x78   : > { %744 = vperm.xlu1 %5696, %v578_v3   ;;  %588 = vperm.xlu0 %5695, %v578_v3   ;;  %v825_v9 = vld [vmem:[#allocation3] sm:$0xff]  ;;  %v5377_v10 = vpack.c.bf16 %v842_v8, %v841_v7  ;;  %v826_v11 = vld [vmem:[#allocation3 + $0x8] sm:$0xff]  ;;  %v843_v12 = vld [vmem:[#allocation3 + $0x90] sm:$0xff]  ;;  %vm1086_vm0 = vcmask 1040384   ;;  %vm1061_vm2 = vcmask 662528   ;;  %vm1291_vm10 = vcmask 523264  }
  0x79   : > { %v5379_v13 = vpack.c.bf16 %v826_v11, %v825_v9  ;;  %v844_v14 = vld [vmem:[#allocation3 + $0x98] sm:$0xff]  ;;  %v827_v15 = vld [vmem:[#allocation3 + $0x10] sm:$0xff]  ;;  %v845_v19 = vld [vmem:[#allocation3 + $0xa0] sm:$0xff]  ;;  %s7486_s24 = smov (!%p569_p4, %s5953_s24), 1  ;;  %vm1619_vm11 = vcmask 1043456   ;;  %vm1570_vm14 = vcmask 293888  }
  0x7a   : > { %v581_v16 = vld [vmem:[%s7449_s6 + $0x18] sm:$0xff]  ;;  %5378 = vmatprep.subr.bf16.mxu0 %v5377_v10  ;;  %v5381_v17 = vpack.c.bf16 %v844_v14, %v843_v12  ;;  %v846_v21 = vld [vmem:[#allocation3 + $0xa8] sm:$0xff]  ;;  %v829_v23 = vld [vmem:[#allocation3 + $0x20] sm:$0xff]  ;;  %s4698_s0 = sshll.u32 %s7486_s24, 3  ;;  %s7481_s30 = sld [smem:[#allocation15_spill]] }
  0x7b   : > { %v828_v18 = vld [vmem:[#allocation3 + $0x18] sm:$0xff]  ;;  %5380 = vmatpush3.bf16.msra.mxu0 %v5379_v13  ;;  %v5385_v22 = vpack.c.bf16 %v846_v21, %v845_v19  ;;  %v830_v24 = vld [vmem:[#allocation3 + $0x28] sm:$0xff]  ;;  %v847_v25 = vld [vmem:[#allocation3 + $0xb0] sm:$0xff]  ;;  %s7482_s22 = sld [smem:[#allocation16_spill]]  ;;  %s7483_s25 = sld [smem:[#allocation17_spill]] }
  0x7c   : > { %5697 = vset.pattern.permute.xlu1 %v5855_v2  ;;  %5699 = vset.pattern.permute.xlu0 %v5854_v1  ;;  %v5383_v20 = vpack.c.bf16 %v828_v18, %v827_v15  ;;  %v848_v26 = vld [vmem:[#allocation3 + $0xb8] sm:$0xff]  ;;  %v5387_v28 = vpack.c.bf16 %v830_v24, %v829_v23  ;;  %v831_v30 = vld [vmem:[#allocation3 + $0x30] sm:$0xff]  ;;  %v849_v32 = vld [vmem:[#allocation3 + $0xc0] sm:$0xff] }
  0x7d   : > { %593 = vperm.xlu1 %5697, %v579_v4   ;;  %748 = vperm.xlu0 %5699, %v579_v4   ;;  %v582_v27 = vld [vmem:[%s7449_s6 + $0x20] sm:$0xff]  ;;  %v5389_v29 = vpack.c.bf16 %v848_v26, %v847_v25  ;;  %v850_v33 = vld [vmem:[#allocation3 + $0xc8] sm:$0xff]  ;;  %v851_v39 = vld [vmem:[#allocation3 + $0xd0] sm:$0xff]  ;;  %s573_s26 = scalar_lea.vmem %s7480_s28, %s4698_s0 }
  0x7e   : > { %5382 = vmatprep.subr.bf16.mxu0 %v5381_v17  ;;  %v832_v31 = vld [vmem:[#allocation3 + $0x38] sm:$0xff]  ;;  %v583_v34 = vld [vmem:[%s7449_s6 + $0x28] sm:$0xff]  ;;  %v5393_v36 = vpack.c.bf16 %v850_v33, %v849_v32  ;;  %v584_v41 = vld [vmem:[%s7449_s6 + $0x30] sm:$0xff] }
  0x7f   : > { %5384 = vmatpush3.bf16.msra.mxu0 %v5383_v20  ;;  %v5391_v35 = vpack.c.bf16 %v832_v31, %v831_v30  ;;  %v833_v37 = vld [vmem:[#allocation3 + $0x40] sm:$0xff]  ;;  %v834_v38 = vld [vmem:[#allocation3 + $0x48] sm:$0xff]  ;;  %v852_v40 = vld [vmem:[#allocation3 + $0xd8] sm:$0xff]  ;;  %v627_v31 = vlaneseq }
  0x80   : > { %5386 = vmatprep.subr.bf16.mxu0 %v5385_v22  ;;  %v5395_v42 = vpack.c.bf16 %v834_v38, %v833_v37  ;;  %v5397_v43 = vpack.c.bf16 %v852_v40, %v851_v39  ;;  %v835_v44 = vld [vmem:[#allocation3 + $0x50] sm:$0xff]  ;;  %v836_v45 = vld [vmem:[#allocation3 + $0x58] sm:$0xff]  ;;  %v853_v46 = vld [vmem:[#allocation3 + $0xe0] sm:$0xff] }
  0x81   : > { %5698 = vset.pattern.permute.xlu1 %v5856_v6  ;;  %752 = vperm.xlu0 %5699, %v580_v5   ;;  %v854_v47 = vld [vmem:[#allocation3 + $0xe8] sm:$0xff]  ;;  %v5399_v48 = vpack.c.bf16 %v836_v45, %v835_v44  ;;  %v837_v50 = vld [vmem:[#allocation3 + $0x60] sm:$0xff]  ;;  %v855_v52 = vld [vmem:[#allocation3 + $0xf0] sm:$0xff]  ;;  %v6253_v33 = vshrl.u32 %v627_v31, 7  ;;  %s576_s17 = scalar_lea.vmem %s7483_s25, %s7486_s24 }
  0x82   : > { %666 = vperm.xlu1 %5698, %v579_v4   ;;  %v5401_v49 = vpack.c.bf16 %v854_v47, %v853_v46  ;;  %v838_v51 = vld [vmem:[#allocation3 + $0x68] sm:$0xff]  ;;  %v856_v53 = vld [vmem:[#allocation3 + $0xf8] sm:$0xff]  ;;  %v839_v57 = vld [vmem:[#allocation3 + $0x70] sm:$0xff] }
  0x83   : > { %5388 = vmatpush3.bf16.msra.mxu0 %v5387_v28  ;;  %v585_v54 = vld [vmem:[%s7449_s6 + $0x38] sm:$0xff]  ;;  %v5403_v55 = vpack.c.bf16 %v838_v51, %v837_v50  ;;  %v5405_v56 = vpack.c.bf16 %v856_v53, %v855_v52  ;;  %v858_v59 = vld [vmem:[%s7450_s7 + $0x8] sm:$0xff]  ;;  %v861_v61 = vld [vmem:[%s7450_s7 + $0x20] sm:$0xff]  ;;  %v699_v38 = vsub.s32 5, %v6253_v33  ;;  %v6266_v39 = vsub.s32 0, %v6253_v33 }
  0x84   : > { %5390 = vmatprep.subr.bf16.mxu0 %v5389_v29  ;;  %v840_v58 = vld [vmem:[#allocation3 + $0x78] sm:$0xff]  ;;  %v863_v62 = vld [vmem:[%s7450_s7 + $0x30] sm:$0xff]  ;;  %v862_v9 = vld [vmem:[%s7450_s7 + $0x28] sm:$0xff]  ;;  %v633_v40 = vsub.s32 4, %v6253_v33  ;;  %v781_v44 = vsub.s32 6, %v6253_v33  ;;  %v6280_v46 = vsub.s32 1, %v6253_v33 }
  0x85   : > { %5702 = vset.pattern.permute.xlu0 %v5856_v6  ;;  %v5407_v60 = vpack.c.bf16 %v840_v58, %v839_v57  ;;  %v1195_v63 = vld [vmem:[%s7452_s9] sm:$0xff]  ;;  %v1197_v0 = vld [vmem:[%s7452_s9 + $0x10] sm:$0xff]  ;;  %v864_v11 = vld [vmem:[%s7450_s7 + $0x38] sm:$0xff] }
  0x86   : > { %5700 = vset.pattern.permute.xlu1 %v5855_v2  ;;  %662 = vperm.xlu0 %5702, %v578_v3   ;;  %v1201_v3 = vld [vmem:[%s7452_s9 + $0x30] sm:$0xff]  ;;  %v857_v4 = vld [vmem:[%s7450_s7] sm:$0xff]  ;;  %v1196_v13 = vld [vmem:[%s7452_s9 + $0x8] sm:$0xff] }
  0x87   : > { %598 = vperm.xlu1 %5700, %v580_v5   ;;  %5392 = vmatpush3.bf16.msra.mxu0 %v5391_v35  ;;  %v1205_v7 = vld [vmem:[%s7452_s9 + $0x50] sm:$0xff]  ;;  %v1207_v8 = vld [vmem:[%s7452_s9 + $0x60] sm:$0xff]  ;;  %v1198_v15 = vld [vmem:[%s7452_s9 + $0x18] sm:$0xff] }
  0x88   : > { %5394 = vmatprep.subr.bf16.mxu0 %v5393_v36  ;;  %v1209_v10 = vld [vmem:[%s7452_s9 + $0x70] sm:$0xff]  ;;  %v1768_v12 = vld [vmem:[%s7454_s11] sm:$0xff]  ;;  %v1200_v17 = vld [vmem:[%s7452_s9 + $0x28] sm:$0xff] }
  0x89   : > { %v1770_v14 = vld [vmem:[%s7454_s11 + $0x10] sm:$0xff]  ;;  %v1202_v19 = vld [vmem:[%s7452_s9 + $0x38] sm:$0xff]  ;;  %v1776_v20 = vld [vmem:[%s7454_s11 + $0x40] sm:$0xff] }
  0x8a   : > { %674 = vperm.xlu0 %5702, %v581_v16   ;;  %v1774_v18 = vld [vmem:[%s7454_s11 + $0x30] sm:$0xff]  ;;  %v1204_v21 = vld [vmem:[%s7452_s9 + $0x48] sm:$0xff]  ;;  %v1206_v23 = vld [vmem:[%s7452_s9 + $0x58] sm:$0xff] }
  0x8b   : > { %5701 = vset.pattern.permute.xlu1 %v5856_v6  ;;  %5396 = vmatpush3.bf16.msra.mxu0 %v5395_v42  ;;  %v1778_v22 = vld [vmem:[%s7454_s11 + $0x50] sm:$0xff]  ;;  %v1780_v24 = vld [vmem:[%s7454_s11 + $0x60] sm:$0xff]  ;;  %v1208_v25 = vld [vmem:[%s7452_s9 + $0x68] sm:$0xff]  ;;  %v6273_v42 = vsub.s32 2, %v6253_v33 }
  0x8c   : > { %670 = vperm.xlu1 %5701, %v580_v5   ;;  %5398 = vmatprep.subr.bf16.mxu0 %v5397_v43  ;;  %v1203_v5 = vld [vmem:[%s7452_s9 + $0x40] sm:$0xff]  ;;  %v1782_v26 = vld [vmem:[%s7454_s11 + $0x70] sm:$0xff]  ;;  %v1769_v29 = vld [vmem:[%s7454_s11 + $0x8] sm:$0xff] }
  0x8d   : > { %v1784_v28 = vld [vmem:[%s7454_s11 + $0x80] sm:$0xff]  ;;  %v1786_v30 = vld [vmem:[%s7454_s11 + $0x90] sm:$0xff]  ;;  %v1771_v32 = vld [vmem:[%s7454_s11 + $0x18] sm:$0xff] }
  0x8e   : > { %678 = vperm.xlu0 %5702, %v582_v27   ;;  %v1773_v37 = vld [vmem:[%s7454_s11 + $0x28] sm:$0xff]  ;;  %v577_v43 = vld [vmem:[%s573_s26] sm:$0x77]  ;;  %v1775_v45 = vld [vmem:[%s7454_s11 + $0x38] sm:$0xff] }
  0x8f   : > { %5400 = vmatpush3.bf16.msra.mxu0 %v5399_v48  ;;  %v630_v50 = vrot.slane %v577_v43, %v6266_v39  ;;  %v634_v51 = vrot.slane %v577_v43, %v633_v40  ;;  %v1792_v52 = vld [vmem:[%s7454_s11 + $0xc0] sm:$0xff]  ;;  %v778_v53 = vrot.slane %v577_v43, %v6273_v42 }
  0x90   : > { %5703 = vset.pattern.permute.xlu1 %v5855_v2  ;;  %5402 = vmatprep.subr.bf16.mxu0 %v5401_v49  ;;  %v700_v49 = vrot.slane %v577_v43, %v699_v38 }
  0x91   : > { %603 = vperm.xlu1 %5703, %v581_v16  }
  0x92   : > { %5707 = vset.pattern.permute.xlu0 %v5855_v2  ;;  %v6292_v57 = vrot.slane %v700_v49, %v6280_v46 }
  0x93   : > { %613 = vperm.xlu0 %5707, %v583_v34   ;;  %5404 = vmatpush3.bf16.msra.mxu0 %v5403_v55  ;;  %v696_v55 = vrot.slane %v577_v43, %v6280_v46 }
  0x94   : > { %5406 = vmatprep.subr.bf16.mxu0 %v5405_v56  ;;  %v1777_v56 = vld [vmem:[%s7454_s11 + $0x48] sm:$0xff] }
  0x95   : > { %5704 = vset.pattern.permute.xlu1 %v5854_v1 }
  0x96   : > { %756 = vperm.xlu1 %5704, %v581_v16   ;;  %v1772_v16 = vld [vmem:[%s7454_s11 + $0x20] sm:$0xff] }
  0x97   : > { %618 = vperm.xlu0 %5707, %v584_v41   ;;  %5408 = vmatpush3.bf16.msra.mxu0 %v5407_v60  ;;  %v6295_v60 = vrot.slane %v630_v50, %v6266_v39 }
  0x9a   : > { %5705 = vset.pattern.permute.xlu1 %v5855_v2 }
  0x9b   : > { %608 = vperm.xlu1 %5705, %v582_v27   ;;  %5711 = vset.pattern.permute.xlu0 %v5854_v1 }
  0x9c   : > { %768 = vperm.xlu0 %5711, %v584_v41  }
  0x9f   : > { %5706 = vset.pattern.permute.xlu1 %v5854_v1 }
  0xa0   : > { %760 = vperm.xlu1 %5706, %v582_v27   ;;  %772 = vperm.xlu0 %5711, %v585_v54   ;;  %v1210_v27 = vld [vmem:[%s7452_s9 + $0x78] sm:$0xff] }
  0xa4   : > { %5708 = vset.pattern.permute.xlu1 %v5856_v6  ;;  %5715 = vset.pattern.permute.xlu0 %v5855_v2 }
  0xa5   : > { %682 = vperm.xlu1 %5708, %v583_v34   ;;  %872 = vperm.xlu0 %5715, %v858_v59  }
  0xa9   : > { %5709 = vset.pattern.permute.xlu1 %v5854_v1  ;;  %887 = vperm.xlu0 %5715, %v861_v61   ;;  %v1199_v1 = vld [vmem:[%s7452_s9 + $0x20] sm:$0xff]  ;;  %v6298_v61 = vrot.slane %v634_v51, %v6266_v39  ;;  %v2735_v51 = vld [vmem:[%s7456_s13 + $0x10] sm:$0xff] }
  0xaa   : > { %764 = vperm.xlu1 %5709, %v583_v34   ;;  %v1788_v34 = vld [vmem:[%s7454_s11 + $0xa0] sm:$0xff] }
  0xad   : > { %897 = vperm.xlu0 %5715, %v863_v62   ;;  %v1794_v62 = vld [vmem:[%s7454_s11 + $0xd0] sm:$0xff] }
  0xae   : > { %5710 = vset.pattern.permute.xlu1 %v5856_v6 }
  0xaf   : > { %686 = vperm.xlu1 %5710, %v584_v41   ;;  %v1790_v41 = vld [vmem:[%s7454_s11 + $0xb0] sm:$0xff] }
  0xb1   : > { %1213 = vperm.xlu0 %5715, %v1195_v63   ;;  %v6304_v63 = vrot.slane %v778_v53, %v6273_v42  ;;  %v1787_v53 = vld [vmem:[%s7454_s11 + $0x98] sm:$0xff] }
  0xb3   : > { %5712 = vset.pattern.permute.xlu1 %v5855_v2 }
  0xb4   : > { %623 = vperm.xlu1 %5712, %v585_v54  }
  0xb5   : > { %1223 = vperm.xlu0 %5715, %v1197_v0  }
  0xb8   : > { %5713 = vset.pattern.permute.xlu1 %v5856_v6  ;;  %v859_v6 = vld [vmem:[%s7450_s7 + $0x10] sm:$0xff] }
  0xb9   : > { %690 = vperm.xlu1 %5713, %v585_v54   ;;  %1233 = vperm.xlu0 %5715, %v1199_v1   ;;  %v782_v54 = vrot.slane %v577_v43, %v781_v44  ;;  %v6310_v1 = vrot.slane %v696_v55, %v6280_v46 }
  0xbb   : > { %v6307_v0 = vrot.slane %v782_v54, %v6273_v42 }
  0xbd   : > { %5714 = vset.pattern.permute.xlu1 %v5855_v2  ;;  %1243 = vperm.xlu0 %5715, %v1201_v3   ;;  %v860_v2 = vld [vmem:[%s7450_s7 + $0x18] sm:$0xff] }
  0xbe   : > { %867 = vperm.xlu1 %5714, %v857_v4   ;;  %v1779_v3 = vld [vmem:[%s7454_s11 + $0x58] sm:$0xff] }
  0xc1   : > { %1253 = vperm.xlu0 %5715, %v1203_v5  }
  0xc2   : > { %877 = vperm.xlu1 %5714, %v859_v6  }
  0xc5   : > { %1263 = vperm.xlu0 %5715, %v1205_v7  }
  0xc6   : > { %882 = vperm.xlu1 %5714, %v860_v2  }
  0xc9   : > { %1273 = vperm.xlu0 %5715, %v1207_v8  }
  0xca   : > { %892 = vperm.xlu1 %5714, %v862_v9  }
  0xcd   : > { %1283 = vperm.xlu0 %5715, %v1209_v10  }
  0xce   : > { %902 = vperm.xlu1 %5714, %v864_v11   ;;  %v1796_v11 = vld [vmem:[%s7454_s11 + $0xe0] sm:$0xff] }
  0xd1   : > { %1802 = vperm.xlu0 %5715, %v1768_v12  }
  0xd2   : > { %1218 = vperm.xlu1 %5714, %v1196_v13  }
  0xd5   : > { %1812 = vperm.xlu0 %5715, %v1770_v14   ;;  %v1781_v14 = vld [vmem:[%s7454_s11 + $0x68] sm:$0xff] }
  0xd6   : > { %1228 = vperm.xlu1 %5714, %v1198_v15  }
  0xd9   : > { %1822 = vperm.xlu0 %5715, %v1772_v16  }
  0xda   : > { %1238 = vperm.xlu1 %5714, %v1200_v17  }
  0xdd   : > { %1832 = vperm.xlu0 %5715, %v1774_v18  }
  0xde   : > { %1248 = vperm.xlu1 %5714, %v1202_v19  }
  0xe1   : > { %1842 = vperm.xlu0 %5715, %v1776_v20  }
  0xe2   : > { %1258 = vperm.xlu1 %5714, %v1204_v21  }
  0xe5   : > { %1852 = vperm.xlu0 %5715, %v1778_v22   ;;  %v1798_v22 = vld [vmem:[%s7454_s11 + $0xf0] sm:$0xff] }
  0xe6   : > { %1268 = vperm.xlu1 %5714, %v1206_v23  }
  0xe9   : > { %1862 = vperm.xlu0 %5715, %v1780_v24  }
  0xea   : > { %1278 = vperm.xlu1 %5714, %v1208_v25  }
  0xed   : > { %1872 = vperm.xlu0 %5715, %v1782_v26  }
  0xee   : > { %1288 = vperm.xlu1 %5714, %v1210_v27  }
  0xf1   : > { %1882 = vperm.xlu0 %5715, %v1784_v28   ;;  %v1783_v28 = vld [vmem:[%s7454_s11 + $0x78] sm:$0xff] }
  0xf2   : > { %1807 = vperm.xlu1 %5714, %v1769_v29  }
  0xf5   : > { %1892 = vperm.xlu0 %5715, %v1786_v30  }
  0xf6   : > { %1817 = vperm.xlu1 %5714, %v1771_v32  }
  0xf7   : > { %v745_v35 = vpop.permute.xlu1 %744  ;;  %v589_v36 = vpop.permute.xlu0 %588 }
  0xf8   : > { %v645_v4 = vmul.f32 %v6295_v60, %v589_v36  ;;  %v646_v5 = vmul.f32 %v6298_v61, %v589_v36  ;;  %v793_v12 = vmul.f32 %v6304_v63, %v745_v35  ;;  %v794_v15 = vmul.f32 %v6307_v0, %v745_v35  ;;  %v2733_v36 = vld [vmem:[%s7456_s13] sm:$0xff] }
  0xf9   : > { %1902 = vperm.xlu0 %5715, %v1788_v34  }
  0xfa   : > { %1827 = vperm.xlu1 %5714, %v1773_v37  }
  0xfc   : > { %v594_v47 = vpop.permute.xlu1 %593  ;;  %v749_v48 = vpop.permute.xlu0 %748 }
  0xfd   : > { %1912 = vperm.xlu0 %5715, %v1790_v41   ;;  %v648_v2 = vmul.f32 %v6298_v61, %v594_v47  ;;  %v796_v16 = vmul.f32 %v6307_v0, %v749_v48  ;;  %v647_v20 = vmul.f32 %v6295_v60, %v594_v47  ;;  %v795_v24 = vmul.f32 %v6304_v63, %v749_v48  ;;  %v1785_v41 = vld [vmem:[%s7454_s11 + $0x88] sm:$0xff] }
  0xfe   : > { %1837 = vperm.xlu1 %5714, %v1775_v45  }
 0x100   : > { %v753_v58 = vpop.permute.xlu0 %752 }
 0x101   : > { %v667_v59 = vpop.permute.xlu1 %666  ;;  %1922 = vperm.xlu0 %5715, %v1792_v52   ;;  %v798_v26 = vmul.f32 %v6307_v0, %v753_v58  ;;  %v797_v37 = vmul.f32 %v6304_v63, %v753_v58 }
 0x102   : > { %1847 = vperm.xlu1 %5714, %v1777_v56   ;;  %v714_v6 = vmul.f32 %v6292_v57, %v667_v59  ;;  %v713_v13 = vmul.f32 %v6310_v1, %v667_v59 }
 0x104   : > { %v730_v17 = vadd.f32 %v714_v6, %v648_v2  ;;  %v729_v25 = vadd.f32 %v713_v13, %v647_v20  ;;  %v2741_v13 = vld [vmem:[%s7456_s13 + $0x40] sm:$0xff] }
 0x105   : > { %1932 = vperm.xlu0 %5715, %v1794_v62   ;;  %v663_v7 = vpop.permute.xlu0 %662  ;;  %v2737_v62 = vld [vmem:[%s7456_s13 + $0x20] sm:$0xff] }
 0x106   : > { %v711_v8 = vmul.f32 %v6310_v1, %v663_v7  ;;  %v712_v9 = vmul.f32 %v6292_v57, %v663_v7  ;;  %1857 = vperm.xlu1 %5714, %v1779_v3   ;;  %v599_v10 = vpop.permute.xlu1 %598  ;;  %v812_v32 = vadd.f32 %v796_v16, %v730_v17  ;;  %v811_v40 = vadd.f32 %v795_v24, %v729_v25  ;;  %v1789_v3 = vld [vmem:[%s7454_s11 + $0xa8] sm:$0xff]  ;;  %v2739_v7 = vld [vmem:[%s7456_s13 + $0x30] sm:$0xff]  ;;  %v1795_v24 = vld [vmem:[%s7454_s11 + $0xd8] sm:$0xff] }
 0x107   : > { %v650_v29 = vmul.f32 %v6298_v61, %v599_v10  ;;  %v649_v34 = vmul.f32 %v6295_v60, %v599_v10 }
 0x108   : > { %v727_v18 = vadd.f32 %v711_v8, %v645_v4  ;;  %v728_v19 = vadd.f32 %v712_v9, %v646_v5  ;;  %v1791_v8 = vld [vmem:[%s7454_s11 + $0xb8] sm:$0xff] }
 0x109   : > { %1942 = vperm.xlu0 %5715, %v1796_v11   ;;  %v675_v43 = vpop.permute.xlu0 %674 }
 0x10a   : > { %1867 = vperm.xlu1 %5714, %v1781_v14   ;;  %v810_v21 = vadd.f32 %v794_v15, %v728_v19  ;;  %v809_v23 = vadd.f32 %v793_v12, %v727_v18  ;;  %v717_v47 = vmul.f32 %v6310_v1, %v675_v43  ;;  %v718_v48 = vmul.f32 %v6292_v57, %v675_v43  ;;  %v1793_v15 = vld [vmem:[%s7454_s11 + $0xc8] sm:$0xff] }
 0x10b   : > { %v671_v27 = vpop.permute.xlu1 %670 }
 0x10c   : > { %v715_v30 = vmul.f32 %v6310_v1, %v671_v27  ;;  %v716_v31 = vmul.f32 %v6292_v57, %v671_v27  ;;  %969 = vmatprep.mubr.f32.mxu0 %v810_v21 }
 0x10d   : > { %1952 = vperm.xlu0 %5715, %v1798_v22   ;;  %970 = vmatmul.mubr.f32.vlgmr.msra.gmra.mrb[0].mxu0 %v809_v23  ;;  %v679_v2 = vpop.permute.xlu0 %678  ;;  %v2743_v22 = vld [vmem:[%s7456_s13 + $0x50] sm:$0xff] }
 0x10e   : > { %v732_v35 = vadd.f32 %v716_v31, %v650_v29  ;;  %1877 = vperm.xlu1 %5714, %v1783_v28   ;;  %974 = vmatprep.mubr.f32.mxu0 %v812_v32  ;;  %v731_v38 = vadd.f32 %v715_v30, %v649_v34  ;;  %v719_v9 = vmul.f32 %v6310_v1, %v679_v2  ;;  %v2745_v30 = vld [vmem:[%s7456_s13 + $0x60] sm:$0xff]  ;;  %v1797_v31 = vld [vmem:[%s7454_s11 + $0xe8] sm:$0xff] }
 0x10f   : > { %v720_v10 = vmul.f32 %v6292_v57, %v679_v2 }
 0x110   : > { %v604_v44 = vpop.permute.xlu1 %603  ;;  %v814_v45 = vadd.f32 %v798_v26, %v732_v35  ;;  %v813_v52 = vadd.f32 %v797_v37, %v731_v38 }
 0x111   : > { %2799 = vperm.xlu0 %5715, %v2733_v36   ;;  %975 = vmatmul.mubr.f32.gmra.mrb[2].mxu0 %v811_v40  ;;  %v651_v49 = vmul.f32 %v6295_v60, %v604_v44  ;;  %v652_v50 = vmul.f32 %v6298_v61, %v604_v44  ;;  %v2747_v40 = vld [vmem:[%s7456_s13 + $0x70] sm:$0xff] }
 0x112   : > { %1887 = vperm.xlu1 %5714, %v1785_v41   ;;  %979 = vmatprep.mubr.f32.mxu0 %v814_v45  ;;  %v614_v20 = vpop.permute.xlu0 %613  ;;  %v1799_v41 = vld [vmem:[%s7454_s11 + $0xf8] sm:$0xff] }
 0x113   : > { %v733_v55 = vadd.f32 %v717_v47, %v651_v49  ;;  %v734_v56 = vadd.f32 %v718_v48, %v652_v50  ;;  %v655_v26 = vmul.f32 %v6295_v60, %v614_v20  ;;  %v656_v27 = vmul.f32 %v6298_v61, %v614_v20  ;;  %v2749_v50 = vld [vmem:[%s7456_s13 + $0x80] sm:$0xff]  ;;  %v2746_v20 = vld [vmem:[%s7456_s13 + $0x68] sm:$0xff] }
 0x115   : > { %v757_v54 = vpop.permute.xlu1 %756  ;;  %2809 = vperm.xlu0 %5715, %v2735_v51   ;;  %980 = vmatmul.mubr.f32.gmra.mrb[4].mxu0 %v813_v52 }
 0x116   : > { %v799_v58 = vmul.f32 %v6304_v63, %v757_v54  ;;  %v800_v59 = vmul.f32 %v6307_v0, %v757_v54  ;;  %1897 = vperm.xlu1 %5714, %v1787_v53   ;;  %v619_v32 = vpop.permute.xlu0 %618 }
 0x117   : > { %v657_v45 = vmul.f32 %v6295_v60, %v619_v32  ;;  %v658_v47 = vmul.f32 %v6298_v61, %v619_v32  ;;  %v2754_v32 = vld [vmem:[%s7456_s13 + $0xa8] sm:$0xff] }
 0x118   : > { %v816_v4 = vadd.f32 %v800_v59, %v734_v56  ;;  %v815_v5 = vadd.f32 %v799_v58, %v733_v55  ;;  %v2734_v55 = vld [vmem:[%s7456_s13 + $0x8] sm:$0xff]  ;;  %v2751_v59 = vld [vmem:[%s7456_s13 + $0x90] sm:$0xff] }
 0x119   : > { %2819 = vperm.xlu0 %5715, %v2737_v62  }
 0x11a   : > { %1907 = vperm.xlu1 %5714, %v1789_v3   ;;  %v609_v6 = vpop.permute.xlu1 %608  ;;  %984 = vmatprep.mubr.f32.mxu0 %v816_v4  ;;  %v2736_v4 = vld [vmem:[%s7456_s13 + $0x18] sm:$0xff] }
 0x11b   : > { %985 = vmatmul.mubr.f32.gmra.mrb[6].mxu0 %v815_v5  ;;  %v653_v11 = vmul.f32 %v6295_v60, %v609_v6  ;;  %v654_v12 = vmul.f32 %v6298_v61, %v609_v6  ;;  %v769_v48 = vpop.permute.xlu0 %768  ;;  %v2753_v6 = vld [vmem:[%s7456_s13 + $0xa0] sm:$0xff] }
 0x11c   : > { %v805_v51 = vmul.f32 %v6304_v63, %v769_v48  ;;  %v806_v52 = vmul.f32 %v6307_v0, %v769_v48  ;;  %v1056_v48 = vld [vmem:[%s7445_s2 + $0x30] sm:$0xff] }
 0x11d   : > { %2829 = vperm.xlu0 %5715, %v2739_v7   ;;  %v735_v16 = vadd.f32 %v719_v9, %v653_v11  ;;  %v736_v17 = vadd.f32 %v720_v10, %v654_v12  ;;  %v2738_v7 = vld [vmem:[%s7456_s13 + $0x28] sm:$0xff] }
 0x11e   : > { %1917 = vperm.xlu1 %5714, %v1791_v8  }
 0x11f   : > { %v761_v14 = vpop.permute.xlu1 %760  ;;  %v773_v12 = vpop.permute.xlu0 %772 }
 0x120   : > { %v801_v18 = vmul.f32 %v6304_v63, %v761_v14  ;;  %v802_v19 = vmul.f32 %v6307_v0, %v761_v14  ;;  %v807_v14 = vmul.f32 %v6304_v63, %v773_v12 }
 0x121   : > { %2839 = vperm.xlu0 %5715, %v2741_v13   ;;  %v2755_v13 = vld [vmem:[%s7456_s13 + $0xb0] sm:$0xff] }
 0x122   : > { %1927 = vperm.xlu1 %5714, %v1793_v15   ;;  %v818_v21 = vadd.f32 %v802_v19, %v736_v17  ;;  %v817_v23 = vadd.f32 %v801_v18, %v735_v16  ;;  %v808_v15 = vmul.f32 %v6307_v0, %v773_v12  ;;  %v2744_v18 = vld [vmem:[%s7456_s13 + $0x58] sm:$0xff]  ;;  %v2761_v19 = vld [vmem:[%s7456_s13 + $0xe0] sm:$0xff] }
 0x123   : > { %v2768_v12 = vld [vmem:[%s7456_s13 + $0x118] sm:$0xff] }
 0x124   : > { %v683_v25 = vpop.permute.xlu1 %682  ;;  %989 = vmatprep.mubr.f32.mxu0 %v818_v21  ;;  %v2763_v21 = vld [vmem:[%s7456_s13 + $0xf0] sm:$0xff] }
 0x125   : > { %2849 = vperm.xlu0 %5715, %v2743_v22   ;;  %990 = vmatmul.mubr.f32.gmra.mrb[8].mxu0 %v817_v23  ;;  %v721_v28 = vmul.f32 %v6310_v1, %v683_v25  ;;  %v722_v29 = vmul.f32 %v6292_v57, %v683_v25  ;;  %v2748_v22 = vld [vmem:[%s7456_s13 + $0x78] sm:$0xff]  ;;  %v2765_v23 = vld [vmem:[%s7456_s13 + $0x100] sm:$0xff]  ;;  %v2767_v25 = vld [vmem:[%s7456_s13 + $0x110] sm:$0xff] }
 0x126   : > { %1937 = vperm.xlu1 %5714, %v1795_v24   ;;  %v2750_v24 = vld [vmem:[%s7456_s13 + $0x88] sm:$0xff] }
 0x127   : > { %v737_v35 = vadd.f32 %v721_v28, %v655_v26  ;;  %v738_v36 = vadd.f32 %v722_v29, %v656_v27  ;;  %v2752_v26 = vld [vmem:[%s7456_s13 + $0x98] sm:$0xff]  ;;  %v1050_v27 = vld [vmem:[%s7445_s2] sm:$0xff]  ;;  %v1051_v28 = vld [vmem:[%s7445_s2 + $0x8] sm:$0xff]  ;;  %v6489_v29 = vpop.permute.xlu0 %872 }
 0x129   : > { %v765_v34 = vpop.permute.xlu1 %764  ;;  %2859 = vperm.xlu0 %5715, %v2745_v30   ;;  %v5409_v30 = vpack.c.bf16 %v1051_v28, %v1050_v27  ;;  %v4278_v27 = vld [vmem:[#allocation2] sm:$0x1]  ;;  %v2782_v28 = vld [vmem:[%s7456_s13 + $0x188] sm:$0xff] }
 0x12a   : > { %v803_v37 = vmul.f32 %v6304_v63, %v765_v34  ;;  %v804_v38 = vmul.f32 %v6307_v0, %v765_v34  ;;  %1947 = vperm.xlu1 %5714, %v1797_v31   ;;  %v2742_v63 = vld [vmem:[%s7456_s13 + $0x48] sm:$0xff]  ;;  %v2759_v0 = vld [vmem:[%s7456_s13 + $0xd0] sm:$0xff]  ;;  %v2769_v31 = vld [vmem:[%s7456_s13 + $0x120] sm:$0xff] }
 0x12b   : > { %5410 = vmatprep.subr.bf16.mxu1 %v5409_v30  ;;  %v1052_v34 = vld [vmem:[%s7445_s2 + $0x10] sm:$0xff] }
 0x12c   : > { %v820_v43 = vadd.f32 %v804_v38, %v738_v36  ;;  %v819_v44 = vadd.f32 %v803_v37, %v737_v35  ;;  %5412 = vmatpush3.bf16.msra.mxu1 %v5409_v30  ;;  %v1053_v35 = vld [vmem:[%s7445_s2 + $0x18] sm:$0xff]  ;;  %v2771_v37 = vld [vmem:[%s7456_s13 + $0x130] sm:$0xff]  ;;  %v6506_v38 = vpop.permute.xlu0 %887 }
 0x12d   : > { %2869 = vperm.xlu0 %5715, %v2747_v40   ;;  %v5413_v36 = vpack.c.bf16 %v1053_v35, %v1052_v34  ;;  %v2756_v40 = vld [vmem:[%s7456_s13 + $0xb8] sm:$0xff]  ;;  %v2786_v35 = vld [vmem:[%s7456_s13 + $0x1a8] sm:$0xff] }
 0x12e   : > { %1957 = vperm.xlu1 %5714, %v1799_v41   ;;  %v687_v49 = vpop.permute.xlu1 %686  ;;  %994 = vmatprep.mubr.f32.mxu0 %v820_v43  ;;  %v1054_v41 = vld [vmem:[%s7445_s2 + $0x20] sm:$0xff]  ;;  %v1055_v43 = vld [vmem:[%s7445_s2 + $0x28] sm:$0xff] }
 0x12f   : > { %v723_v53 = vmul.f32 %v6310_v1, %v687_v49  ;;  %v724_v54 = vmul.f32 %v6292_v57, %v687_v49  ;;  %995 = vmatmul.mubr.f32.gmra.mrb[10].mxu0 %v819_v44  ;;  %5414 = vmatprep.subr.bf16.mxu1 %v5413_v36  ;;  %v5417_v44 = vpack.c.bf16 %v1055_v43, %v1054_v41  ;;  %v1057_v49 = vld [vmem:[%s7445_s2 + $0x38] sm:$0xff] }
 0x130   : > { %5416 = vmatpush3.bf16.msra.mxu1 %v5413_v36  ;;  %v2788_v36 = vld [vmem:[%s7456_s13 + $0x1b8] sm:$0xff] }
 0x131   : > { %v739_v56 = vadd.f32 %v723_v53, %v657_v45  ;;  %v740_v58 = vadd.f32 %v724_v54, %v658_v47  ;;  %2879 = vperm.xlu0 %5715, %v2749_v50   ;;  %v2773_v45 = vld [vmem:[%s7456_s13 + $0x140] sm:$0xff]  ;;  %v2758_v47 = vld [vmem:[%s7456_s13 + $0xc8] sm:$0xff]  ;;  %5418 = vmatprep.subr.bf16.mxu1 %v5417_v44  ;;  %v6529_v50 = vpop.permute.xlu0 %897  ;;  %v2760_v53 = vld [vmem:[%s7456_s13 + $0xd8] sm:$0xff] }
 0x132   : > { %2804 = vperm.xlu1 %5714, %v2734_v55   ;;  %v1058_v54 = vld [vmem:[%s7445_s2 + $0x40] sm:$0xff]  ;;  %v1059_v55 = vld [vmem:[%s7445_s2 + $0x48] sm:$0xff]  ;;  %v2792_v43 = vld [vmem:[%s7456_s13 + $0x1d8] sm:$0xff] }
 0x133   : > { %v624_v62 = vpop.permute.xlu1 %623  ;;  %v822_v3 = vadd.f32 %v806_v52, %v740_v58  ;;  %v821_v5 = vadd.f32 %v805_v51, %v739_v56  ;;  %v5421_v51 = vpack.c.bf16 %v1057_v49, %v1056_v48  ;;  %v2775_v52 = vld [vmem:[%s7456_s13 + $0x150] sm:$0xff]  ;;  %v5425_v56 = vpack.c.bf16 %v1059_v55, %v1058_v54  ;;  %v2777_v58 = vld [vmem:[%s7456_s13 + $0x160] sm:$0xff] }
 0x134   : > { %v659_v8 = vmul.f32 %v6295_v60, %v624_v62  ;;  %v660_v9 = vmul.f32 %v6298_v61, %v624_v62  ;;  %v2740_v60 = vld [vmem:[%s7456_s13 + $0x38] sm:$0xff]  ;;  %5420 = vmatpush3.bf16.msra.mxu1 %v5417_v44  ;;  %v2762_v62 = vld [vmem:[%s7456_s13 + $0xe8] sm:$0xff] }
 0x135   : > { %2889 = vperm.xlu0 %5715, %v2751_v59   ;;  %999 = vmatprep.mubr.f32.mxu0 %v822_v3  ;;  %v6546_v59 = vpop.permute.xlu0 %1213  ;;  %v2779_v3 = vld [vmem:[%s7456_s13 + $0x170] sm:$0xff]  ;;  %v2794_v44 = vld [vmem:[%s7456_s13 + $0x1e8] sm:$0xff] }
 0x136   : > { %2814 = vperm.xlu1 %5714, %v2736_v4   ;;  %1000 = vmatmul.mubr.f32.gmra.mrb[12].mxu0 %v821_v5  ;;  %v1060_v4 = vld [vmem:[%s7445_s2 + $0x50] sm:$0x1]  ;;  %v2764_v5 = vld [vmem:[%s7456_s13 + $0xf8] sm:$0xff] }
 0x137   : > { %5422 = vmatprep.subr.bf16.mxu1 %v5421_v51 }
 0x138   : > { %v691_v2 = vpop.permute.xlu1 %690  ;;  %5424 = vmatpush3.bf16.msra.mxu1 %v5421_v51 }
 0x139   : > { %v725_v10 = vmul.f32 %v6310_v1, %v691_v2  ;;  %v726_v11 = vmul.f32 %v6292_v57, %v691_v2  ;;  %2899 = vperm.xlu0 %5715, %v2753_v6   ;;  %v2757_v1 = vld [vmem:[%s7456_s13 + $0xc0] sm:$0xff]  ;;  %5426 = vmatprep.subr.bf16.mxu1 %v5425_v56 }
 0x13a   : > { %2824 = vperm.xlu1 %5714, %v2738_v7   ;;  %v6564_v7 = vpop.permute.xlu0 %1223  ;;  %v2781_v2 = vld [vmem:[%s7456_s13 + $0x180] sm:$0xff] }
 0x13b   : > { %v741_v16 = vadd.f32 %v725_v10, %v659_v8  ;;  %v742_v17 = vadd.f32 %v726_v11, %v660_v9  ;;  %v2766_v8 = vld [vmem:[%s7456_s13 + $0x108] sm:$0xff]  ;;  %v2783_v10 = vld [vmem:[%s7456_s13 + $0x190] sm:$0xff] }
 0x13c   : > { %5428 = vmatpush3.bf16.msra.mxu1 %v5425_v56 }
 0x13d   : > { %2909 = vperm.xlu0 %5715, %v2755_v13   ;;  %v824_v61 = vadd.f32 %v808_v15, %v742_v17  ;;  %v823_v57 = vadd.f32 %v807_v14, %v741_v16  ;;  %5057 = vmatprep.subr.msk.mxu1 %vm1086_vm0, %v1060_v4  ;;  %v6561_v6 = vpop.permute.xlu1 %867  ;;  %v2785_v13 = vld [vmem:[%s7456_s13 + $0x1a0] sm:$0xff]  ;;  %v2770_v14 = vld [vmem:[%s7456_s13 + $0x128] sm:$0xff]  ;;  %v2787_v17 = vld [vmem:[%s7456_s13 + $0x1b0] sm:$0xff] }
 0x13e   : > { %2834 = vperm.xlu1 %5714, %v2740_v60   ;;  %v6577_v11 = vpop.permute.xlu0 %1233  ;;  %v2772_v60 = vld [vmem:[%s7456_s13 + $0x138] sm:$0xff] }
 0x13f   : > { %1004 = vmatprep.mubr.f32.mxu0 %v824_v61 }
 0x140   : > { %1005 = vmatmul.mubr.f32.gmra.mrb[14].mxu0 %v823_v57  ;;  %5058 = vmatpush3.msk.msra.mxu1 %vm1086_vm0, %v1060_v4  ;;  %v2789_v57 = vld [vmem:[%s7456_s13 + $0x1c0] sm:$0xff] }
 0x141   : > { %2919 = vperm.xlu0 %5715, %v2757_v1   ;;  %v6572_v9 = vpop.permute.xlu1 %877 }
 0x142   : > { %2844 = vperm.xlu1 %5714, %v2742_v63   ;;  %v6590_v16 = vpop.permute.xlu0 %1243  ;;  %v2774_v63 = vld [vmem:[%s7456_s13 + $0x148] sm:$0xff] }
 0x145   : > { %2929 = vperm.xlu0 %5715, %v2759_v0   ;;  %v6588_v15 = vpop.permute.xlu1 %882  ;;  %v2791_v0 = vld [vmem:[%s7456_s13 + $0x1d0] sm:$0xff] }
 0x146   : > { %2854 = vperm.xlu1 %5714, %v2744_v18   ;;  %v6603_v1 = vpop.permute.xlu0 %1253  ;;  %v2776_v18 = vld [vmem:[%s7456_s13 + $0x158] sm:$0xff] }
 0x149   : > { %2939 = vperm.xlu0 %5715, %v2761_v19   ;;  %v6598_v61 = vpop.permute.xlu1 %892 }
 0x14a   : > { %2864 = vperm.xlu1 %5714, %v2746_v20   ;;  %v6616_v20 = vpop.permute.xlu0 %1263 }
 0x14d   : > { %2949 = vperm.xlu0 %5715, %v2763_v21   ;;  %v6614_v19 = vpop.permute.xlu1 %902  ;;  %v2793_v21 = vld [vmem:[%s7456_s13 + $0x1e0] sm:$0xff] }
 0x14e   : > { %2874 = vperm.xlu1 %5714, %v2748_v22   ;;  %v2778_v22 = vld [vmem:[%s7456_s13 + $0x168] sm:$0xff] }
 0x151   : > { %2959 = vperm.xlu0 %5715, %v2765_v23   ;;  %v6624_v23 = vpop.permute.xlu1 %1218 }
 0x152   : > { %2884 = vperm.xlu1 %5714, %v2750_v24   ;;  %v2795_v24 = vld [vmem:[%s7456_s13 + $0x1f0] sm:$0xff] }
 0x155   : > { %2969 = vperm.xlu0 %5715, %v2767_v25   ;;  %v6629_v25 = vpop.permute.xlu0 %1273  ;;  %v6637_v30 = vpop.permute.xlu1 %1228 }
 0x156   : > { %2894 = vperm.xlu1 %5714, %v2752_v26   ;;  %v2780_v26 = vld [vmem:[%s7456_s13 + $0x178] sm:$0xff] }
 0x159   : > { %2979 = vperm.xlu0 %5715, %v2769_v31   ;;  %v6639_v31 = vpop.permute.xlu0 %1283  ;;  %v6644_v34 = vpop.permute.xlu1 %1238 }
 0x15a   : > { %2904 = vperm.xlu1 %5714, %v2754_v32   ;;  %v2784_v32 = vld [vmem:[%s7456_s13 + $0x198] sm:$0xff] }
 0x15d   : > { %2989 = vperm.xlu0 %5715, %v2771_v37   ;;  %v6652_v37 = vpop.permute.xlu1 %1248 }
 0x15e   : > { %2914 = vperm.xlu1 %5714, %v2756_v40   ;;  %v2790_v40 = vld [vmem:[%s7456_s13 + $0x1c8] sm:$0xff] }
 0x161   : > { %2999 = vperm.xlu0 %5715, %v2773_v45   ;;  %v6657_v41 = vpop.permute.xlu1 %1258 }
 0x162   : > { %2924 = vperm.xlu1 %5714, %v2758_v47   ;;  %v2796_v47 = vld [vmem:[%s7456_s13 + $0x1f8] sm:$0xff] }
 0x165   : > { %3009 = vperm.xlu0 %5715, %v2775_v52   ;;  %v6665_v45 = vpop.permute.xlu1 %1268 }
 0x166   : > { %2934 = vperm.xlu1 %5714, %v2760_v53  }
 0x169   : > { %3019 = vperm.xlu0 %5715, %v2777_v58   ;;  %v6670_v48 = vpop.permute.xlu1 %1278 }
 0x16a   : > { %2944 = vperm.xlu1 %5714, %v2762_v62  }
 0x16d   : > { %3029 = vperm.xlu0 %5715, %v2779_v3  }
 0x16e   : > { %2954 = vperm.xlu1 %5714, %v2764_v5  }
 0x171   : > { %3039 = vperm.xlu0 %5715, %v2781_v2  }
 0x172   : > { %2964 = vperm.xlu1 %5714, %v2766_v8  }
 0x175   : > { %3049 = vperm.xlu0 %5715, %v2783_v10  }
 0x176   : > { %2974 = vperm.xlu1 %5714, %v2768_v12  }
 0x179   : > { %3059 = vperm.xlu0 %5715, %v2785_v13  }
 0x17a   : > { %2984 = vperm.xlu1 %5714, %v2770_v14  }
 0x17d   : > { %3069 = vperm.xlu0 %5715, %v2787_v17  }
 0x17e   : > { %2994 = vperm.xlu1 %5714, %v2772_v60  }
 0x181   : > { %3079 = vperm.xlu0 %5715, %v2789_v57  }
 0x182   : > { %3004 = vperm.xlu1 %5714, %v2774_v63  }
 0x185   : > { %3089 = vperm.xlu0 %5715, %v2791_v0  }
 0x186   : > { %3014 = vperm.xlu1 %5714, %v2776_v18  }
 0x189   : > { %3099 = vperm.xlu0 %5715, %v2793_v21  }
 0x18a   : > { %3024 = vperm.xlu1 %5714, %v2778_v22  }
 0x18d   : > { %3109 = vperm.xlu0 %5715, %v2795_v24  }
 0x18e   : > { %3034 = vperm.xlu1 %5714, %v2780_v26  }
 0x191   : > { %4281 = vperm.xlu0 %5715, %v4278_v27  }
 0x192   : > { %3044 = vperm.xlu1 %5714, %v2782_v28  }
 0x196   : > { %3054 = vperm.xlu1 %5714, %v2784_v32  }
 0x19a   : > { %3064 = vperm.xlu1 %5714, %v2786_v35  }
 0x19e   : > { %3074 = vperm.xlu1 %5714, %v2788_v36  }
 0x1a2   : > { %3084 = vperm.xlu1 %5714, %v2790_v40  }
 0x1a6   : > { %3094 = vperm.xlu1 %5714, %v2792_v43  }
 0x1aa   : > { %3104 = vperm.xlu1 %5714, %v2794_v44  }
 0x1ae   : > { %3114 = vperm.xlu1 %5714, %v2796_v47  }
 0x1e0   : > { %v4731_v49 = vpop.f32.mrb[0].mxu0 }
 0x1e1   : > { %v4732_v51 = vpop.f32.mrb[1].mxu0 }
 0x1e2   : > { %v4733_v52 = vadd.f32 %v4732_v51, %v4731_v49 }
 0x1e4   : > { %v972_v53 = vadd.f32 %v4733_v52, %v6561_v6  ;;  %v4734_v54 = vpop.f32.mrb[2].mxu0 }
 0x1e5   : > { %v4735_v55 = vpop.f32.mrb[3].mxu0 }
 0x1e6   : > { %v4736_v56 = vadd.f32 %v4735_v55, %v4734_v54  ;;  %vm1010_vm1 = vcmp.ge.f32.partialorder %v972_v53, 0.0  ;;  %v1018_v58 = vmul.f32 0.2, %v972_v53  ;;  %v1034_v55 = vld [vmem:[%s7451_s8] sm:$0xff] }
 0x1e8   : > { %v977_v62 = vadd.f32 %v4736_v56, %v6489_v29  ;;  %v4737_v3 = vpop.f32.mrb[4].mxu0  ;;  %v1026_v4 = vsel %vm1010_vm1, %v972_v53, %v1018_v58  ;;  %v1566_v56 = vld [vmem:[#allocation5 + $0x8] sm:$0xff]  ;;  %v1567_v58 = vld [vmem:[#allocation5 + $0x10] sm:$0xff] }
 0x1e9   : > { %v4738_v5 = vpop.f32.mrb[5].mxu0  ;;  %5059 = vmatprep.mubr.msk.f32.mxu1 %vm1061_vm2, %v1026_v4 }
 0x1ea   : > { %v1019_v2 = vmul.f32 0.2, %v977_v62  ;;  %v4739_v8 = vadd.f32 %v4738_v5, %v4737_v3  ;;  %vm1011_vm3 = vcmp.ge.f32.partialorder %v977_v62, 0.0  ;;  %v1568_v3 = vld [vmem:[#allocation5 + $0x18] sm:$0xff] }
 0x1eb   : > { %v5449_v4 = vpack.c.bf16 %v1568_v3, %v1567_v58 }
 0x1ec   : > { %v982_v10 = vadd.f32 %v4739_v8, %v6572_v9  ;;  %v1027_v12 = vsel %vm1011_vm3, %v977_v62, %v1019_v2 }
 0x1ed   : > { %5060 = vmatmul.mubr.msk.f32.vlgmr.msra.gmra.mrb[0].mxu1 %vm1061_vm2, %v1027_v12 }
 0x1ee   : > { %v1020_v6 = vmul.f32 0.2, %v982_v10  ;;  %v4740_v13 = vpop.f32.mrb[6].mxu0  ;;  %vm1012_vm4 = vcmp.ge.f32.partialorder %v982_v10, 0.0 }
 0x1ef   : > { %v4741_v14 = vpop.f32.mrb[7].mxu0 }
 0x1f0   : > { %v4742_v17 = vadd.f32 %v4741_v14, %v4740_v13  ;;  %v1028_v60 = vsel %vm1012_vm4, %v982_v10, %v1020_v6 }
 0x1f1   : > { %5062 = vmatprep.mubr.msk.f32.mxu1 %vm1061_vm2, %v1028_v60 }
 0x1f2   : > { %v987_v29 = vadd.f32 %v4742_v17, %v6588_v15 }
 0x1f4   : > { %v1021_v57 = vmul.f32 0.2, %v987_v29  ;;  %vm1013_vm5 = vcmp.ge.f32.partialorder %v987_v29, 0.0 }
 0x1f6   : > { %v1029_v63 = vsel %vm1013_vm5, %v987_v29, %v1021_v57 }
 0x1f7   : > { %5063 = vmatmul.mubr.msk.f32.gmra.mrb[2].mxu1 %vm1061_vm2, %v1029_v63  ;;  %v1035_v63 = vld [vmem:[%s7451_s8 + $0x8] sm:$0xff] }
 0x1f8   : > { %v4743_v0 = vpop.f32.mrb[8].mxu0 }
 0x1f9   : > { %v4744_v9 = vpop.f32.mrb[9].mxu0 }
 0x1fa   : > { %v4745_v18 = vadd.f32 %v4744_v9, %v4743_v0  ;;  %v1036_v0 = vld [vmem:[%s7451_s8 + $0x10] sm:$0xff]  ;;  %v1037_v9 = vld [vmem:[%s7451_s8 + $0x18] sm:$0xff] }
 0x1fc   : > { %v992_v21 = vadd.f32 %v4745_v18, %v6506_v38  ;;  %v1038_v18 = vld [vmem:[%s7451_s8 + $0x20] sm:$0xff] }
 0x1fe   : > { %v1022_v22 = vmul.f32 0.2, %v992_v21  ;;  %vm1014_vm6 = vcmp.ge.f32.partialorder %v992_v21, 0.0 }
 0x200   : > { %v1030_v24 = vsel %vm1014_vm6, %v992_v21, %v1022_v22  ;;  %v1039_v21 = vld [vmem:[%s7451_s8 + $0x28] sm:$0xff]  ;;  %v1040_v22 = vld [vmem:[%s7451_s8 + $0x30] sm:$0xff] }
 0x201   : > { %5065 = vmatprep.mubr.msk.f32.mxu1 %vm1061_vm2, %v1030_v24  ;;  %v1041_v24 = vld [vmem:[%s7451_s8 + $0x38] sm:$0xff] }
 0x202   : > { %v4746_v26 = vpop.f32.mrb[10].mxu0 }
 0x203   : > { %v4747_v27 = vpop.f32.mrb[11].mxu0 }
 0x204   : > { %v4748_v28 = vadd.f32 %v4747_v27, %v4746_v26  ;;  %v1042_v26 = vld [vmem:[%s7451_s8 + $0x40] sm:$0xff]  ;;  %v1043_v27 = vld [vmem:[%s7451_s8 + $0x48] sm:$0xff] }
 0x206   : > { %v997_v15 = vadd.f32 %v4748_v28, %v6598_v61  ;;  %v1044_v28 = vld [vmem:[%s7451_s8 + $0x50] sm:$0xff] }
 0x208   : > { %v1023_v32 = vmul.f32 0.2, %v997_v15  ;;  %vm1015_vm7 = vcmp.ge.f32.partialorder %v997_v15, 0.0 }
 0x209   : > { %v4749_v35 = vpop.f32.mrb[12].mxu0 }
 0x20a   : > { %v4750_v36 = vpop.f32.mrb[13].mxu0  ;;  %v1031_v40 = vsel %vm1015_vm7, %v997_v15, %v1023_v32  ;;  %v1045_v15 = vld [vmem:[%s7451_s8 + $0x58] sm:$0xff]  ;;  %v1046_v32 = vld [vmem:[%s7451_s8 + $0x60] sm:$0xff] }
 0x20b   : > { %v4751_v43 = vadd.f32 %v4750_v36, %v4749_v35  ;;  %5066 = vmatmul.mubr.msk.f32.gmra.mrb[4].mxu1 %vm1061_vm2, %v1031_v40  ;;  %v1047_v35 = vld [vmem:[%s7451_s8 + $0x68] sm:$0xff]  ;;  %v1048_v36 = vld [vmem:[%s7451_s8 + $0x70] sm:$0xff]  ;;  %v1049_v40 = vld [vmem:[%s7451_s8 + $0x78] sm:$0xff] }
 0x20d   : > { %v1002_v38 = vadd.f32 %v4751_v43, %v6529_v50  ;;  %v1565_v50 = vld [vmem:[#allocation5] sm:$0xff] }
 0x20e   : > { %v5445_v62 = vpack.c.bf16 %v1566_v56, %v1565_v50 }
 0x20f   : > { %v1024_v44 = vmul.f32 0.2, %v1002_v38  ;;  %vm1016_vm8 = vcmp.ge.f32.partialorder %v1002_v38, 0.0 }
 0x210   : > { %5446 = vmatprep.subr.bf16.mxu0 %v5445_v62 }
 0x211   : > { %v1032_v47 = vsel %vm1016_vm8, %v1002_v38, %v1024_v44  ;;  %5448 = vmatpush3.bf16.msra.mxu0 %v5445_v62 }
 0x212   : > { %5068 = vmatprep.mubr.msk.f32.mxu1 %vm1061_vm2, %v1032_v47  ;;  %5450 = vmatprep.subr.bf16.mxu0 %v5449_v4 }
 0x213   : > { %v4752_v49 = vpop.f32.mrb[14].mxu0 }
 0x214   : > { %v4753_v51 = vpop.f32.mrb[15].mxu0 }
 0x215   : > { %v4754_v52 = vadd.f32 %v4753_v51, %v4752_v49  ;;  %5452 = vmatpush3.bf16.msra.mxu0 %v5449_v4 }
 0x217   : > { %v1007_v61 = vadd.f32 %v4754_v52, %v6614_v19  ;;  %v1569_v19 = vld [vmem:[#allocation5 + $0x20] sm:$0xf] }
 0x218   : > { %5119 = vmatprep.subr.msk.mxu0 %vm1619_vm11, %v1569_v19 }
 0x219   : > { %v1025_v53 = vmul.f32 0.2, %v1007_v61  ;;  %vm1017_vm9 = vcmp.ge.f32.partialorder %v1007_v61, 0.0  ;;  %5120 = vmatpush3.msk.msra.mxu0 %vm1619_vm11, %v1569_v19 }
 0x21b   : > { %v1033_v54 = vsel %vm1017_vm9, %v1007_v61, %v1025_v53 }
 0x21c   : > { %5069 = vmatmul.mubr.msk.f32.gmra.mrb[6].mxu1 %vm1061_vm2, %v1033_v54 }
 0x21d   : > { %5087 = vmatprep.mubr.msk.f32.mxu1 %vm1291_vm10, %v1034_v55 }
 0x2c0   : > { %v5061_v5 = vpop.f32.mrb[0].mxu1 }
 0x2c1   : > { %v1156_v2 = vpop.f32.mrb[1].mxu1 }
 0x2c2   : > { %v5429_v8 = vpack.c.bf16 %v5061_v5, %v1156_v2 }
 0x2c4   : > { %5430 = vmatprep.subr.bf16.mxu1 %v5429_v8 }
 0x2c5   : > { %5432 = vmatpush3.bf16.msra.mxu1 %v5429_v8 }
 0x2ca   : > { %v5064_v10 = vpop.f32.mrb[2].mxu1 }
 0x2cb   : > { %v1166_v12 = vpop.f32.mrb[3].mxu1 }
 0x2cc   : > { %v5433_v6 = vpack.c.bf16 %v5064_v10, %v1166_v12 }
 0x2ce   : > { %5434 = vmatprep.subr.bf16.mxu1 %v5433_v6 }
 0x2cf   : > { %5436 = vmatpush3.bf16.msra.mxu1 %v5433_v6 }
 0x2de   : > { %v5067_v13 = vpop.f32.mrb[4].mxu1 }
 0x2df   : > { %v1176_v14 = vpop.f32.mrb[5].mxu1 }
 0x2e0   : > { %v5437_v17 = vpack.c.bf16 %v5067_v13, %v1176_v14 }
 0x2e2   : > { %5438 = vmatprep.subr.bf16.mxu1 %v5437_v17 }
 0x2e3   : > { %5440 = vmatpush3.bf16.msra.mxu1 %v5437_v17 }
 0x2ef   : > { %v5070_v60 = vpop.f32.mrb[6].mxu1 }
 0x2f0   : > { %v1186_v29 = vpop.f32.mrb[7].mxu1 }
 0x2f1   : > { %v5441_v57 = vpack.c.bf16 %v5070_v60, %v1186_v29 }
 0x2f3   : > { %5442 = vmatprep.subr.bf16.mxu1 %v5441_v57 }
 0x2f4   : > { %5444 = vmatpush3.bf16.msra.mxu1 %v5441_v57 }
 0x2f7   : > { %5088 = vmatmul.mubr.msk.f32.vlgmr.msra.gmra.mrb[8].mxu1 %vm1291_vm10, %v1035_v63 }
 0x2f8   : > { %5090 = vmatprep.mubr.msk.f32.mxu1 %vm1291_vm10, %v1036_v0 }
 0x2fb   : > { %5091 = vmatmul.mubr.msk.f32.gmra.mrb[10].mxu1 %vm1291_vm10, %v1037_v9 }
 0x2fc   : > { %5093 = vmatprep.mubr.msk.f32.mxu1 %vm1291_vm10, %v1038_v18 }
 0x2ff   : > { %5094 = vmatmul.mubr.msk.f32.gmra.mrb[12].mxu1 %vm1291_vm10, %v1039_v21 }
 0x300   : > { %5096 = vmatprep.mubr.msk.f32.mxu1 %vm1291_vm10, %v1040_v22 }
 0x303   : > { %5097 = vmatmul.mubr.msk.f32.gmra.mrb[14].mxu1 %vm1291_vm10, %v1041_v24 }
 0x304   : > { %5099 = vmatprep.mubr.msk.f32.mxu1 %vm1291_vm10, %v1042_v26 }
 0x307   : > { %5100 = vmatmul.mubr.msk.f32.gmra.mrb[16].mxu1 %vm1291_vm10, %v1043_v27 }
 0x308   : > { %5102 = vmatprep.mubr.msk.f32.mxu1 %vm1291_vm10, %v1044_v28 }
 0x30b   : > { %5103 = vmatmul.mubr.msk.f32.gmra.mrb[18].mxu1 %vm1291_vm10, %v1045_v15 }
 0x30c   : > { %5105 = vmatprep.mubr.msk.f32.mxu1 %vm1291_vm10, %v1046_v32  ;;  %v1289_v32 = vpop.permute.xlu1 %1288 }
 0x30f   : > { %5106 = vmatmul.mubr.msk.f32.gmra.mrb[20].mxu1 %vm1291_vm10, %v1047_v35 }
 0x310   : > { %5108 = vmatprep.mubr.msk.f32.mxu1 %vm1291_vm10, %v1048_v36 }
 0x313   : > { %5109 = vmatmul.mubr.msk.f32.gmra.mrb[22].mxu1 %vm1291_vm10, %v1049_v40 }
 0x3ca   : > { %v5089_v43 = vpop.f32.mrb[8].mxu1 }
 0x3cb   : > { %v1412_v38 = vadd.f32 %v5089_v43, %v6624_v23  ;;  %v1406_v44 = vpop.f32.mrb[9].mxu1 }
 0x3cc   : > { %v1407_v47 = vadd.f32 %v1406_v44, %v6546_v59 }
 0x3cd   : > { %v1502_v49 = vmul.f32 0.2, %v1412_v38  ;;  %vm1486_vm12 = vcmp.ge.f32.partialorder %v1412_v38, 0.0 }
 0x3ce   : > { %vm1485_vm13 = vcmp.ge.f32.partialorder %v1407_v47, 0.0  ;;  %v1501_v51 = vmul.f32 0.2, %v1407_v47  ;;  %v5092_v52 = vpop.f32.mrb[10].mxu1 }
 0x3cf   : > { %v1422_v61 = vadd.f32 %v5092_v52, %v6637_v30  ;;  %v1416_v53 = vpop.f32.mrb[11].mxu1  ;;  %v1518_v50 = vsel %vm1486_vm12, %v1412_v38, %v1502_v49  ;;  %v2409_v52 = vld [vmem:[%s7481_s30] sm:$0xff] }
 0x3d0   : > { %v1417_v54 = vadd.f32 %v1416_v53, %v6564_v7  ;;  %v1517_v55 = vsel %vm1485_vm13, %v1407_v47, %v1501_v51 }
 0x3d1   : > { %v1504_v56 = vmul.f32 0.2, %v1422_v61  ;;  %5121 = vmatprep.mubr.msk.f32.mxu0 %vm1570_vm14, %v1517_v55  ;;  %vm1488_vm15 = vcmp.ge.f32.partialorder %v1422_v61, 0.0 }
 0x3d2   : > { %vm1487_vm1 = vcmp.ge.f32.partialorder %v1417_v54, 0.0  ;;  %v1503_v23 = vmul.f32 0.2, %v1417_v54  ;;  %v5095_v59 = vpop.f32.mrb[12].mxu1  ;;  %5122 = vmatmul.mubr.msk.f32.vlgmr.msra.gmra.mrb[16].mxu0 %vm1570_vm14, %v1518_v50 }
 0x3d3   : > { %v1432_v58 = vadd.f32 %v5095_v59, %v6644_v34  ;;  %v1426_v62 = vpop.f32.mrb[13].mxu1  ;;  %v1520_v7 = vsel %vm1488_vm15, %v1422_v61, %v1504_v56  ;;  %v2410_v61 = vld [vmem:[%s7481_s30 + $0x8] sm:$0xff] }
 0x3d4   : > { %v1427_v3 = vadd.f32 %v1426_v62, %v6577_v11  ;;  %v1519_v30 = vsel %vm1487_vm1, %v1417_v54, %v1503_v23  ;;  %v5485_v53 = vpack.c.bf16 %v2410_v61, %v2409_v52  ;;  %vm2411_vm1 = vcmask 130048  }
 0x3d5   : > { %v1506_v4 = vmul.f32 0.2, %v1432_v58  ;;  %5124 = vmatprep.mubr.msk.f32.mxu0 %vm1570_vm14, %v1519_v30  ;;  %vm1490_vm2 = vcmp.ge.f32.partialorder %v1432_v58, 0.0 }
 0x3d6   : > { %vm1489_vm3 = vcmp.ge.f32.partialorder %v1427_v3, 0.0  ;;  %v1505_v19 = vmul.f32 0.2, %v1427_v3  ;;  %v5098_v5 = vpop.f32.mrb[14].mxu1  ;;  %5125 = vmatmul.mubr.msk.f32.gmra.mrb[18].mxu0 %vm1570_vm14, %v1520_v7  ;;  %5486 = vmatprep.subr.bf16.mxu0 %v5485_v53 }
 0x3d7   : > { %v1442_v2 = vadd.f32 %v5098_v5, %v6652_v37  ;;  %v1436_v8 = vpop.f32.mrb[15].mxu1  ;;  %v1522_v11 = vsel %vm1490_vm2, %v1432_v58, %v1506_v4  ;;  %5488 = vmatpush3.bf16.msra.mxu0 %v5485_v53 }
 0x3d8   : > { %v1437_v10 = vadd.f32 %v1436_v8, %v6590_v16  ;;  %v1521_v34 = vsel %vm1489_vm3, %v1427_v3, %v1505_v19 }
 0x3d9   : > { %v1508_v12 = vmul.f32 0.2, %v1442_v2  ;;  %5127 = vmatprep.mubr.msk.f32.mxu0 %vm1570_vm14, %v1521_v34  ;;  %vm1492_vm4 = vcmp.ge.f32.partialorder %v1442_v2, 0.0 }
 0x3da   : > { %vm1491_vm5 = vcmp.ge.f32.partialorder %v1437_v10, 0.0  ;;  %v1507_v6 = vmul.f32 0.2, %v1437_v10  ;;  %v5101_v13 = vpop.f32.mrb[16].mxu1  ;;  %5128 = vmatmul.mubr.msk.f32.gmra.mrb[20].mxu0 %vm1570_vm14, %v1522_v11 }
 0x3db   : > { %v1452_v14 = vadd.f32 %v5101_v13, %v6657_v41  ;;  %v1446_v17 = vpop.f32.mrb[17].mxu1  ;;  %v1524_v16 = vsel %vm1492_vm4, %v1442_v2, %v1508_v12 }
 0x3dc   : > { %v1447_v60 = vadd.f32 %v1446_v17, %v6603_v1  ;;  %v1523_v37 = vsel %vm1491_vm5, %v1437_v10, %v1507_v6 }
 0x3dd   : > { %v1510_v29 = vmul.f32 0.2, %v1452_v14  ;;  %5130 = vmatprep.mubr.msk.f32.mxu0 %vm1570_vm14, %v1523_v37  ;;  %vm1494_vm6 = vcmp.ge.f32.partialorder %v1452_v14, 0.0  ;;  %v1535_v37 = vld [vmem:[%s7453_s10 + $0x10] sm:$0xff] }
 0x3de   : > { %vm1493_vm7 = vcmp.ge.f32.partialorder %v1447_v60, 0.0  ;;  %v1509_v57 = vmul.f32 0.2, %v1447_v60  ;;  %v5104_v63 = vpop.f32.mrb[18].mxu1  ;;  %5131 = vmatmul.mubr.msk.f32.gmra.mrb[22].mxu0 %vm1570_vm14, %v1524_v16  ;;  %v1537_v16 = vld [vmem:[%s7453_s10 + $0x20] sm:$0xff] }
 0x3df   : > { %v1462_v0 = vadd.f32 %v5104_v63, %v6665_v45  ;;  %v1456_v9 = vpop.f32.mrb[19].mxu1  ;;  %v1526_v1 = vsel %vm1494_vm6, %v1452_v14, %v1510_v29  ;;  %v1536_v29 = vld [vmem:[%s7453_s10 + $0x18] sm:$0xff]  ;;  %v1539_v63 = vld [vmem:[%s7453_s10 + $0x30] sm:$0xff] }
 0x3e0   : > { %v1457_v18 = vadd.f32 %v1456_v9, %v6616_v20  ;;  %v1525_v41 = vsel %vm1493_vm7, %v1447_v60, %v1509_v57  ;;  %v1534_v60 = vld [vmem:[%s7453_s10 + $0x8] sm:$0xff]  ;;  %v1541_v9 = vld [vmem:[%s7453_s10 + $0x40] sm:$0xff] }
 0x3e1   : > { %v1512_v21 = vmul.f32 0.2, %v1462_v0  ;;  %5133 = vmatprep.mubr.msk.f32.mxu0 %vm1570_vm14, %v1525_v41  ;;  %vm1496_vm8 = vcmp.ge.f32.partialorder %v1462_v0, 0.0  ;;  %v1538_v57 = vld [vmem:[%s7453_s10 + $0x28] sm:$0xff]  ;;  %v1543_v41 = vld [vmem:[%s7453_s10 + $0x50] sm:$0xff] }
 0x3e2   : > { %vm1495_vm9 = vcmp.ge.f32.partialorder %v1457_v18, 0.0  ;;  %v1511_v22 = vmul.f32 0.2, %v1457_v18  ;;  %v5107_v24 = vpop.f32.mrb[20].mxu1  ;;  %5134 = vmatmul.mubr.msk.f32.gmra.mrb[24].mxu0 %vm1570_vm14, %v1526_v1  ;;  %v1545_v1 = vld [vmem:[%s7453_s10 + $0x60] sm:$0xff] }
 0x3e3   : > { %v1472_v26 = vadd.f32 %v5107_v24, %v6670_v48  ;;  %v1466_v27 = vpop.f32.mrb[21].mxu1  ;;  %v1528_v20 = vsel %vm1496_vm8, %v1462_v0, %v1512_v21  ;;  %v1540_v0 = vld [vmem:[%s7453_s10 + $0x38] sm:$0xff]  ;;  %v1547_v24 = vld [vmem:[%s7453_s10 + $0x70] sm:$0xff] }
 0x3e4   : > { %v1467_v28 = vadd.f32 %v1466_v27, %v6629_v25  ;;  %v1527_v45 = vsel %vm1495_vm9, %v1457_v18, %v1511_v22  ;;  %v1542_v18 = vld [vmem:[%s7453_s10 + $0x48] sm:$0xff]  ;;  %v1544_v21 = vld [vmem:[%s7453_s10 + $0x58] sm:$0xff]  ;;  %v1549_v27 = vld [vmem:[%s7453_s10 + $0x80] sm:$0xff] }
 0x3e5   : > { %v1514_v15 = vmul.f32 0.2, %v1472_v26  ;;  %5136 = vmatprep.mubr.msk.f32.mxu0 %vm1570_vm14, %v1527_v45  ;;  %vm1498_vm10 = vcmp.ge.f32.partialorder %v1472_v26, 0.0  ;;  %v1546_v22 = vld [vmem:[%s7453_s10 + $0x68] sm:$0xff]  ;;  %v1551_v45 = vld [vmem:[%s7453_s10 + $0x90] sm:$0xff] }
 0x3e6   : > { %vm1497_vm11 = vcmp.ge.f32.partialorder %v1467_v28, 0.0  ;;  %v1513_v35 = vmul.f32 0.2, %v1467_v28  ;;  %v5110_v36 = vpop.f32.mrb[22].mxu1  ;;  %5137 = vmatmul.mubr.msk.f32.gmra.mrb[26].mxu0 %vm1570_vm14, %v1528_v20  ;;  %v1553_v20 = vld [vmem:[%s7453_s10 + $0xa0] sm:$0xff] }
 0x3e7   : > { %v1482_v40 = vadd.f32 %v5110_v36, %v1289_v32  ;;  %v1476_v43 = vpop.f32.mrb[23].mxu1  ;;  %v1530_v25 = vsel %vm1498_vm10, %v1472_v26, %v1514_v15  ;;  %v1548_v26 = vld [vmem:[%s7453_s10 + $0x78] sm:$0xff]  ;;  %v1554_v32 = vld [vmem:[%s7453_s10 + $0xa8] sm:$0xff] }
 0x3e8   : > { %v1477_v38 = vadd.f32 %v1476_v43, %v6639_v31  ;;  %v1529_v48 = vsel %vm1497_vm11, %v1467_v28, %v1513_v35  ;;  %v1533_v31 = vld [vmem:[%s7453_s10] sm:$0xff]  ;;  %v1550_v28 = vld [vmem:[%s7453_s10 + $0x88] sm:$0xff]  ;;  %v1552_v15 = vld [vmem:[%s7453_s10 + $0x98] sm:$0xff] }
 0x3e9   : > { %v1516_v44 = vmul.f32 0.2, %v1482_v40  ;;  %5139 = vmatprep.mubr.msk.f32.mxu0 %vm1570_vm14, %v1529_v48  ;;  %vm1500_vm12 = vcmp.ge.f32.partialorder %v1482_v40, 0.0  ;;  %5177 = vmatprep.mubr.f32.mxu1 %v1533_v31  ;;  %v1555_v35 = vld [vmem:[%s7453_s10 + $0xb0] sm:$0xff]  ;;  %v1556_v36 = vld [vmem:[%s7453_s10 + $0xb8] sm:$0xff]  ;;  %v1558_v43 = vld [vmem:[%s7453_s10 + $0xc8] sm:$0xff]  ;;  %v1803_v31 = vpop.permute.xlu0 %1802 }
 0x3ea   : > { %vm1499_vm13 = vcmp.ge.f32.partialorder %v1477_v38, 0.0  ;;  %v1515_v47 = vmul.f32 0.2, %v1477_v38  ;;  %5140 = vmatmul.mubr.msk.f32.gmra.mrb[28].mxu0 %vm1570_vm14, %v1530_v25  ;;  %v1560_v48 = vld [vmem:[%s7453_s10 + $0xd8] sm:$0xff]  ;;  %v1562_v25 = vld [vmem:[%s7453_s10 + $0xe8] sm:$0xff] }
 0x3eb   : > { %v1532_v51 = vsel %vm1500_vm12, %v1482_v40, %v1516_v44  ;;  %v1557_v40 = vld [vmem:[%s7453_s10 + $0xc0] sm:$0xff] }
 0x3ec   : > { %v1531_v49 = vsel %vm1499_vm13, %v1477_v38, %v1515_v47  ;;  %v1559_v38 = vld [vmem:[%s7453_s10 + $0xd0] sm:$0xff]  ;;  %v1561_v44 = vld [vmem:[%s7453_s10 + $0xe0] sm:$0xff] }
 0x3ed   : > { %5142 = vmatprep.mubr.msk.f32.mxu0 %vm1570_vm14, %v1531_v49  ;;  %v1563_v47 = vld [vmem:[%s7453_s10 + $0xf0] sm:$0xff]  ;;  %v1564_v49 = vld [vmem:[%s7453_s10 + $0xf8] sm:$0xff]  ;;  %v1813_v61 = vpop.permute.xlu0 %1812 }
 0x3ee   : > { %5143 = vmatmul.mubr.msk.f32.gmra.mrb[30].mxu0 %vm1570_vm14, %v1532_v51  ;;  %v1808_v51 = vpop.permute.xlu1 %1807 }
 0x3f2   : > { %v1818_v52 = vpop.permute.xlu1 %1817 }
 0x3f6   : > { %v1828_v53 = vpop.permute.xlu1 %1827 }
 0x4a5   : > { %v5123_v54 = vpop.f32.mrb[16].mxu0 }
 0x4a6   : > { %v1689_v55 = vpop.f32.mrb[17].mxu0 }
 0x4a7   : > { %v5453_v50 = vpack.c.bf16 %v5123_v54, %v1689_v55  ;;  %v1823_v54 = vpop.permute.xlu0 %1822  ;;  %v1838_v55 = vpop.permute.xlu1 %1837 }
 0x4a9   : > { %v5126_v56 = vpop.f32.mrb[18].mxu0  ;;  %5454 = vmatprep.subr.bf16.mxu1 %v5453_v50 }
 0x4aa   : > { %v1699_v23 = vpop.f32.mrb[19].mxu0  ;;  %5456 = vmatpush3.bf16.msra.mxu1 %v5453_v50 }
 0x4ab   : > { %v5457_v59 = vpack.c.bf16 %v5126_v56, %v1699_v23  ;;  %v1833_v50 = vpop.permute.xlu0 %1832  ;;  %v1848_v56 = vpop.permute.xlu1 %1847 }
 0x4ad   : > { %v5129_v58 = vpop.f32.mrb[20].mxu0  ;;  %5458 = vmatprep.subr.bf16.mxu1 %v5457_v59 }
 0x4ae   : > { %v1709_v62 = vpop.f32.mrb[21].mxu0  ;;  %5460 = vmatpush3.bf16.msra.mxu1 %v5457_v59 }
 0x4af   : > { %v5461_v3 = vpack.c.bf16 %v5129_v58, %v1709_v62  ;;  %v1843_v23 = vpop.permute.xlu0 %1842  ;;  %v6885_v59 = vpop.permute.xlu1 %1857 }
 0x4b1   : > { %v5132_v30 = vpop.f32.mrb[22].mxu0  ;;  %5462 = vmatprep.subr.bf16.mxu1 %v5461_v3 }
 0x4b2   : > { %v1719_v4 = vpop.f32.mrb[23].mxu0  ;;  %5464 = vmatpush3.bf16.msra.mxu1 %v5461_v3 }
 0x4b3   : > { %v5465_v7 = vpack.c.bf16 %v5132_v30, %v1719_v4  ;;  %v6887_v62 = vpop.permute.xlu0 %1852 }
 0x4b5   : > { %v5135_v19 = vpop.f32.mrb[24].mxu0  ;;  %5466 = vmatprep.subr.bf16.mxu1 %v5465_v7 }
 0x4b6   : > { %v1729_v5 = vpop.f32.mrb[25].mxu0  ;;  %5468 = vmatpush3.bf16.msra.mxu1 %v5465_v7 }
 0x4b7   : > { %v5469_v2 = vpack.c.bf16 %v5135_v19, %v1729_v5 }
 0x4b9   : > { %v5138_v8 = vpop.f32.mrb[26].mxu0  ;;  %5470 = vmatprep.subr.bf16.mxu1 %v5469_v2 }
 0x4ba   : > { %v1739_v10 = vpop.f32.mrb[27].mxu0  ;;  %5472 = vmatpush3.bf16.msra.mxu1 %v5469_v2 }
 0x4bb   : > { %v5473_v34 = vpack.c.bf16 %v5138_v8, %v1739_v10  ;;  %v6889_v10 = vpop.permute.xlu1 %1867 }
 0x4bd   : > { %v5141_v12 = vpop.f32.mrb[28].mxu0  ;;  %5474 = vmatprep.subr.bf16.mxu1 %v5473_v34 }
 0x4be   : > { %v1749_v11 = vpop.f32.mrb[29].mxu0  ;;  %5476 = vmatpush3.bf16.msra.mxu1 %v5473_v34 }
 0x4bf   : > { %v5477_v6 = vpack.c.bf16 %v5141_v12, %v1749_v11  ;;  %v6891_v11 = vpop.permute.xlu0 %1862 }
 0x4c1   : > { %v5144_v13 = vpop.f32.mrb[30].mxu0  ;;  %5478 = vmatprep.subr.bf16.mxu1 %v5477_v6 }
 0x4c2   : > { %v1759_v14 = vpop.f32.mrb[31].mxu0  ;;  %5480 = vmatpush3.bf16.msra.mxu1 %v5477_v6 }
 0x4c3   : > { %v5481_v17 = vpack.c.bf16 %v5144_v13, %v1759_v14 }
 0x4c5   : > { %5482 = vmatprep.subr.bf16.mxu1 %v5481_v17 }
 0x4c6   : > { %5484 = vmatpush3.bf16.msra.mxu1 %v5481_v17 }
 0x4c9   : > { %5178 = vmatmul.mubr.f32.vlgmr.msra.gmra.mrb[24].mxu1 %v1534_v60 }
 0x4ca   : > { %5180 = vmatprep.mubr.f32.mxu1 %v1535_v37 }
 0x4cd   : > { %5181 = vmatmul.mubr.f32.gmra.mrb[26].mxu1 %v1536_v29 }
 0x4ce   : > { %5183 = vmatprep.mubr.f32.mxu1 %v1537_v16 }
 0x4d1   : > { %5184 = vmatmul.mubr.f32.gmra.mrb[28].mxu1 %v1538_v57 }
 0x4d2   : > { %5186 = vmatprep.mubr.f32.mxu1 %v1539_v63 }
 0x4d5   : > { %5187 = vmatmul.mubr.f32.gmra.mrb[30].mxu1 %v1540_v0  ;;  %v1878_v0 = vpop.permute.xlu1 %1877 }
 0x4d6   : > { %5189 = vmatprep.mubr.f32.mxu1 %v1541_v9 }
 0x4d9   : > { %5190 = vmatmul.mubr.f32.gmra.mrb[32].mxu1 %v1542_v18 }
 0x4da   : > { %5192 = vmatprep.mubr.f32.mxu1 %v1543_v41  ;;  %v1873_v41 = vpop.permute.xlu0 %1872 }
 0x4dd   : > { %5193 = vmatmul.mubr.f32.gmra.mrb[34].mxu1 %v1544_v21 }
 0x4de   : > { %5195 = vmatprep.mubr.f32.mxu1 %v1545_v1 }
 0x4e1   : > { %5196 = vmatmul.mubr.f32.gmra.mrb[36].mxu1 %v1546_v22 }
 0x4e2   : > { %5198 = vmatprep.mubr.f32.mxu1 %v1547_v24 }
 0x4e5   : > { %5199 = vmatmul.mubr.f32.gmra.mrb[38].mxu1 %v1548_v26 }
 0x4e6   : > { %5201 = vmatprep.mubr.f32.mxu1 %v1549_v27 }
 0x4e9   : > { %5202 = vmatmul.mubr.f32.gmra.mrb[40].mxu1 %v1550_v28 }
 0x4ea   : > { %5204 = vmatprep.mubr.f32.mxu1 %v1551_v45 }
 0x4ed   : > { %5205 = vmatmul.mubr.f32.gmra.mrb[42].mxu1 %v1552_v15 }
 0x4ee   : > { %5207 = vmatprep.mubr.f32.mxu1 %v1553_v20 }
 0x4f1   : > { %5208 = vmatmul.mubr.f32.gmra.mrb[44].mxu1 %v1554_v32  ;;  %v1888_v32 = vpop.permute.xlu1 %1887 }
 0x4f2   : > { %5210 = vmatprep.mubr.f32.mxu1 %v1555_v35 }
 0x4f5   : > { %5211 = vmatmul.mubr.f32.gmra.mrb[46].mxu1 %v1556_v36 }
 0x4f6   : > { %5213 = vmatprep.mubr.f32.mxu1 %v1557_v40  ;;  %v1883_v40 = vpop.permute.xlu0 %1882 }
 0x4f9   : > { %5214 = vmatmul.mubr.f32.gmra.mrb[48].mxu1 %v1558_v43 }
 0x4fa   : > { %5216 = vmatprep.mubr.f32.mxu1 %v1559_v38 }
 0x4fd   : > { %5217 = vmatmul.mubr.f32.gmra.mrb[50].mxu1 %v1560_v48 }
 0x4fe   : > { %5219 = vmatprep.mubr.f32.mxu1 %v1561_v44 }
 0x501   : > { %5220 = vmatmul.mubr.f32.gmra.mrb[52].mxu1 %v1562_v25 }
 0x502   : > { %5222 = vmatprep.mubr.f32.mxu1 %v1563_v47 }
 0x505   : > { %5223 = vmatmul.mubr.f32.gmra.mrb[54].mxu1 %v1564_v49 }
 0x59c   : > { %v5179_v58 = vpop.f32.mrb[24].mxu1 }
 0x59d   : > { %v2032_v3 = vadd.f32 %v5179_v58, %v1808_v51  ;;  %v2026_v30 = vpop.f32.mrb[25].mxu1 }
 0x59e   : > { %v2027_v4 = vadd.f32 %v2026_v30, %v1803_v31 }
 0x59f   : > { %v2218_v7 = vmul.f32 0.2, %v2032_v3  ;;  %vm2186_vm14 = vcmp.ge.f32.partialorder %v2032_v3, 0.0 }
 0x5a0   : > { %vm2185_vm15 = vcmp.ge.f32.partialorder %v2027_v4, 0.0  ;;  %v2217_v19 = vmul.f32 0.2, %v2027_v4  ;;  %v5182_v5 = vpop.f32.mrb[26].mxu1 }
 0x5a1   : > { %v2042_v2 = vadd.f32 %v5182_v5, %v1818_v52  ;;  %v2036_v8 = vpop.f32.mrb[27].mxu1  ;;  %v2250_v6 = vsel %vm2186_vm14, %v2032_v3, %v2218_v7 }
 0x5a2   : > { %v2037_v34 = vadd.f32 %v2036_v8, %v1813_v61  ;;  %v2249_v12 = vsel %vm2185_vm15, %v2027_v4, %v2217_v19  ;;  %v1898_v61 = vpop.permute.xlu1 %1897 }
 0x5a3   : > { %v2220_v13 = vmul.f32 0.2, %v2042_v2  ;;  %5229 = vmatprep.mubr.msk.f32.mxu0 %vm2411_vm1, %v2249_v12  ;;  %vm2188_vm2 = vcmp.ge.f32.partialorder %v2042_v2, 0.0 }
 0x5a4   : > { %vm2187_vm3 = vcmp.ge.f32.partialorder %v2037_v34, 0.0  ;;  %v2219_v14 = vmul.f32 0.2, %v2037_v34  ;;  %v5185_v17 = vpop.f32.mrb[28].mxu1  ;;  %5230 = vmatmul.mubr.msk.f32.vlgmr.msra.gmra.mrb[32].mxu0 %vm2411_vm1, %v2250_v6 }
 0x5a5   : > { %v2052_v60 = vadd.f32 %v5185_v17, %v1828_v53  ;;  %v2046_v37 = vpop.f32.mrb[29].mxu1  ;;  %v2252_v63 = vsel %vm2188_vm2, %v2042_v2, %v2220_v13 }
 0x5a6   : > { %v2047_v29 = vadd.f32 %v2046_v37, %v1823_v54  ;;  %v2251_v16 = vsel %vm2187_vm3, %v2037_v34, %v2219_v14  ;;  %v1908_v19 = vpop.permute.xlu1 %1907 }
 0x5a7   : > { %v2222_v57 = vmul.f32 0.2, %v2052_v60  ;;  %5232 = vmatprep.mubr.msk.f32.mxu0 %vm2411_vm1, %v2251_v16  ;;  %vm2190_vm4 = vcmp.ge.f32.partialorder %v2052_v60, 0.0 }
 0x5a8   : > { %vm2189_vm5 = vcmp.ge.f32.partialorder %v2047_v29, 0.0  ;;  %v2221_v9 = vmul.f32 0.2, %v2047_v29  ;;  %v5188_v18 = vpop.f32.mrb[30].mxu1  ;;  %5233 = vmatmul.mubr.msk.f32.gmra.mrb[34].mxu0 %vm2411_vm1, %v2252_v63 }
 0x5a9   : > { %v2062_v21 = vadd.f32 %v5188_v18, %v1838_v55  ;;  %v2056_v1 = vpop.f32.mrb[31].mxu1  ;;  %v2254_v27 = vsel %vm2190_vm4, %v2052_v60, %v2222_v57  ;;  %v1893_v55 = vpop.permute.xlu0 %1892 }
 0x5aa   : > { %v2057_v22 = vadd.f32 %v2056_v1, %v1833_v50  ;;  %v2253_v24 = vsel %vm2189_vm5, %v2047_v29, %v2221_v9  ;;  %v1918_v29 = vpop.permute.xlu1 %1917 }
 0x5ab   : > { %v2224_v26 = vmul.f32 0.2, %v2062_v21  ;;  %5235 = vmatprep.mubr.msk.f32.mxu0 %vm2411_vm1, %v2253_v24  ;;  %vm2192_vm6 = vcmp.ge.f32.partialorder %v2062_v21, 0.0 }
 0x5ac   : > { %vm2191_vm7 = vcmp.ge.f32.partialorder %v2057_v22, 0.0  ;;  %v2223_v28 = vmul.f32 0.2, %v2057_v22  ;;  %v5191_v45 = vpop.f32.mrb[32].mxu1  ;;  %5236 = vmatmul.mubr.msk.f32.gmra.mrb[36].mxu0 %vm2411_vm1, %v2254_v27 }
 0x5ad   : > { %v2072_v15 = vadd.f32 %v5191_v45, %v1848_v56  ;;  %v2066_v20 = vpop.f32.mrb[33].mxu1  ;;  %v2256_v38 = vsel %vm2192_vm6, %v2062_v21, %v2224_v26  ;;  %v1903_v8 = vpop.permute.xlu0 %1902 }
 0x5ae   : > { %v2067_v35 = vadd.f32 %v2066_v20, %v1843_v23  ;;  %v2255_v36 = vsel %vm2191_vm7, %v2057_v22, %v2223_v28  ;;  %v1928_v28 = vpop.permute.xlu1 %1927 }
 0x5af   : > { %v2226_v43 = vmul.f32 0.2, %v2072_v15  ;;  %5238 = vmatprep.mubr.msk.f32.mxu0 %vm2411_vm1, %v2255_v36  ;;  %vm2194_vm8 = vcmp.ge.f32.partialorder %v2072_v15, 0.0 }
 0x5b0   : > { %vm2193_vm9 = vcmp.ge.f32.partialorder %v2067_v35, 0.0  ;;  %v2225_v48 = vmul.f32 0.2, %v2067_v35  ;;  %v5194_v44 = vpop.f32.mrb[34].mxu1  ;;  %5239 = vmatmul.mubr.msk.f32.gmra.mrb[38].mxu0 %vm2411_vm1, %v2256_v38 }
 0x5b1   : > { %v2082_v25 = vadd.f32 %v5194_v44, %v6885_v59  ;;  %v2076_v47 = vpop.f32.mrb[35].mxu1  ;;  %v2258_v52 = vsel %vm2194_vm8, %v2072_v15, %v2226_v43  ;;  %v1913_v63 = vpop.permute.xlu0 %1912 }
 0x5b2   : > { %v2077_v49 = vadd.f32 %v2076_v47, %v6887_v62  ;;  %v2257_v51 = vsel %vm2193_vm9, %v2067_v35, %v2225_v48 }
 0x5b3   : > { %v2228_v31 = vmul.f32 0.2, %v2082_v25  ;;  %5241 = vmatprep.mubr.msk.f32.mxu0 %vm2411_vm1, %v2257_v51  ;;  %vm2196_vm10 = vcmp.ge.f32.partialorder %v2082_v25, 0.0 }
 0x5b4   : > { %vm2195_vm11 = vcmp.ge.f32.partialorder %v2077_v49, 0.0  ;;  %v2227_v53 = vmul.f32 0.2, %v2077_v49  ;;  %v5197_v54 = vpop.f32.mrb[36].mxu1  ;;  %5242 = vmatmul.mubr.msk.f32.gmra.mrb[40].mxu0 %vm2411_vm1, %v2258_v52 }
 0x5b5   : > { %v2092_v50 = vadd.f32 %v5197_v54, %v6889_v10  ;;  %v2086_v56 = vpop.f32.mrb[37].mxu1  ;;  %v2260_v62 = vsel %vm2196_vm10, %v2082_v25, %v2228_v31  ;;  %v1923_v20 = vpop.permute.xlu0 %1922 }
 0x5b6   : > { %v2087_v23 = vadd.f32 %v2086_v56, %v6891_v11  ;;  %v2259_v59 = vsel %vm2195_vm11, %v2077_v49, %v2227_v53  ;;  %v1938_v49 = vpop.permute.xlu1 %1937 }
 0x5b7   : > { %v2230_v58 = vmul.f32 0.2, %v2092_v50  ;;  %5244 = vmatprep.mubr.msk.f32.mxu0 %vm2411_vm1, %v2259_v59  ;;  %vm2198_vm12 = vcmp.ge.f32.partialorder %v2092_v50, 0.0 }
 0x5b8   : > { %vm2197_vm13 = vcmp.ge.f32.partialorder %v2087_v23, 0.0  ;;  %v2229_v3 = vmul.f32 0.2, %v2087_v23  ;;  %v5200_v30 = vpop.f32.mrb[38].mxu1  ;;  %5245 = vmatmul.mubr.msk.f32.gmra.mrb[42].mxu0 %vm2411_vm1, %v2260_v62 }
 0x5b9   : > { %v2102_v4 = vadd.f32 %v5200_v30, %v1878_v0  ;;  %v2096_v7 = vpop.f32.mrb[39].mxu1  ;;  %v2262_v34 = vsel %vm2198_vm12, %v2092_v50, %v2230_v58  ;;  %v1933_v52 = vpop.permute.xlu0 %1932 }
 0x5ba   : > { %v2097_v5 = vadd.f32 %v2096_v7, %v1873_v41  ;;  %v2261_v2 = vsel %vm2197_vm13, %v2087_v23, %v2229_v3  ;;  %v1948_v3 = vpop.permute.xlu1 %1947 }
 0x5bb   : > { %v2232_v10 = vmul.f32 0.2, %v2102_v4  ;;  %5247 = vmatprep.mubr.msk.f32.mxu0 %vm2411_vm1, %v2261_v2  ;;  %vm2200_vm14 = vcmp.ge.f32.partialorder %v2102_v4, 0.0 }
 0x5bc   : > { %vm2199_vm15 = vcmp.ge.f32.partialorder %v2097_v5, 0.0  ;;  %v2231_v12 = vmul.f32 0.2, %v2097_v5  ;;  %v5203_v11 = vpop.f32.mrb[40].mxu1  ;;  %5248 = vmatmul.mubr.msk.f32.gmra.mrb[44].mxu0 %vm2411_vm1, %v2262_v34 }
 0x5bd   : > { %v2112_v6 = vadd.f32 %v5203_v11, %v1888_v32  ;;  %v2106_v13 = vpop.f32.mrb[41].mxu1  ;;  %v2264_v37 = vsel %vm2200_vm14, %v2102_v4, %v2232_v10  ;;  %v1943_v7 = vpop.permute.xlu0 %1942 }
 0x5be   : > { %v2107_v14 = vadd.f32 %v2106_v13, %v1883_v40  ;;  %v2263_v17 = vsel %vm2199_vm15, %v2097_v5, %v2231_v12 }
 0x5bf   : > { %v2234_v60 = vmul.f32 0.2, %v2112_v6  ;;  %5250 = vmatprep.mubr.msk.f32.mxu0 %vm2411_vm1, %v2263_v17  ;;  %vm2202_vm2 = vcmp.ge.f32.partialorder %v2112_v6, 0.0 }
 0x5c0   : > { %vm2201_vm3 = vcmp.ge.f32.partialorder %v2107_v14, 0.0  ;;  %v2233_v16 = vmul.f32 0.2, %v2107_v14  ;;  %v5206_v57 = vpop.f32.mrb[42].mxu1  ;;  %5251 = vmatmul.mubr.msk.f32.gmra.mrb[46].mxu0 %vm2411_vm1, %v2264_v37 }
 0x5c1   : > { %v2122_v0 = vadd.f32 %v5206_v57, %v1898_v61  ;;  %v2116_v9 = vpop.f32.mrb[43].mxu1  ;;  %v2266_v1 = vsel %vm2202_vm2, %v2112_v6, %v2234_v60  ;;  %v1953_v37 = vpop.permute.xlu0 %1952 }
 0x5c2   : > { %v2117_v18 = vadd.f32 %v2116_v9, %v1893_v55  ;;  %v2265_v41 = vsel %vm2201_vm3, %v2107_v14, %v2233_v16  ;;  %v1958_v14 = vpop.permute.xlu1 %1957 }
 0x5c3   : > { %v2236_v21 = vmul.f32 0.2, %v2122_v0  ;;  %5253 = vmatprep.mubr.msk.f32.mxu0 %vm2411_vm1, %v2265_v41  ;;  %vm2204_vm4 = vcmp.ge.f32.partialorder %v2122_v0, 0.0 }
 0x5c4   : > { %vm2203_vm5 = vcmp.ge.f32.partialorder %v2117_v18, 0.0  ;;  %v2235_v22 = vmul.f32 0.2, %v2117_v18  ;;  %v5209_v24 = vpop.f32.mrb[44].mxu1  ;;  %5254 = vmatmul.mubr.msk.f32.gmra.mrb[48].mxu0 %vm2411_vm1, %v2266_v1  ;;  %v5857_v1 = vmov 0.0|0.0  }
 0x5c5   : > { %v2132_v26 = vadd.f32 %v5209_v24, %v1908_v19  ;;  %v2126_v27 = vpop.f32.mrb[45].mxu1  ;;  %v2268_v35 = vsel %vm2204_vm4, %v2122_v0, %v2236_v21  ;;  %5489 = vmatprep.subr.bf16.mxu0 %v5857_v1  ;;  %5607 = vmatprep.subr.bf16.mxu1 %v5857_v1  ;;  %v2298_v24 = vld [vmem:[%s7482_s22 + $0x88] sm:$0xff] }
 0x5c6   : > { %v2127_v45 = vadd.f32 %v2126_v27, %v1903_v8  ;;  %v2267_v15 = vsel %vm2203_vm5, %v2117_v18, %v2235_v22  ;;  %v2282_v22 = vld [vmem:[%s7482_s22 + $0x8] sm:$0xff]  ;;  %3221 = vmatprep.mubr.f32.mxu1 %v2298_v24  ;;  %v2304_v24 = vld [vmem:[%s7482_s22 + $0xb8] sm:$0xff]  ;;  %vm3697_vm5 = vcmask 72704  }
 0x5c7   : > { %v2238_v32 = vmul.f32 0.2, %v2132_v26  ;;  %5256 = vmatprep.mubr.msk.f32.mxu0 %vm2411_vm1, %v2267_v15  ;;  %vm2206_vm6 = vcmp.ge.f32.partialorder %v2132_v26, 0.0 }
 0x5c8   : > { %vm2205_vm7 = vcmp.ge.f32.partialorder %v2127_v45, 0.0  ;;  %v2237_v36 = vmul.f32 0.2, %v2127_v45  ;;  %v5212_v40 = vpop.f32.mrb[46].mxu1  ;;  %5257 = vmatmul.mubr.msk.f32.gmra.mrb[50].mxu0 %vm2411_vm1, %v2268_v35 }
 0x5c9   : > { %v2142_v43 = vadd.f32 %v5212_v40, %v1918_v29  ;;  %v2136_v38 = vpop.f32.mrb[47].mxu1  ;;  %v2270_v47 = vsel %vm2206_vm6, %v2132_v26, %v2238_v32 }
 0x5ca   : > { %v2137_v48 = vadd.f32 %v2136_v38, %v1913_v63  ;;  %v2269_v44 = vsel %vm2205_vm7, %v2127_v45, %v2237_v36 }
 0x5cb   : > { %v2240_v25 = vmul.f32 0.2, %v2142_v43  ;;  %5259 = vmatprep.mubr.msk.f32.mxu0 %vm2411_vm1, %v2269_v44  ;;  %vm2208_vm8 = vcmp.ge.f32.partialorder %v2142_v43, 0.0 }
 0x5cc   : > { %vm2207_vm9 = vcmp.ge.f32.partialorder %v2137_v48, 0.0  ;;  %v2239_v51 = vmul.f32 0.2, %v2137_v48  ;;  %v5215_v31 = vpop.f32.mrb[48].mxu1  ;;  %5260 = vmatmul.mubr.msk.f32.gmra.mrb[52].mxu0 %vm2411_vm1, %v2270_v47 }
 0x5cd   : > { %v2152_v61 = vadd.f32 %v5215_v31, %v1928_v28  ;;  %v2146_v53 = vpop.f32.mrb[49].mxu1  ;;  %v2272_v56 = vsel %vm2208_vm8, %v2142_v43, %v2240_v25 }
 0x5ce   : > { %v2147_v54 = vadd.f32 %v2146_v53, %v1923_v20  ;;  %v2271_v55 = vsel %vm2207_vm9, %v2137_v48, %v2239_v51 }
 0x5cf   : > { %v2242_v50 = vmul.f32 0.2, %v2152_v61  ;;  %5262 = vmatprep.mubr.msk.f32.mxu0 %vm2411_vm1, %v2271_v55  ;;  %vm2210_vm10 = vcmp.ge.f32.partialorder %v2152_v61, 0.0 }
 0x5d0   : > { %vm2209_vm11 = vcmp.ge.f32.partialorder %v2147_v54, 0.0  ;;  %v2241_v23 = vmul.f32 0.2, %v2147_v54  ;;  %v5218_v59 = vpop.f32.mrb[50].mxu1  ;;  %5263 = vmatmul.mubr.msk.f32.gmra.mrb[54].mxu0 %vm2411_vm1, %v2272_v56 }
 0x5d1   : > { %v2162_v58 = vadd.f32 %v5218_v59, %v1938_v49  ;;  %v2156_v62 = vpop.f32.mrb[51].mxu1  ;;  %v2274_v5 = vsel %vm2210_vm10, %v2152_v61, %v2242_v50 }
 0x5d2   : > { %v2157_v30 = vadd.f32 %v2156_v62, %v1933_v52  ;;  %v2273_v4 = vsel %vm2209_vm11, %v2147_v54, %v2241_v23 }
 0x5d3   : > { %v2244_v19 = vmul.f32 0.2, %v2162_v58  ;;  %5265 = vmatprep.mubr.msk.f32.mxu0 %vm2411_vm1, %v2273_v4  ;;  %vm2212_vm12 = vcmp.ge.f32.partialorder %v2162_v58, 0.0 }
 0x5d4   : > { %vm2211_vm13 = vcmp.ge.f32.partialorder %v2157_v30, 0.0  ;;  %v2243_v2 = vmul.f32 0.2, %v2157_v30  ;;  %v5221_v8 = vpop.f32.mrb[52].mxu1  ;;  %5266 = vmatmul.mubr.msk.f32.gmra.mrb[56].mxu0 %vm2411_vm1, %v2274_v5 }
 0x5d5   : > { %v2172_v10 = vadd.f32 %v5221_v8, %v1948_v3  ;;  %v2166_v34 = vpop.f32.mrb[53].mxu1  ;;  %v2276_v13 = vsel %vm2212_vm12, %v2162_v58, %v2244_v19 }
 0x5d6   : > { %v2167_v12 = vadd.f32 %v2166_v34, %v1943_v7  ;;  %v2275_v11 = vsel %vm2211_vm13, %v2157_v30, %v2243_v2 }
 0x5d7   : > { %v2246_v6 = vmul.f32 0.2, %v2172_v10  ;;  %5268 = vmatprep.mubr.msk.f32.mxu0 %vm2411_vm1, %v2275_v11  ;;  %vm2214_vm14 = vcmp.ge.f32.partialorder %v2172_v10, 0.0 }
 0x5d8   : > { %vm2213_vm15 = vcmp.ge.f32.partialorder %v2167_v12, 0.0  ;;  %v2245_v17 = vmul.f32 0.2, %v2167_v12  ;;  %v5224_v60 = vpop.f32.mrb[54].mxu1  ;;  %5269 = vmatmul.mubr.msk.f32.gmra.mrb[58].mxu0 %vm2411_vm1, %v2276_v13 }
 0x5d9   : > { %v2182_v29 = vadd.f32 %v5224_v60, %v1958_v14  ;;  %v2176_v16 = vpop.f32.mrb[55].mxu1  ;;  %v2278_v9 = vsel %vm2214_vm14, %v2172_v10, %v2246_v6 }
 0x5da   : > { %v2177_v57 = vadd.f32 %v2176_v16, %v1953_v37  ;;  %v2277_v63 = vsel %vm2213_vm15, %v2167_v12, %v2245_v17  ;;  %v2297_v16 = vld [vmem:[%s7482_s22 + $0x80] sm:$0xff] }
 0x5db   : > { %v2248_v0 = vmul.f32 0.2, %v2182_v29  ;;  %5271 = vmatprep.mubr.msk.f32.mxu0 %vm2411_vm1, %v2277_v63  ;;  %vm2216_vm2 = vcmp.ge.f32.partialorder %v2182_v29, 0.0  ;;  %v2300_v63 = vld [vmem:[%s7482_s22 + $0x98] sm:$0xff] }
 0x5dc   : > { %vm2215_vm3 = vcmp.ge.f32.partialorder %v2177_v57, 0.0  ;;  %v2247_v18 = vmul.f32 0.2, %v2177_v57  ;;  %5272 = vmatmul.mubr.msk.f32.gmra.mrb[60].mxu0 %vm2411_vm1, %v2278_v9  ;;  %v2299_v9 = vld [vmem:[%s7482_s22 + $0x90] sm:$0xff] }
 0x5dd   : > { %v2280_v21 = vsel %vm2216_vm2, %v2182_v29, %v2248_v0  ;;  %v2281_v29 = vld [vmem:[%s7482_s22] sm:$0xff]  ;;  %v2283_v0 = vld [vmem:[%s7482_s22 + $0x10] sm:$0xff] }
 0x5de   : > { %v2279_v41 = vsel %vm2215_vm3, %v2177_v57, %v2247_v18  ;;  %v2284_v57 = vld [vmem:[%s7482_s22 + $0x18] sm:$0xff]  ;;  %v2286_v18 = vld [vmem:[%s7482_s22 + $0x28] sm:$0xff] }
 0x5df   : > { %5274 = vmatprep.mubr.msk.f32.mxu0 %vm2411_vm1, %v2279_v41  ;;  %v2302_v41 = vld [vmem:[%s7482_s22 + $0xa8] sm:$0xff] }
 0x5e0   : > { %5275 = vmatmul.mubr.msk.f32.gmra.mrb[62].mxu0 %vm2411_vm1, %v2280_v21  ;;  %v2285_v21 = vld [vmem:[%s7482_s22 + $0x20] sm:$0xff]  ;;  %vm5858_vm1 = vmmov 1  }
 0x5e1   : > { %3181 = vmatprep.mubr.f32.mxu0 %v2282_v22  ;;  %v2288_v22 = vld [vmem:[%s7482_s22 + $0x38] sm:$0xff]  ;;  %vm5538_vm4 = vmpackc.low %vm1086_vm0, %vm5858_vm1 }
 0x677   : > { %v5231_v26 = vpop.f32.mrb[32].mxu0 }
 0x678   : > { %v2574_v27 = vpop.f32.mrb[33].mxu0 }
 0x679   : > { %v5490_v28 = vpack.c.bf16 %v5231_v26, %v2574_v27  ;;  %v2287_v26 = vld [vmem:[%s7482_s22 + $0x30] sm:$0xff] }
 0x67a   : > { %v2303_v27 = vld [vmem:[%s7482_s22 + $0xb0] sm:$0xff] }
 0x67b   : > { %v5234_v45 = vpop.f32.mrb[34].mxu0  ;;  %5491 = vmatpush1.bf16.msra.mxu0 %v5490_v28  ;;  %5623 = vmatpush1.bf16.msra.mxu1 %v5490_v28  ;;  %v2290_v28 = vld [vmem:[%s7482_s22 + $0x48] sm:$0xff] }
 0x67c   : > { %v2584_v15 = vpop.f32.mrb[35].mxu0  ;;  %5492 = vmatprep.subr.bf16.mxu0 %v5857_v1  ;;  %5608 = vmatprep.subr.bf16.mxu1 %v5857_v1 }
 0x67d   : > { %v5493_v20 = vpack.c.bf16 %v5234_v45, %v2584_v15  ;;  %v2306_v45 = vld [vmem:[%s7482_s22 + $0xc8] sm:$0xff]  ;;  %v2289_v15 = vld [vmem:[%s7482_s22 + $0x40] sm:$0xff] }
 0x67f   : > { %v5237_v32 = vpop.f32.mrb[36].mxu0  ;;  %5494 = vmatpush1.bf16.msra.mxu0 %v5493_v20  ;;  %5624 = vmatpush1.bf16.msra.mxu1 %v5493_v20  ;;  %v2305_v20 = vld [vmem:[%s7482_s22 + $0xc0] sm:$0xff] }
 0x680   : > { %v2594_v35 = vpop.f32.mrb[37].mxu0  ;;  %5495 = vmatprep.subr.bf16.mxu0 %v5857_v1  ;;  %5609 = vmatprep.subr.bf16.mxu1 %v5857_v1 }
 0x681   : > { %v5496_v36 = vpack.c.bf16 %v5237_v32, %v2594_v35  ;;  %v2292_v32 = vld [vmem:[%s7482_s22 + $0x58] sm:$0xff] }
 0x682   : > { %v2308_v35 = vld [vmem:[%s7482_s22 + $0xd8] sm:$0xff] }
 0x683   : > { %v5240_v40 = vpop.f32.mrb[38].mxu0  ;;  %5497 = vmatpush1.bf16.msra.mxu0 %v5496_v36  ;;  %5625 = vmatpush1.bf16.msra.mxu1 %v5496_v36  ;;  %v2291_v36 = vld [vmem:[%s7482_s22 + $0x50] sm:$0xff] }
 0x684   : > { %v2604_v43 = vpop.f32.mrb[39].mxu0  ;;  %5498 = vmatprep.subr.bf16.mxu0 %v5857_v1  ;;  %5610 = vmatprep.subr.bf16.mxu1 %v5857_v1 }
 0x685   : > { %v5499_v38 = vpack.c.bf16 %v5240_v40, %v2604_v43  ;;  %v2307_v40 = vld [vmem:[%s7482_s22 + $0xd0] sm:$0xff]  ;;  %v2294_v43 = vld [vmem:[%s7482_s22 + $0x68] sm:$0xff] }
 0x687   : > { %v5243_v48 = vpop.f32.mrb[40].mxu0  ;;  %5500 = vmatpush1.bf16.msra.mxu0 %v5499_v38  ;;  %5626 = vmatpush1.bf16.msra.mxu1 %v5499_v38  ;;  %v2310_v38 = vld [vmem:[%s7482_s22 + $0xe8] sm:$0xff] }
 0x688   : > { %v2614_v44 = vpop.f32.mrb[41].mxu0  ;;  %5501 = vmatprep.subr.bf16.mxu0 %v5857_v1  ;;  %5611 = vmatprep.subr.bf16.mxu1 %v5857_v1 }
 0x689   : > { %v5502_v25 = vpack.c.bf16 %v5243_v48, %v2614_v44  ;;  %v2293_v48 = vld [vmem:[%s7482_s22 + $0x60] sm:$0xff] }
 0x68a   : > { %v2309_v44 = vld [vmem:[%s7482_s22 + $0xe0] sm:$0xff] }
 0x68b   : > { %v5246_v47 = vpop.f32.mrb[42].mxu0  ;;  %5503 = vmatpush1.bf16.msra.mxu0 %v5502_v25  ;;  %5627 = vmatpush1.bf16.msra.mxu1 %v5502_v25  ;;  %v2296_v25 = vld [vmem:[%s7482_s22 + $0x78] sm:$0xff] }
 0x68c   : > { %v2624_v49 = vpop.f32.mrb[43].mxu0  ;;  %5504 = vmatprep.subr.bf16.mxu0 %v5857_v1  ;;  %5612 = vmatprep.subr.bf16.mxu1 %v5857_v1 }
 0x68d   : > { %v5505_v51 = vpack.c.bf16 %v5246_v47, %v2624_v49  ;;  %v2312_v47 = vld [vmem:[%s7482_s22 + $0xf8] sm:$0xff]  ;;  %v2295_v49 = vld [vmem:[%s7482_s22 + $0x70] sm:$0xff] }
 0x68f   : > { %v5249_v31 = vpop.f32.mrb[44].mxu0  ;;  %5506 = vmatpush1.bf16.msra.mxu0 %v5505_v51  ;;  %5628 = vmatpush1.bf16.msra.mxu1 %v5505_v51  ;;  %v2311_v51 = vld [vmem:[%s7482_s22 + $0xf0] sm:$0xff] }
 0x690   : > { %v2634_v52 = vpop.f32.mrb[45].mxu0  ;;  %5507 = vmatprep.subr.bf16.mxu0 %v5857_v1  ;;  %5613 = vmatprep.subr.bf16.mxu1 %v5857_v1 }
 0x691   : > { %v5508_v61 = vpack.c.bf16 %v5249_v31, %v2634_v52  ;;  %v2314_v31 = vld [vmem:[%s7482_s22 + $0x108] sm:$0xff]  ;;  %v2313_v52 = vld [vmem:[%s7482_s22 + $0x100] sm:$0xff] }
 0x693   : > { %v5252_v53 = vpop.f32.mrb[46].mxu0  ;;  %5509 = vmatpush1.bf16.msra.mxu0 %v5508_v61  ;;  %5629 = vmatpush1.bf16.msra.mxu1 %v5508_v61  ;;  %v2316_v61 = vld [vmem:[%s7482_s22 + $0x118] sm:$0xff] }
 0x694   : > { %v2644_v54 = vpop.f32.mrb[47].mxu0  ;;  %5510 = vmatprep.subr.bf16.mxu0 %v5857_v1  ;;  %5614 = vmatprep.subr.bf16.mxu1 %v5857_v1 }
 0x695   : > { %v5511_v55 = vpack.c.bf16 %v5252_v53, %v2644_v54  ;;  %v2315_v53 = vld [vmem:[%s7482_s22 + $0x110] sm:$0xff]  ;;  %v2318_v54 = vld [vmem:[%s7482_s22 + $0x128] sm:$0xff] }
 0x697   : > { %v5255_v50 = vpop.f32.mrb[48].mxu0  ;;  %5512 = vmatpush1.bf16.msra.mxu0 %v5511_v55  ;;  %5630 = vmatpush1.bf16.msra.mxu1 %v5511_v55  ;;  %v2317_v55 = vld [vmem:[%s7482_s22 + $0x120] sm:$0xff] }
 0x698   : > { %v2654_v56 = vpop.f32.mrb[49].mxu0  ;;  %5513 = vmatprep.subr.bf16.mxu0 %v5857_v1  ;;  %5615 = vmatprep.subr.bf16.mxu1 %v5857_v1 }
 0x699   : > { %v5514_v23 = vpack.c.bf16 %v5255_v50, %v2654_v56  ;;  %v2320_v50 = vld [vmem:[%s7482_s22 + $0x138] sm:$0xff]  ;;  %v2319_v56 = vld [vmem:[%s7482_s22 + $0x130] sm:$0xff] }
 0x69b   : > { %v5258_v59 = vpop.f32.mrb[50].mxu0  ;;  %5515 = vmatpush1.bf16.msra.mxu0 %v5514_v23  ;;  %5631 = vmatpush1.bf16.msra.mxu1 %v5514_v23  ;;  %v2322_v23 = vld [vmem:[%s7482_s22 + $0x148] sm:$0xff] }
 0x69c   : > { %v2664_v58 = vpop.f32.mrb[51].mxu0  ;;  %5516 = vmatprep.subr.bf16.mxu0 %v5857_v1  ;;  %5616 = vmatprep.subr.bf16.mxu1 %v5857_v1 }
 0x69d   : > { %v5517_v62 = vpack.c.bf16 %v5258_v59, %v2664_v58  ;;  %v2321_v59 = vld [vmem:[%s7482_s22 + $0x140] sm:$0xff]  ;;  %v2324_v58 = vld [vmem:[%s7482_s22 + $0x158] sm:$0xff] }
 0x69f   : > { %v5261_v3 = vpop.f32.mrb[52].mxu0  ;;  %5518 = vmatpush1.bf16.msra.mxu0 %v5517_v62  ;;  %5632 = vmatpush1.bf16.msra.mxu1 %v5517_v62  ;;  %v2323_v62 = vld [vmem:[%s7482_s22 + $0x150] sm:$0xff] }
 0x6a0   : > { %v2674_v30 = vpop.f32.mrb[53].mxu0  ;;  %5519 = vmatprep.subr.bf16.mxu0 %v5857_v1  ;;  %5617 = vmatprep.subr.bf16.mxu1 %v5857_v1 }
 0x6a1   : > { %v5520_v4 = vpack.c.bf16 %v5261_v3, %v2674_v30  ;;  %v2326_v3 = vld [vmem:[%s7482_s22 + $0x168] sm:$0xff]  ;;  %v2325_v30 = vld [vmem:[%s7482_s22 + $0x160] sm:$0xff] }
 0x6a3   : > { %v5264_v7 = vpop.f32.mrb[54].mxu0  ;;  %5521 = vmatpush1.bf16.msra.mxu0 %v5520_v4  ;;  %5633 = vmatpush1.bf16.msra.mxu1 %v5520_v4  ;;  %v2328_v4 = vld [vmem:[%s7482_s22 + $0x178] sm:$0xff] }
 0x6a4   : > { %v2684_v19 = vpop.f32.mrb[55].mxu0  ;;  %5522 = vmatprep.subr.bf16.mxu0 %v5857_v1  ;;  %5618 = vmatprep.subr.bf16.mxu1 %v5857_v1 }
 0x6a5   : > { %v5523_v5 = vpack.c.bf16 %v5264_v7, %v2684_v19  ;;  %v2327_v7 = vld [vmem:[%s7482_s22 + $0x170] sm:$0xff]  ;;  %v2330_v19 = vld [vmem:[%s7482_s22 + $0x188] sm:$0xff] }
 0x6a7   : > { %v5267_v2 = vpop.f32.mrb[56].mxu0  ;;  %5524 = vmatpush1.bf16.msra.mxu0 %v5523_v5  ;;  %5634 = vmatpush1.bf16.msra.mxu1 %v5523_v5  ;;  %v2329_v5 = vld [vmem:[%s7482_s22 + $0x180] sm:$0xff] }
 0x6a8   : > { %v2694_v8 = vpop.f32.mrb[57].mxu0  ;;  %5525 = vmatprep.subr.bf16.mxu0 %v5857_v1  ;;  %5619 = vmatprep.subr.bf16.mxu1 %v5857_v1 }
 0x6a9   : > { %v5526_v10 = vpack.c.bf16 %v5267_v2, %v2694_v8  ;;  %v2332_v2 = vld [vmem:[%s7482_s22 + $0x198] sm:$0xff]  ;;  %v2331_v8 = vld [vmem:[%s7482_s22 + $0x190] sm:$0xff] }
 0x6ab   : > { %v5270_v34 = vpop.f32.mrb[58].mxu0  ;;  %5527 = vmatpush1.bf16.msra.mxu0 %v5526_v10  ;;  %5635 = vmatpush1.bf16.msra.mxu1 %v5526_v10  ;;  %v2334_v10 = vld [vmem:[%s7482_s22 + $0x1a8] sm:$0xff] }
 0x6ac   : > { %v2704_v12 = vpop.f32.mrb[59].mxu0  ;;  %5528 = vmatprep.subr.bf16.mxu0 %v5857_v1  ;;  %5620 = vmatprep.subr.bf16.mxu1 %v5857_v1 }
 0x6ad   : > { %v5529_v11 = vpack.c.bf16 %v5270_v34, %v2704_v12  ;;  %v2333_v34 = vld [vmem:[%s7482_s22 + $0x1a0] sm:$0xff]  ;;  %v2336_v12 = vld [vmem:[%s7482_s22 + $0x1b8] sm:$0xff] }
 0x6af   : > { %v5273_v6 = vpop.f32.mrb[60].mxu0  ;;  %5530 = vmatpush1.bf16.msra.mxu0 %v5529_v11  ;;  %5636 = vmatpush1.bf16.msra.mxu1 %v5529_v11  ;;  %v2335_v11 = vld [vmem:[%s7482_s22 + $0x1b0] sm:$0xff] }
 0x6b0   : > { %v2714_v13 = vpop.f32.mrb[61].mxu0  ;;  %5531 = vmatprep.subr.bf16.mxu0 %v5857_v1  ;;  %5621 = vmatprep.subr.bf16.mxu1 %v5857_v1 }
 0x6b1   : > { %v5532_v14 = vpack.c.bf16 %v5273_v6, %v2714_v13  ;;  %v2338_v6 = vld [vmem:[%s7482_s22 + $0x1c8] sm:$0xff]  ;;  %v2337_v13 = vld [vmem:[%s7482_s22 + $0x1c0] sm:$0xff] }
 0x6b3   : > { %v5276_v17 = vpop.f32.mrb[62].mxu0  ;;  %5533 = vmatpush1.bf16.msra.mxu0 %v5532_v14  ;;  %5637 = vmatpush1.bf16.msra.mxu1 %v5532_v14  ;;  %v2340_v14 = vld [vmem:[%s7482_s22 + $0x1d8] sm:$0xff] }
 0x6b4   : > { %v2724_v60 = vpop.f32.mrb[63].mxu0  ;;  %5534 = vmatprep.subr.bf16.mxu0 %v5857_v1  ;;  %5622 = vmatprep.subr.bf16.mxu1 %v5857_v1  ;;  %v2301_v1 = vld [vmem:[%s7482_s22 + $0xa0] sm:$0xff] }
 0x6b5   : > { %v5535_v37 = vpack.c.bf16 %v5276_v17, %v2724_v60  ;;  %v2339_v17 = vld [vmem:[%s7482_s22 + $0x1d0] sm:$0xff]  ;;  %v2342_v60 = vld [vmem:[%s7482_s22 + $0x1e8] sm:$0xff] }
 0x6b7   : > { %5536 = vmatpush1.bf16.msra.mxu0 %v5535_v37  ;;  %5638 = vmatpush1.bf16.msra.mxu1 %v5535_v37  ;;  %v2341_v37 = vld [vmem:[%s7482_s22 + $0x1e0] sm:$0xff] }
 0x6ba   : > { %3182 = vmatmul.mubr.f32.vlgmr.msra.gmra.mrb[64].mxu0 %v2281_v29  ;;  %3222 = vmatmul.mubr.f32.vlgmr.msra.gmra.mrb[56].mxu1 %v2297_v16  ;;  %v2344_v29 = vld [vmem:[%s7482_s22 + $0x1f8] sm:$0xff]  ;;  %v3695_v16 = vld [vmem:[#allocation7] sm:$0xff] }
 0x6bb   : > { %3186 = vmatprep.mubr.f32.mxu0 %v2284_v57  ;;  %3226 = vmatprep.mubr.f32.mxu1 %v2300_v63  ;;  %v3696_v57 = vld [vmem:[#allocation7 + $0x8] sm:$0x1] }
 0x6bc   : > { %v5537_v63 = vpack.c.bf16 %v3696_v57, %v3695_v16  ;;  %v2400_v57 = vld [vmem:[%s7482_s22 + $0x3b8] sm:$0xff] }
 0x6be   : > { %3187 = vmatmul.mubr.f32.gmra.mrb[66].mxu0 %v2283_v0  ;;  %3227 = vmatmul.mubr.f32.gmra.mrb[58].mxu1 %v2299_v9  ;;  %v2343_v0 = vld [vmem:[%s7482_s22 + $0x1f0] sm:$0xff]  ;;  %v2346_v9 = vld [vmem:[%s7482_s22 + $0x208] sm:$0xff] }
 0x6bf   : > { %3191 = vmatprep.mubr.f32.mxu0 %v2286_v18  ;;  %3231 = vmatprep.mubr.f32.mxu1 %v2302_v41  ;;  %v2345_v18 = vld [vmem:[%s7482_s22 + $0x200] sm:$0xff]  ;;  %v2348_v41 = vld [vmem:[%s7482_s22 + $0x218] sm:$0xff] }
 0x6c0   : > { %5539 = vmatprep.subr.msk.bf16.mxu0 %vm5538_vm4, %v5537_v63 }
 0x6c1   : > { %5542 = vmatpush3.bf16.msk.msra.mxu0 %vm5538_vm4, %v5537_v63  ;;  %v2399_v63 = vld [vmem:[%s7482_s22 + $0x3b0] sm:$0xff] }
 0x6c2   : > { %3192 = vmatmul.mubr.f32.gmra.mrb[68].mxu0 %v2285_v21  ;;  %3232 = vmatmul.mubr.f32.gmra.mrb[60].mxu1 %v2301_v1  ;;  %v2347_v21 = vld [vmem:[%s7482_s22 + $0x210] sm:$0xff]  ;;  %v2350_v1 = vld [vmem:[%s7482_s22 + $0x228] sm:$0xff] }
 0x6c3   : > { %3196 = vmatprep.mubr.f32.mxu0 %v2288_v22  ;;  %3236 = vmatprep.mubr.f32.mxu1 %v2304_v24  ;;  %v2349_v22 = vld [vmem:[%s7482_s22 + $0x220] sm:$0xff]  ;;  %v2352_v24 = vld [vmem:[%s7482_s22 + $0x238] sm:$0xff] }
 0x6c6   : > { %3197 = vmatmul.mubr.f32.gmra.mrb[70].mxu0 %v2287_v26  ;;  %3237 = vmatmul.mubr.f32.gmra.mrb[62].mxu1 %v2303_v27  ;;  %v2351_v26 = vld [vmem:[%s7482_s22 + $0x230] sm:$0xff]  ;;  %v2354_v27 = vld [vmem:[%s7482_s22 + $0x248] sm:$0xff] }
 0x6c7   : > { %3201 = vmatprep.mubr.f32.mxu0 %v2290_v28  ;;  %3241 = vmatprep.mubr.f32.mxu1 %v2306_v45  ;;  %v2353_v28 = vld [vmem:[%s7482_s22 + $0x240] sm:$0xff]  ;;  %v2356_v45 = vld [vmem:[%s7482_s22 + $0x258] sm:$0xff] }
 0x6ca   : > { %3202 = vmatmul.mubr.f32.gmra.mrb[72].mxu0 %v2289_v15  ;;  %3242 = vmatmul.mubr.f32.gmra.mrb[64].mxu1 %v2305_v20  ;;  %v2355_v15 = vld [vmem:[%s7482_s22 + $0x250] sm:$0xff]  ;;  %v2358_v20 = vld [vmem:[%s7482_s22 + $0x268] sm:$0xff] }
 0x6cb   : > { %3206 = vmatprep.mubr.f32.mxu0 %v2292_v32  ;;  %3246 = vmatprep.mubr.f32.mxu1 %v2308_v35  ;;  %v2357_v32 = vld [vmem:[%s7482_s22 + $0x260] sm:$0xff]  ;;  %v2360_v35 = vld [vmem:[%s7482_s22 + $0x278] sm:$0xff] }
 0x6ce   : > { %3207 = vmatmul.mubr.f32.gmra.mrb[74].mxu0 %v2291_v36  ;;  %3247 = vmatmul.mubr.f32.gmra.mrb[66].mxu1 %v2307_v40  ;;  %v2359_v36 = vld [vmem:[%s7482_s22 + $0x270] sm:$0xff]  ;;  %v2362_v40 = vld [vmem:[%s7482_s22 + $0x288] sm:$0xff] }
 0x6cf   : > { %3211 = vmatprep.mubr.f32.mxu0 %v2294_v43  ;;  %3251 = vmatprep.mubr.f32.mxu1 %v2310_v38  ;;  %v2361_v43 = vld [vmem:[%s7482_s22 + $0x280] sm:$0xff]  ;;  %v2364_v38 = vld [vmem:[%s7482_s22 + $0x298] sm:$0xff] }
 0x6d2   : > { %3212 = vmatmul.mubr.f32.gmra.mrb[76].mxu0 %v2293_v48  ;;  %3252 = vmatmul.mubr.f32.gmra.mrb[68].mxu1 %v2309_v44  ;;  %v2363_v48 = vld [vmem:[%s7482_s22 + $0x290] sm:$0xff]  ;;  %v2366_v44 = vld [vmem:[%s7482_s22 + $0x2a8] sm:$0xff] }
 0x6d3   : > { %3216 = vmatprep.mubr.f32.mxu0 %v2296_v25  ;;  %3256 = vmatprep.mubr.f32.mxu1 %v2312_v47  ;;  %v2365_v25 = vld [vmem:[%s7482_s22 + $0x2a0] sm:$0xff]  ;;  %v2368_v47 = vld [vmem:[%s7482_s22 + $0x2b8] sm:$0xff] }
 0x6d6   : > { %3217 = vmatmul.mubr.f32.gmra.mrb[78].mxu0 %v2295_v49  ;;  %3257 = vmatmul.mubr.f32.gmra.mrb[70].mxu1 %v2311_v51  ;;  %v2367_v49 = vld [vmem:[%s7482_s22 + $0x2b0] sm:$0xff]  ;;  %v2370_v51 = vld [vmem:[%s7482_s22 + $0x2c8] sm:$0xff] }
 0x6d7   : > { %3261 = vmatprep.mubr.f32.mxu1 %v2314_v31  ;;  %v2369_v31 = vld [vmem:[%s7482_s22 + $0x2c0] sm:$0xff] }
 0x6da   : > { %3262 = vmatmul.mubr.f32.gmra.mrb[72].mxu1 %v2313_v52  ;;  %v2372_v52 = vld [vmem:[%s7482_s22 + $0x2d8] sm:$0xff] }
 0x6db   : > { %3266 = vmatprep.mubr.f32.mxu1 %v2316_v61  ;;  %v2371_v61 = vld [vmem:[%s7482_s22 + $0x2d0] sm:$0xff] }
 0x6de   : > { %3267 = vmatmul.mubr.f32.gmra.mrb[74].mxu1 %v2315_v53  ;;  %v2374_v53 = vld [vmem:[%s7482_s22 + $0x2e8] sm:$0xff] }
 0x6df   : > { %3271 = vmatprep.mubr.f32.mxu1 %v2318_v54  ;;  %v2373_v54 = vld [vmem:[%s7482_s22 + $0x2e0] sm:$0xff] }
 0x6e2   : > { %3272 = vmatmul.mubr.f32.gmra.mrb[76].mxu1 %v2317_v55  ;;  %v2376_v55 = vld [vmem:[%s7482_s22 + $0x2f8] sm:$0xff] }
 0x6e3   : > { %3276 = vmatprep.mubr.f32.mxu1 %v2320_v50  ;;  %v2375_v50 = vld [vmem:[%s7482_s22 + $0x2f0] sm:$0xff] }
 0x6e6   : > { %3277 = vmatmul.mubr.f32.gmra.mrb[78].mxu1 %v2319_v56  ;;  %v2378_v56 = vld [vmem:[%s7482_s22 + $0x308] sm:$0xff] }
 0x6e7   : > { %3281 = vmatprep.mubr.f32.mxu1 %v2322_v23  ;;  %v2377_v23 = vld [vmem:[%s7482_s22 + $0x300] sm:$0xff] }
 0x6ea   : > { %3282 = vmatmul.mubr.f32.gmra.mrb[80].mxu1 %v2321_v59  ;;  %v2380_v59 = vld [vmem:[%s7482_s22 + $0x318] sm:$0xff] }
 0x6eb   : > { %3286 = vmatprep.mubr.f32.mxu1 %v2324_v58  ;;  %v2379_v58 = vld [vmem:[%s7482_s22 + $0x310] sm:$0xff] }
 0x6ee   : > { %3287 = vmatmul.mubr.f32.gmra.mrb[82].mxu1 %v2323_v62  ;;  %v2382_v62 = vld [vmem:[%s7482_s22 + $0x328] sm:$0xff] }
 0x6ef   : > { %3291 = vmatprep.mubr.f32.mxu1 %v2326_v3  ;;  %v2381_v3 = vld [vmem:[%s7482_s22 + $0x320] sm:$0xff] }
 0x6f2   : > { %3292 = vmatmul.mubr.f32.gmra.mrb[84].mxu1 %v2325_v30  ;;  %v2384_v30 = vld [vmem:[%s7482_s22 + $0x338] sm:$0xff] }
 0x6f3   : > { %3296 = vmatprep.mubr.f32.mxu1 %v2328_v4  ;;  %v2383_v4 = vld [vmem:[%s7482_s22 + $0x330] sm:$0xff] }
 0x6f6   : > { %3297 = vmatmul.mubr.f32.gmra.mrb[86].mxu1 %v2327_v7  ;;  %v2386_v7 = vld [vmem:[%s7482_s22 + $0x348] sm:$0xff] }
 0x6f7   : > { %3301 = vmatprep.mubr.f32.mxu1 %v2330_v19  ;;  %v2385_v19 = vld [vmem:[%s7482_s22 + $0x340] sm:$0xff] }
 0x6fa   : > { %3302 = vmatmul.mubr.f32.gmra.mrb[88].mxu1 %v2329_v5  ;;  %v2388_v5 = vld [vmem:[%s7482_s22 + $0x358] sm:$0xff] }
 0x6fb   : > { %3306 = vmatprep.mubr.f32.mxu1 %v2332_v2  ;;  %v2387_v2 = vld [vmem:[%s7482_s22 + $0x350] sm:$0xff] }
 0x6fe   : > { %3307 = vmatmul.mubr.f32.gmra.mrb[90].mxu1 %v2331_v8  ;;  %v2390_v8 = vld [vmem:[%s7482_s22 + $0x368] sm:$0xff] }
 0x6ff   : > { %3311 = vmatprep.mubr.f32.mxu1 %v2334_v10  ;;  %v2389_v10 = vld [vmem:[%s7482_s22 + $0x360] sm:$0xff] }
 0x702   : > { %3312 = vmatmul.mubr.f32.gmra.mrb[92].mxu1 %v2333_v34  ;;  %v2392_v34 = vld [vmem:[%s7482_s22 + $0x378] sm:$0xff] }
 0x703   : > { %3316 = vmatprep.mubr.f32.mxu1 %v2336_v12  ;;  %v2391_v12 = vld [vmem:[%s7482_s22 + $0x370] sm:$0xff] }
 0x706   : > { %3317 = vmatmul.mubr.f32.gmra.mrb[94].mxu1 %v2335_v11  ;;  %v2394_v11 = vld [vmem:[%s7482_s22 + $0x388] sm:$0xff] }
 0x707   : > { %3321 = vmatprep.mubr.f32.mxu1 %v2338_v6  ;;  %v2393_v6 = vld [vmem:[%s7482_s22 + $0x380] sm:$0xff] }
 0x70a   : > { %3322 = vmatmul.mubr.f32.gmra.mrb[96].mxu1 %v2337_v13  ;;  %v2396_v13 = vld [vmem:[%s7482_s22 + $0x398] sm:$0xff] }
 0x70b   : > { %3326 = vmatprep.mubr.f32.mxu1 %v2340_v14  ;;  %v2800_v14 = vpop.permute.xlu0 %2799 }
 0x70e   : > { %3327 = vmatmul.mubr.f32.gmra.mrb[98].mxu1 %v2339_v17  ;;  %v2395_v17 = vld [vmem:[%s7482_s22 + $0x390] sm:$0xff] }
 0x70f   : > { %3331 = vmatprep.mubr.f32.mxu1 %v2342_v60  ;;  %v2398_v60 = vld [vmem:[%s7482_s22 + $0x3a8] sm:$0xff]  ;;  %v2810_v16 = vpop.permute.xlu0 %2809 }
 0x712   : > { %3332 = vmatmul.mubr.f32.gmra.mrb[100].mxu1 %v2341_v37  ;;  %v2805_v37 = vpop.permute.xlu1 %2804 }
 0x713   : > { %3336 = vmatprep.mubr.f32.mxu1 %v2344_v29  ;;  %v2397_v29 = vld [vmem:[%s7482_s22 + $0x3a0] sm:$0xff] }
 0x716   : > { %3337 = vmatmul.mubr.f32.gmra.mrb[102].mxu1 %v2343_v0  ;;  %v2815_v0 = vpop.permute.xlu1 %2814 }
 0x717   : > { %3341 = vmatprep.mubr.f32.mxu1 %v2346_v9  ;;  %v2402_v9 = vld [vmem:[%s7482_s22 + $0x3c8] sm:$0xff] }
 0x71a   : > { %3342 = vmatmul.mubr.f32.gmra.mrb[104].mxu1 %v2345_v18  ;;  %v2820_v18 = vpop.permute.xlu0 %2819 }
 0x71b   : > { %3346 = vmatprep.mubr.f32.mxu1 %v2348_v41  ;;  %v2401_v41 = vld [vmem:[%s7482_s22 + $0x3c0] sm:$0xff] }
 0x71e   : > { %3347 = vmatmul.mubr.f32.gmra.mrb[106].mxu1 %v2347_v21  ;;  %v2404_v21 = vld [vmem:[%s7482_s22 + $0x3d8] sm:$0xff] }
 0x71f   : > { %3351 = vmatprep.mubr.f32.mxu1 %v2350_v1  ;;  %v7331_v1 = vpop.permute.xlu1 %2824 }
 0x722   : > { %3352 = vmatmul.mubr.f32.gmra.mrb[108].mxu1 %v2349_v22  ;;  %v2403_v22 = vld [vmem:[%s7482_s22 + $0x3d0] sm:$0xff] }
 0x723   : > { %3356 = vmatprep.mubr.f32.mxu1 %v2352_v24  ;;  %v7336_v24 = vpop.permute.xlu0 %2829 }
 0x726   : > { %3357 = vmatmul.mubr.f32.gmra.mrb[110].mxu1 %v2351_v26  ;;  %v2406_v26 = vld [vmem:[%s7482_s22 + $0x3e8] sm:$0xff] }
 0x727   : > { %3361 = vmatprep.mubr.f32.mxu1 %v2354_v27 }
 0x72a   : > { %3362 = vmatmul.mubr.f32.gmra.mrb[112].mxu1 %v2353_v28 }
 0x72b   : > { %3366 = vmatprep.mubr.f32.mxu1 %v2356_v45 }
 0x72e   : > { %3367 = vmatmul.mubr.f32.gmra.mrb[114].mxu1 %v2355_v15 }
 0x72f   : > { %3371 = vmatprep.mubr.f32.mxu1 %v2358_v20 }
 0x732   : > { %3372 = vmatmul.mubr.f32.gmra.mrb[116].mxu1 %v2357_v32  ;;  %v2405_v32 = vld [vmem:[%s7482_s22 + $0x3e0] sm:$0xff] }
 0x733   : > { %3376 = vmatprep.mubr.f32.mxu1 %v2360_v35  ;;  %v7346_v35 = vpop.permute.xlu1 %2834 }
 0x736   : > { %3377 = vmatmul.mubr.f32.gmra.mrb[118].mxu1 %v2359_v36 }
 0x737   : > { %3381 = vmatprep.mubr.f32.mxu1 %v2362_v40  ;;  %v2408_v40 = vld [vmem:[%s7482_s22 + $0x3f8] sm:$0xff] }
 0x73a   : > { %3382 = vmatmul.mubr.f32.gmra.mrb[120].mxu1 %v2361_v43 }
 0x73b   : > { %3386 = vmatprep.mubr.f32.mxu1 %v2364_v38 }
 0x73e   : > { %3387 = vmatmul.mubr.f32.gmra.mrb[122].mxu1 %v2363_v48 }
 0x73f   : > { %3391 = vmatprep.mubr.f32.mxu1 %v2366_v44 }
 0x742   : > { %3392 = vmatmul.mubr.f32.gmra.mrb[124].mxu1 %v2365_v25 }
 0x743   : > { %3396 = vmatprep.mubr.f32.mxu1 %v2368_v47 }
 0x746   : > { %3397 = vmatmul.mubr.f32.gmra.mrb[126].mxu1 %v2367_v49  ;;  %v2407_v49 = vld [vmem:[%s7482_s22 + $0x3f0] sm:$0xff] }
 0x747   : > { %3401 = vmatprep.mubr.f32.mxu1 %v2370_v51  ;;  %v2840_v51 = vpop.permute.xlu0 %2839 }
 0x74a   : > { %3402 = vmatmul.mubr.f32.gmra.mrb[128].mxu1 %v2369_v31 }
 0x74b   : > { %3406 = vmatprep.mubr.f32.mxu1 %v2372_v52 }
 0x74e   : > { %3407 = vmatmul.mubr.f32.gmra.mrb[130].mxu1 %v2371_v61 }
 0x74f   : > { %3411 = vmatprep.mubr.f32.mxu1 %v2374_v53 }
 0x752   : > { %3412 = vmatmul.mubr.f32.gmra.mrb[132].mxu1 %v2373_v54 }
 0x753   : > { %3416 = vmatprep.mubr.f32.mxu1 %v2376_v55 }
 0x756   : > { %3417 = vmatmul.mubr.f32.gmra.mrb[134].mxu1 %v2375_v50 }
 0x757   : > { %3421 = vmatprep.mubr.f32.mxu1 %v2378_v56  ;;  %v2845_v56 = vpop.permute.xlu1 %2844 }
 0x75a   : > { %3422 = vmatmul.mubr.f32.gmra.mrb[136].mxu1 %v2377_v23 }
 0x75b   : > { %3426 = vmatprep.mubr.f32.mxu1 %v2380_v59 }
 0x75e   : > { %3427 = vmatmul.mubr.f32.gmra.mrb[138].mxu1 %v2379_v58 }
 0x75f   : > { %3431 = vmatprep.mubr.f32.mxu1 %v2382_v62 }
 0x762   : > { %3432 = vmatmul.mubr.f32.gmra.mrb[140].mxu1 %v2381_v3 }
 0x763   : > { %3436 = vmatprep.mubr.f32.mxu1 %v2384_v30 }
 0x766   : > { %3437 = vmatmul.mubr.f32.gmra.mrb[142].mxu1 %v2383_v4 }
 0x767   : > { %3441 = vmatprep.mubr.f32.mxu1 %v2386_v7  ;;  %v2850_v7 = vpop.permute.xlu0 %2849 }
 0x76a   : > { %3442 = vmatmul.mubr.f32.gmra.mrb[144].mxu1 %v2385_v19 }
 0x76b   : > { %3446 = vmatprep.mubr.f32.mxu1 %v2388_v5 }
 0x76e   : > { %3447 = vmatmul.mubr.f32.gmra.mrb[146].mxu1 %v2387_v2 }
 0x76f   : > { %3451 = vmatprep.mubr.f32.mxu1 %v2390_v8 }
 0x772   : > { %3452 = vmatmul.mubr.f32.gmra.mrb[148].mxu1 %v2389_v10 }
 0x773   : > { %3456 = vmatprep.mubr.f32.mxu1 %v2392_v34 }
 0x776   : > { %3457 = vmatmul.mubr.f32.gmra.mrb[150].mxu1 %v2391_v12 }
 0x777   : > { %3461 = vmatprep.mubr.f32.mxu1 %v2394_v11  ;;  %v2855_v11 = vpop.permute.xlu1 %2854 }
 0x77a   : > { %3462 = vmatmul.mubr.f32.gmra.mrb[152].mxu1 %v2393_v6 }
 0x77b   : > { %3466 = vmatprep.mubr.f32.mxu1 %v2396_v13 }
 0x77e   : > { %3467 = vmatmul.mubr.f32.gmra.mrb[154].mxu1 %v2395_v17 }
 0x77f   : > { %3471 = vmatprep.mubr.f32.mxu1 %v2398_v60 }
 0x782   : > { %3472 = vmatmul.mubr.f32.gmra.mrb[156].mxu1 %v2397_v29 }
 0x783   : > { %3476 = vmatprep.mubr.f32.mxu1 %v2400_v57 }
 0x786   : > { %3477 = vmatmul.mubr.f32.gmra.mrb[158].mxu1 %v2399_v63 }
 0x787   : > { %3481 = vmatprep.mubr.f32.mxu1 %v2402_v9 }
 0x78a   : > { %3482 = vmatmul.mubr.f32.gmra.mrb[160].mxu1 %v2401_v41 }
 0x78b   : > { %3486 = vmatprep.mubr.f32.mxu1 %v2404_v21 }
 0x78d   : > { %v3183_v27 = vpop.f32.mrb[64].mxu0  ;;  %v7341_v28 = vpop.f32.mrb[56].mxu1 }
 0x78e   : > { %v3184_v45 = vadd.f32 %v3183_v27, %v2800_v14  ;;  %v3225_v15 = vpop.f32.mrb[57].mxu1  ;;  %3487 = vmatmul.mubr.f32.gmra.mrb[162].mxu1 %v2403_v22  ;;  %v3185_v20 = vpop.f32.mrb[65].mxu0  ;;  %v3224_v22 = vadd.f32 %v7341_v28, %v2840_v51 }
 0x78f   : > { %3491 = vmatprep.mubr.f32.mxu1 %v2406_v26 }
 0x790   : > { %vm3502_vm0 = vcmp.ge.f32.partialorder %v3184_v45, 0.0  ;;  %v3566_v36 = vmul.f32 0.2, %v3184_v45  ;;  %vm3510_vm12 = vcmp.ge.f32.partialorder %v3224_v22, 0.0 }
 0x791   : > { %v3188_v43 = vpop.f32.mrb[66].mxu0  ;;  %v7351_v38 = vpop.f32.mrb[58].mxu1 }
 0x792   : > { %v3189_v48 = vadd.f32 %v3188_v43, %v2805_v37  ;;  %v3230_v44 = vpop.f32.mrb[59].mxu1  ;;  %3492 = vmatmul.mubr.f32.gmra.mrb[164].mxu1 %v2405_v32  ;;  %v3630_v25 = vsel %vm3502_vm0, %v3184_v45, %v3566_v36  ;;  %v3190_v47 = vpop.f32.mrb[67].mxu0  ;;  %v3229_v15 = vadd.f32 %v7351_v38, %v2845_v56 }
 0x793   : > { %5281 = vmatprep.mubr.msk.f32.mxu0 %vm3697_vm5, %v3630_v25  ;;  %3496 = vmatprep.mubr.f32.mxu1 %v2408_v40 }
 0x794   : > { %vm3503_vm6 = vcmp.ge.f32.partialorder %v3189_v48, 0.0  ;;  %v3567_v31 = vmul.f32 0.2, %v3189_v48  ;;  %v3575_v25 = vmul.f32 0.2, %v3229_v15  ;;  %vm3511_vm14 = vcmp.ge.f32.partialorder %v3229_v15, 0.0 }
 0x795   : > { %v3193_v52 = vpop.f32.mrb[68].mxu0  ;;  %v3233_v61 = vpop.f32.mrb[60].mxu1 }
 0x796   : > { %v3631_v53 = vsel %vm3503_vm6, %v3189_v48, %v3567_v31  ;;  %v3194_v54 = vadd.f32 %v3193_v52, %v2810_v16  ;;  %v3235_v55 = vpop.f32.mrb[61].mxu1  ;;  %3497 = vmatmul.mubr.f32.gmra.mrb[166].mxu1 %v2407_v49  ;;  %v3195_v50 = vpop.f32.mrb[69].mxu0  ;;  %v3234_v43 = vadd.f32 %v3233_v61, %v2850_v7  ;;  %v3639_v56 = vsel %vm3511_vm14, %v3229_v15, %v3575_v25 }
 0x797   : > { %5282 = vmatmul.mubr.msk.f32.vlgmr.msra.gmra.mrb[80].mxu0 %vm3697_vm5, %v3631_v53  ;;  %v2860_v16 = vpop.permute.xlu0 %2859 }
 0x798   : > { %vm3504_vm7 = vcmp.ge.f32.partialorder %v3194_v54, 0.0  ;;  %v3568_v23 = vmul.f32 0.2, %v3194_v54  ;;  %v3576_v38 = vmul.f32 0.2, %v3234_v43  ;;  %vm3512_vm15 = vcmp.ge.f32.partialorder %v3234_v43, 0.0 }
 0x799   : > { %v3198_v59 = vpop.f32.mrb[70].mxu0  ;;  %v3238_v58 = vpop.f32.mrb[62].mxu1 }
 0x79a   : > { %v3199_v62 = vadd.f32 %v3198_v59, %v2815_v0  ;;  %v3240_v3 = vpop.f32.mrb[63].mxu1  ;;  %v3632_v30 = vsel %vm3504_vm7, %v3194_v54, %v3568_v23  ;;  %v3200_v4 = vpop.f32.mrb[71].mxu0  ;;  %v3239_v47 = vadd.f32 %v3238_v58, %v2855_v11  ;;  %v3640_v58 = vsel %vm3512_vm15, %v3234_v43, %v3576_v38 }
 0x79b   : > { %5284 = vmatprep.mubr.msk.f32.mxu0 %vm3697_vm5, %v3632_v30  ;;  %v2870_v48 = vpop.permute.xlu0 %2869 }
 0x79c   : > { %vm3505_vm8 = vcmp.ge.f32.partialorder %v3199_v62, 0.0  ;;  %v3569_v19 = vmul.f32 0.2, %v3199_v62  ;;  %v3577_v54 = vmul.f32 0.2, %v3239_v47  ;;  %vm3513_vm2 = vcmp.ge.f32.partialorder %v3239_v47, 0.0 }
 0x79d   : > { %v3203_v5 = vpop.f32.mrb[72].mxu0  ;;  %v3243_v2 = vpop.f32.mrb[64].mxu1 }
 0x79e   : > { %v3204_v8 = vadd.f32 %v3203_v5, %v2820_v18  ;;  %v3245_v10 = vpop.f32.mrb[65].mxu1  ;;  %v3633_v34 = vsel %vm3505_vm8, %v3199_v62, %v3569_v19  ;;  %v3205_v12 = vpop.f32.mrb[73].mxu0  ;;  %v3641_v19 = vsel %vm3513_vm2, %v3239_v47, %v3577_v54 }
 0x79f   : > { %5285 = vmatmul.mubr.msk.f32.gmra.mrb[82].mxu0 %vm3697_vm5, %v3633_v34  ;;  %v2880_v53 = vpop.permute.xlu0 %2879 }
 0x7a0   : > { %vm3506_vm9 = vcmp.ge.f32.partialorder %v3204_v8, 0.0  ;;  %v3570_v6 = vmul.f32 0.2, %v3204_v8 }
 0x7a1   : > { %v3208_v13 = vpop.f32.mrb[74].mxu0  ;;  %v3248_v14 = vpop.f32.mrb[66].mxu1 }
 0x7a2   : > { %v3209_v17 = vadd.f32 %v3208_v13, %v7331_v1  ;;  %v3250_v60 = vpop.f32.mrb[67].mxu1  ;;  %v3634_v37 = vsel %vm3506_vm9, %v3204_v8, %v3570_v6  ;;  %v3210_v29 = vpop.f32.mrb[75].mxu0 }
 0x7a3   : > { %5287 = vmatprep.mubr.msk.f32.mxu0 %vm3697_vm5, %v3634_v37  ;;  %v2865_v1 = vpop.permute.xlu1 %2864  ;;  %v2890_v10 = vpop.permute.xlu0 %2889 }
 0x7a4   : > { %vm3507_vm10 = vcmp.ge.f32.partialorder %v3209_v17, 0.0  ;;  %v3571_v57 = vmul.f32 0.2, %v3209_v17  ;;  %v3249_v55 = vadd.f32 %v3248_v14, %v2865_v1 }
 0x7a5   : > { %v3213_v63 = vpop.f32.mrb[76].mxu0  ;;  %v3253_v0 = vpop.f32.mrb[68].mxu1 }
 0x7a6   : > { %v3214_v9 = vadd.f32 %v3213_v63, %v7336_v24  ;;  %v3255_v18 = vpop.f32.mrb[69].mxu1  ;;  %v3635_v41 = vsel %vm3507_vm10, %v3209_v17, %v3571_v57  ;;  %v3215_v21 = vpop.f32.mrb[77].mxu0  ;;  %v3574_v24 = vmul.f32 0.2, %v3224_v22  ;;  %v3254_v59 = vadd.f32 %v3253_v0, %v2870_v48 }
 0x7a7   : > { %5288 = vmatmul.mubr.msk.f32.gmra.mrb[84].mxu0 %vm3697_vm5, %v3635_v41  ;;  %v2875_v31 = vpop.permute.xlu1 %2874  ;;  %v3579_v30 = vmul.f32 0.2, %v3249_v55  ;;  %vm3515_vm1 = vcmp.ge.f32.partialorder %v3249_v55, 0.0 }
 0x7a8   : > { %vm3508_vm11 = vcmp.ge.f32.partialorder %v3214_v9, 0.0  ;;  %v3572_v26 = vmul.f32 0.2, %v3214_v9  ;;  %v3638_v52 = vsel %vm3510_vm12, %v3224_v22, %v3574_v24  ;;  %v3580_v5 = vmul.f32 0.2, %v3254_v59 }
 0x7a9   : > { %v3218_v27 = vpop.f32.mrb[78].mxu0  ;;  %v3258_v45 = vpop.f32.mrb[70].mxu1  ;;  %vm3516_vm4 = vcmp.ge.f32.partialorder %v3254_v59, 0.0  ;;  %v3643_v13 = vsel %vm3515_vm1, %v3249_v55, %v3579_v30 }
 0x7aa   : > { %v3219_v20 = vadd.f32 %v3218_v27, %v7346_v35  ;;  %v3260_v32 = vpop.f32.mrb[71].mxu1  ;;  %v3636_v36 = vsel %vm3508_vm11, %v3214_v9, %v3572_v26  ;;  %v3220_v40 = vpop.f32.mrb[79].mxu0  ;;  %v3244_v35 = vadd.f32 %v3243_v2, %v2860_v16  ;;  %v3259_v4 = vadd.f32 %v3258_v45, %v2875_v31 }
 0x7ab   : > { %5290 = vmatprep.mubr.msk.f32.mxu0 %vm3697_vm5, %v3636_v36  ;;  %v2885_v62 = vpop.permute.xlu1 %2884  ;;  %v3644_v37 = vsel %vm3516_vm4, %v3254_v59, %v3580_v5  ;;  %v2900_v16 = vpop.permute.xlu0 %2899 }
 0x7ac   : > { %vm3509_vm13 = vcmp.ge.f32.partialorder %v3219_v20, 0.0  ;;  %v3573_v28 = vmul.f32 0.2, %v3219_v20  ;;  %v3578_v23 = vmul.f32 0.2, %v3244_v35  ;;  %vm3514_vm3 = vcmp.ge.f32.partialorder %v3244_v35, 0.0 }
 0x7ad   : > { %v3263_v44 = vpop.f32.mrb[72].mxu1  ;;  %v3581_v12 = vmul.f32 0.2, %v3259_v4  ;;  %vm3517_vm0 = vcmp.ge.f32.partialorder %v3259_v4, 0.0 }
 0x7ae   : > { %v3265_v49 = vpop.f32.mrb[73].mxu1  ;;  %v3637_v51 = vsel %vm3509_vm13, %v3219_v20, %v3573_v28  ;;  %v3264_v2 = vadd.f32 %v3263_v44, %v2880_v53  ;;  %v3642_v8 = vsel %vm3514_vm3, %v3244_v35, %v3578_v23 }
 0x7af   : > { %5291 = vmatmul.mubr.msk.f32.gmra.mrb[86].mxu0 %vm3697_vm5, %v3637_v51  ;;  %v2895_v14 = vpop.permute.xlu1 %2894  ;;  %v3645_v9 = vsel %vm3517_vm0, %v3259_v4, %v3581_v12  ;;  %v2910_v36 = vpop.permute.xlu0 %2909 }
 0x7b0   : > { %5293 = vmatprep.mubr.msk.f32.mxu0 %vm3697_vm5, %v3638_v52  ;;  %v3582_v17 = vmul.f32 0.2, %v3264_v2  ;;  %vm3518_vm6 = vcmp.ge.f32.partialorder %v3264_v2, 0.0 }
 0x7b1   : > { %v3268_v61 = vpop.f32.mrb[74].mxu1 }
 0x7b2   : > { %v3270_v50 = vpop.f32.mrb[75].mxu1  ;;  %v3269_v11 = vadd.f32 %v3268_v61, %v2885_v62  ;;  %v3646_v21 = vsel %vm3518_vm6, %v3264_v2, %v3582_v17 }
 0x7b3   : > { %5294 = vmatmul.mubr.msk.f32.gmra.mrb[88].mxu0 %vm3697_vm5, %v3639_v56  ;;  %v2905_v22 = vpop.permute.xlu1 %2904  ;;  %v2920_v61 = vpop.permute.xlu0 %2919 }
 0x7b4   : > { %5296 = vmatprep.mubr.msk.f32.mxu0 %vm3697_vm5, %v3640_v58  ;;  %v3583_v57 = vmul.f32 0.2, %v3269_v11  ;;  %vm3519_vm7 = vcmp.ge.f32.partialorder %v3269_v11, 0.0 }
 0x7b5   : > { %v3273_v3 = vpop.f32.mrb[76].mxu1 }
 0x7b6   : > { %v3275_v7 = vpop.f32.mrb[77].mxu1  ;;  %v3274_v60 = vadd.f32 %v3273_v3, %v2890_v10  ;;  %v3647_v15 = vsel %vm3519_vm7, %v3269_v11, %v3583_v57 }
 0x7b7   : > { %5297 = vmatmul.mubr.msk.f32.gmra.mrb[90].mxu0 %vm3697_vm5, %v3641_v19  ;;  %v2915_v47 = vpop.permute.xlu1 %2914  ;;  %v2930_v4 = vpop.permute.xlu0 %2929 }
 0x7b8   : > { %5299 = vmatprep.mubr.msk.f32.mxu0 %vm3697_vm5, %v3642_v8  ;;  %v3584_v18 = vmul.f32 0.2, %v3274_v60  ;;  %vm3520_vm8 = vcmp.ge.f32.partialorder %v3274_v60, 0.0 }
 0x7b9   : > { %v3278_v34 = vpop.f32.mrb[78].mxu1 }
 0x7ba   : > { %v3280_v6 = vpop.f32.mrb[79].mxu1  ;;  %v3279_v63 = vadd.f32 %v3278_v34, %v2895_v14  ;;  %v3648_v32 = vsel %vm3520_vm8, %v3274_v60, %v3584_v18 }
 0x7bb   : > { %5300 = vmatmul.mubr.msk.f32.gmra.mrb[92].mxu0 %vm3697_vm5, %v3643_v13  ;;  %v2925_v23 = vpop.permute.xlu1 %2924  ;;  %v2940_v14 = vpop.permute.xlu0 %2939 }
 0x7bc   : > { %5302 = vmatprep.mubr.msk.f32.mxu0 %vm3697_vm5, %v3644_v37  ;;  %v3585_v26 = vmul.f32 0.2, %v3279_v63  ;;  %vm3521_vm9 = vcmp.ge.f32.partialorder %v3279_v63, 0.0 }
 0x7bd   : > { %v3283_v29 = vpop.f32.mrb[80].mxu1 }
 0x7be   : > { %v3285_v0 = vpop.f32.mrb[81].mxu1  ;;  %v3284_v41 = vadd.f32 %v3283_v29, %v2900_v16  ;;  %v3649_v28 = vsel %vm3521_vm9, %v3279_v63, %v3585_v26 }
 0x7bf   : > { %5303 = vmatmul.mubr.msk.f32.gmra.mrb[94].mxu0 %vm3697_vm5, %v3645_v9  ;;  %v2935_v10 = vpop.permute.xlu1 %2934 }
 0x7c0   : > { %5305 = vmatprep.mubr.msk.f32.mxu0 %vm3697_vm5, %v3646_v21  ;;  %v3586_v20 = vmul.f32 0.2, %v3284_v41  ;;  %vm3522_vm10 = vcmp.ge.f32.partialorder %v3284_v41, 0.0  ;;  %v2950_v21 = vpop.permute.xlu0 %2949 }
 0x7c1   : > { %v3288_v1 = vpop.f32.mrb[82].mxu1 }
 0x7c2   : > { %v3289_v27 = vadd.f32 %v3288_v1, %v2905_v22  ;;  %v3290_v45 = vpop.f32.mrb[83].mxu1  ;;  %v3650_v44 = vsel %vm3522_vm10, %v3284_v41, %v3586_v20 }
 0x7c3   : > { %5306 = vmatmul.mubr.msk.f32.gmra.mrb[96].mxu0 %vm3697_vm5, %v3647_v15  ;;  %v2945_v57 = vpop.permute.xlu1 %2944 }
 0x7c4   : > { %5308 = vmatprep.mubr.msk.f32.mxu0 %vm3697_vm5, %v3648_v32  ;;  %v3587_v24 = vmul.f32 0.2, %v3289_v27  ;;  %vm3523_vm11 = vcmp.ge.f32.partialorder %v3289_v27, 0.0 }
 0x7c5   : > { %v3293_v40 = vpop.f32.mrb[84].mxu1 }
 0x7c6   : > { %v3294_v43 = vadd.f32 %v3293_v40, %v2910_v36  ;;  %v3295_v48 = vpop.f32.mrb[85].mxu1  ;;  %v3651_v38 = vsel %vm3523_vm11, %v3289_v27, %v3587_v24 }
 0x7c7   : > { %5309 = vmatmul.mubr.msk.f32.gmra.mrb[98].mxu0 %vm3697_vm5, %v3649_v28  ;;  %v2955_v15 = vpop.permute.xlu1 %2954 }
 0x7c8   : > { %vm3524_vm12 = vcmp.ge.f32.partialorder %v3294_v43, 0.0  ;;  %v3588_v25 = vmul.f32 0.2, %v3294_v43  ;;  %5311 = vmatprep.mubr.msk.f32.mxu0 %vm3697_vm5, %v3650_v44 }
 0x7c9   : > { %v3298_v49 = vpop.f32.mrb[86].mxu1 }
 0x7ca   : > { %v3299_v51 = vadd.f32 %v3298_v49, %v2915_v47  ;;  %v3300_v31 = vpop.f32.mrb[87].mxu1  ;;  %v3652_v35 = vsel %vm3524_vm12, %v3294_v43, %v3588_v25  ;;  %v2960_v43 = vpop.permute.xlu0 %2959 }
 0x7cb   : > { %5312 = vmatmul.mubr.msk.f32.gmra.mrb[100].mxu0 %vm3697_vm5, %v3651_v38  ;;  %v2965_v49 = vpop.permute.xlu1 %2964 }
 0x7cc   : > { %vm3525_vm13 = vcmp.ge.f32.partialorder %v3299_v51, 0.0  ;;  %v3589_v52 = vmul.f32 0.2, %v3299_v51  ;;  %5314 = vmatprep.mubr.msk.f32.mxu0 %vm3697_vm5, %v3652_v35 }
 0x7cd   : > { %v3303_v53 = vpop.f32.mrb[88].mxu1 }
 0x7ce   : > { %v3304_v54 = vadd.f32 %v3303_v53, %v2920_v61  ;;  %v3305_v55 = vpop.f32.mrb[89].mxu1  ;;  %v3653_v50 = vsel %vm3525_vm13, %v3299_v51, %v3589_v52  ;;  %v2970_v61 = vpop.permute.xlu0 %2969 }
 0x7cf   : > { %5315 = vmatmul.mubr.msk.f32.gmra.mrb[102].mxu0 %vm3697_vm5, %v3653_v50 }
 0x7d0   : > { %vm3526_vm14 = vcmp.ge.f32.partialorder %v3304_v54, 0.0  ;;  %v3590_v56 = vmul.f32 0.2, %v3304_v54 }
 0x7d1   : > { %v3308_v59 = vpop.f32.mrb[90].mxu1 }
 0x7d2   : > { %v3309_v58 = vadd.f32 %v3308_v59, %v2925_v23  ;;  %v3310_v62 = vpop.f32.mrb[91].mxu1  ;;  %v3654_v3 = vsel %vm3526_vm14, %v3304_v54, %v3590_v56  ;;  %v2975_v23 = vpop.permute.xlu1 %2974 }
 0x7d3   : > { %5317 = vmatprep.mubr.msk.f32.mxu0 %vm3697_vm5, %v3654_v3 }
 0x7d4   : > { %vm3527_vm15 = vcmp.ge.f32.partialorder %v3309_v58, 0.0  ;;  %v3591_v30 = vmul.f32 0.2, %v3309_v58 }
 0x7d5   : > { %v3313_v7 = vpop.f32.mrb[92].mxu1 }
 0x7d6   : > { %v3314_v19 = vadd.f32 %v3313_v7, %v2930_v4  ;;  %v3315_v5 = vpop.f32.mrb[93].mxu1  ;;  %v3655_v2 = vsel %vm3527_vm15, %v3309_v58, %v3591_v30  ;;  %v2980_v4 = vpop.permute.xlu0 %2979 }
 0x7d7   : > { %5318 = vmatmul.mubr.msk.f32.gmra.mrb[104].mxu0 %vm3697_vm5, %v3655_v2 }
 0x7d8   : > { %vm3528_vm2 = vcmp.ge.f32.partialorder %v3314_v19, 0.0  ;;  %v3592_v8 = vmul.f32 0.2, %v3314_v19 }
 0x7d9   : > { %v3318_v34 = vpop.f32.mrb[94].mxu1 }
 0x7da   : > { %v3319_v12 = vadd.f32 %v3318_v34, %v2935_v10  ;;  %v3320_v11 = vpop.f32.mrb[95].mxu1  ;;  %v3656_v6 = vsel %vm3528_vm2, %v3314_v19, %v3592_v8  ;;  %v2985_v10 = vpop.permute.xlu1 %2984 }
 0x7db   : > { %5320 = vmatprep.mubr.msk.f32.mxu0 %vm3697_vm5, %v3656_v6 }
 0x7dc   : > { %vm3529_vm3 = vcmp.ge.f32.partialorder %v3319_v12, 0.0  ;;  %v3593_v13 = vmul.f32 0.2, %v3319_v12 }
 0x7dd   : > { %v3323_v17 = vpop.f32.mrb[96].mxu1 }
 0x7de   : > { %v3324_v60 = vadd.f32 %v3323_v17, %v2940_v14  ;;  %v3325_v37 = vpop.f32.mrb[97].mxu1  ;;  %v3657_v29 = vsel %vm3529_vm3, %v3319_v12, %v3593_v13  ;;  %v2990_v14 = vpop.permute.xlu0 %2989 }
 0x7df   : > { %5321 = vmatmul.mubr.msk.f32.gmra.mrb[106].mxu0 %vm3697_vm5, %v3657_v29 }
 0x7e0   : > { %vm3530_vm1 = vcmp.ge.f32.partialorder %v3324_v60, 0.0  ;;  %v3594_v16 = vmul.f32 0.2, %v3324_v60 }
 0x7e1   : > { %v3328_v63 = vpop.f32.mrb[98].mxu1 }
 0x7e2   : > { %v3329_v0 = vadd.f32 %v3328_v63, %v2945_v57  ;;  %v3330_v9 = vpop.f32.mrb[99].mxu1  ;;  %v3658_v18 = vsel %vm3530_vm1, %v3324_v60, %v3594_v16  ;;  %v2995_v57 = vpop.permute.xlu1 %2994 }
 0x7e3   : > { %5323 = vmatprep.mubr.msk.f32.mxu0 %vm3697_vm5, %v3658_v18 }
 0x7e4   : > { %vm3531_vm4 = vcmp.ge.f32.partialorder %v3329_v0, 0.0  ;;  %v3595_v41 = vmul.f32 0.2, %v3329_v0 }
 0x7e5   : > { %v3333_v22 = vpop.f32.mrb[100].mxu1 }
 0x7e6   : > { %v3334_v1 = vadd.f32 %v3333_v22, %v2950_v21  ;;  %v3335_v26 = vpop.f32.mrb[101].mxu1  ;;  %v3659_v27 = vsel %vm3531_vm4, %v3329_v0, %v3595_v41  ;;  %v3000_v21 = vpop.permute.xlu0 %2999 }
 0x7e7   : > { %5324 = vmatmul.mubr.msk.f32.gmra.mrb[108].mxu0 %vm3697_vm5, %v3659_v27 }
 0x7e8   : > { %vm3532_vm0 = vcmp.ge.f32.partialorder %v3334_v1, 0.0  ;;  %v3596_v45 = vmul.f32 0.2, %v3334_v1 }
 0x7e9   : > { %v3338_v20 = vpop.f32.mrb[102].mxu1 }
 0x7ea   : > { %v3339_v32 = vadd.f32 %v3338_v20, %v2955_v15  ;;  %v3340_v36 = vpop.f32.mrb[103].mxu1  ;;  %v3660_v40 = vsel %vm3532_vm0, %v3334_v1, %v3596_v45  ;;  %v3005_v15 = vpop.permute.xlu1 %3004 }
 0x7eb   : > { %5326 = vmatprep.mubr.msk.f32.mxu0 %vm3697_vm5, %v3660_v40 }
 0x7ec   : > { %vm3533_vm6 = vcmp.ge.f32.partialorder %v3339_v32, 0.0  ;;  %v3597_v24 = vmul.f32 0.2, %v3339_v32 }
 0x7ed   : > { %v3343_v48 = vpop.f32.mrb[104].mxu1 }
 0x7ee   : > { %v3344_v28 = vadd.f32 %v3343_v48, %v2960_v43  ;;  %v3345_v44 = vpop.f32.mrb[105].mxu1  ;;  %v3661_v25 = vsel %vm3533_vm6, %v3339_v32, %v3597_v24  ;;  %v3010_v43 = vpop.permute.xlu0 %3009 }
 0x7ef   : > { %5327 = vmatmul.mubr.msk.f32.gmra.mrb[110].mxu0 %vm3697_vm5, %v3661_v25 }
 0x7f0   : > { %vm3534_vm7 = vcmp.ge.f32.partialorder %v3344_v28, 0.0  ;;  %v3598_v47 = vmul.f32 0.2, %v3344_v28 }
 0x7f1   : > { %v3348_v51 = vpop.f32.mrb[106].mxu1 }
 0x7f2   : > { %v3349_v31 = vadd.f32 %v3348_v51, %v2965_v49  ;;  %v3350_v38 = vpop.f32.mrb[107].mxu1  ;;  %v3662_v35 = vsel %vm3534_vm7, %v3344_v28, %v3598_v47  ;;  %v3015_v49 = vpop.permute.xlu1 %3014 }
 0x7f3   : > { %5329 = vmatprep.mubr.msk.f32.mxu0 %vm3697_vm5, %v3662_v35 }
 0x7f4   : > { %vm3535_vm8 = vcmp.ge.f32.partialorder %v3349_v31, 0.0  ;;  %v3599_v52 = vmul.f32 0.2, %v3349_v31 }
 0x7f5   : > { %v3353_v53 = vpop.f32.mrb[108].mxu1 }
 0x7f6   : > { %v3354_v54 = vadd.f32 %v3353_v53, %v2970_v61  ;;  %v3355_v55 = vpop.f32.mrb[109].mxu1  ;;  %v3663_v50 = vsel %vm3535_vm8, %v3349_v31, %v3599_v52  ;;  %v3020_v61 = vpop.permute.xlu0 %3019 }
 0x7f7   : > { %5330 = vmatmul.mubr.msk.f32.gmra.mrb[112].mxu0 %vm3697_vm5, %v3663_v50 }
 0x7f8   : > { %vm3536_vm9 = vcmp.ge.f32.partialorder %v3354_v54, 0.0  ;;  %v3600_v56 = vmul.f32 0.2, %v3354_v54 }
 0x7f9   : > { %v3358_v59 = vpop.f32.mrb[110].mxu1 }
 0x7fa   : > { %v3359_v58 = vadd.f32 %v3358_v59, %v2975_v23  ;;  %v3360_v62 = vpop.f32.mrb[111].mxu1  ;;  %v3664_v3 = vsel %vm3536_vm9, %v3354_v54, %v3600_v56  ;;  %v3025_v23 = vpop.permute.xlu1 %3024 }
 0x7fb   : > { %5332 = vmatprep.mubr.msk.f32.mxu0 %vm3697_vm5, %v3664_v3 }
 0x7fc   : > { %vm3537_vm10 = vcmp.ge.f32.partialorder %v3359_v58, 0.0  ;;  %v3601_v30 = vmul.f32 0.2, %v3359_v58 }
 0x7fd   : > { %v3363_v7 = vpop.f32.mrb[112].mxu1 }
 0x7fe   : > { %v3364_v19 = vadd.f32 %v3363_v7, %v2980_v4  ;;  %v3365_v5 = vpop.f32.mrb[113].mxu1  ;;  %v3665_v2 = vsel %vm3537_vm10, %v3359_v58, %v3601_v30  ;;  %v3030_v4 = vpop.permute.xlu0 %3029 }
 0x7ff   : > { %5333 = vmatmul.mubr.msk.f32.gmra.mrb[114].mxu0 %vm3697_vm5, %v3665_v2 }
 0x800   : > { %vm3538_vm11 = vcmp.ge.f32.partialorder %v3364_v19, 0.0  ;;  %v3602_v8 = vmul.f32 0.2, %v3364_v19 }
 0x801   : > { %v3368_v34 = vpop.f32.mrb[114].mxu1 }
 0x802   : > { %v3369_v12 = vadd.f32 %v3368_v34, %v2985_v10  ;;  %v3370_v11 = vpop.f32.mrb[115].mxu1  ;;  %v3666_v6 = vsel %vm3538_vm11, %v3364_v19, %v3602_v8  ;;  %v3035_v10 = vpop.permute.xlu1 %3034 }
 0x803   : > { %5335 = vmatprep.mubr.msk.f32.mxu0 %vm3697_vm5, %v3666_v6 }
 0x804   : > { %vm3539_vm12 = vcmp.ge.f32.partialorder %v3369_v12, 0.0  ;;  %v3603_v13 = vmul.f32 0.2, %v3369_v12 }
 0x805   : > { %v3373_v17 = vpop.f32.mrb[116].mxu1 }
 0x806   : > { %v3374_v60 = vadd.f32 %v3373_v17, %v2990_v14  ;;  %v3375_v37 = vpop.f32.mrb[117].mxu1  ;;  %v3667_v29 = vsel %vm3539_vm12, %v3369_v12, %v3603_v13  ;;  %v3040_v14 = vpop.permute.xlu0 %3039 }
 0x807   : > { %5336 = vmatmul.mubr.msk.f32.gmra.mrb[116].mxu0 %vm3697_vm5, %v3667_v29 }
 0x808   : > { %vm3540_vm13 = vcmp.ge.f32.partialorder %v3374_v60, 0.0  ;;  %v3604_v16 = vmul.f32 0.2, %v3374_v60 }
 0x809   : > { %v3378_v63 = vpop.f32.mrb[118].mxu1 }
 0x80a   : > { %v3379_v0 = vadd.f32 %v3378_v63, %v2995_v57  ;;  %v3380_v9 = vpop.f32.mrb[119].mxu1  ;;  %v3668_v18 = vsel %vm3540_vm13, %v3374_v60, %v3604_v16  ;;  %v3045_v57 = vpop.permute.xlu1 %3044 }
 0x80b   : > { %5338 = vmatprep.mubr.msk.f32.mxu0 %vm3697_vm5, %v3668_v18 }
 0x80c   : > { %vm3541_vm14 = vcmp.ge.f32.partialorder %v3379_v0, 0.0  ;;  %v3605_v41 = vmul.f32 0.2, %v3379_v0 }
 0x80d   : > { %v3383_v22 = vpop.f32.mrb[120].mxu1 }
 0x80e   : > { %v3384_v1 = vadd.f32 %v3383_v22, %v3000_v21  ;;  %v3385_v26 = vpop.f32.mrb[121].mxu1  ;;  %v3669_v27 = vsel %vm3541_vm14, %v3379_v0, %v3605_v41  ;;  %v3050_v21 = vpop.permute.xlu0 %3049 }
 0x80f   : > { %5339 = vmatmul.mubr.msk.f32.gmra.mrb[118].mxu0 %vm3697_vm5, %v3669_v27 }
 0x810   : > { %vm3542_vm15 = vcmp.ge.f32.partialorder %v3384_v1, 0.0  ;;  %v3606_v45 = vmul.f32 0.2, %v3384_v1 }
 0x811   : > { %v3388_v20 = vpop.f32.mrb[122].mxu1 }
 0x812   : > { %v3389_v32 = vadd.f32 %v3388_v20, %v3005_v15  ;;  %v3390_v36 = vpop.f32.mrb[123].mxu1  ;;  %v3670_v40 = vsel %vm3542_vm15, %v3384_v1, %v3606_v45  ;;  %v3055_v15 = vpop.permute.xlu1 %3054 }
 0x813   : > { %5341 = vmatprep.mubr.msk.f32.mxu0 %vm3697_vm5, %v3670_v40 }
 0x814   : > { %vm3543_vm2 = vcmp.ge.f32.partialorder %v3389_v32, 0.0  ;;  %v3607_v24 = vmul.f32 0.2, %v3389_v32 }
 0x815   : > { %v3393_v48 = vpop.f32.mrb[124].mxu1 }
 0x816   : > { %v3394_v28 = vadd.f32 %v3393_v48, %v3010_v43  ;;  %v3395_v44 = vpop.f32.mrb[125].mxu1  ;;  %v3671_v25 = vsel %vm3543_vm2, %v3389_v32, %v3607_v24  ;;  %v3060_v43 = vpop.permute.xlu0 %3059 }
 0x817   : > { %5342 = vmatmul.mubr.msk.f32.gmra.mrb[120].mxu0 %vm3697_vm5, %v3671_v25 }
 0x818   : > { %vm3544_vm3 = vcmp.ge.f32.partialorder %v3394_v28, 0.0  ;;  %v3608_v47 = vmul.f32 0.2, %v3394_v28 }
 0x819   : > { %v3398_v51 = vpop.f32.mrb[126].mxu1 }
 0x81a   : > { %v3399_v31 = vadd.f32 %v3398_v51, %v3015_v49  ;;  %v3400_v38 = vpop.f32.mrb[127].mxu1  ;;  %v3672_v35 = vsel %vm3544_vm3, %v3394_v28, %v3608_v47  ;;  %v3065_v49 = vpop.permute.xlu1 %3064 }
 0x81b   : > { %5344 = vmatprep.mubr.msk.f32.mxu0 %vm3697_vm5, %v3672_v35 }
 0x81c   : > { %vm3545_vm1 = vcmp.ge.f32.partialorder %v3399_v31, 0.0  ;;  %v3609_v52 = vmul.f32 0.2, %v3399_v31 }
 0x81d   : > { %v3403_v53 = vpop.f32.mrb[128].mxu1 }
 0x81e   : > { %v3404_v54 = vadd.f32 %v3403_v53, %v3020_v61  ;;  %v3405_v55 = vpop.f32.mrb[129].mxu1  ;;  %v3673_v50 = vsel %vm3545_vm1, %v3399_v31, %v3609_v52  ;;  %v3070_v61 = vpop.permute.xlu0 %3069 }
 0x81f   : > { %5345 = vmatmul.mubr.msk.f32.gmra.mrb[122].mxu0 %vm3697_vm5, %v3673_v50 }
 0x820   : > { %vm3546_vm4 = vcmp.ge.f32.partialorder %v3404_v54, 0.0  ;;  %v3610_v56 = vmul.f32 0.2, %v3404_v54 }
 0x821   : > { %v3408_v59 = vpop.f32.mrb[130].mxu1 }
 0x822   : > { %v3409_v58 = vadd.f32 %v3408_v59, %v3025_v23  ;;  %v3410_v62 = vpop.f32.mrb[131].mxu1  ;;  %v3674_v3 = vsel %vm3546_vm4, %v3404_v54, %v3610_v56  ;;  %v3075_v23 = vpop.permute.xlu1 %3074 }
 0x823   : > { %5347 = vmatprep.mubr.msk.f32.mxu0 %vm3697_vm5, %v3674_v3 }
 0x824   : > { %vm3547_vm0 = vcmp.ge.f32.partialorder %v3409_v58, 0.0  ;;  %v3611_v30 = vmul.f32 0.2, %v3409_v58 }
 0x825   : > { %v3413_v7 = vpop.f32.mrb[132].mxu1 }
 0x826   : > { %v3414_v19 = vadd.f32 %v3413_v7, %v3030_v4  ;;  %v3415_v5 = vpop.f32.mrb[133].mxu1  ;;  %v3675_v2 = vsel %vm3547_vm0, %v3409_v58, %v3611_v30  ;;  %v3080_v4 = vpop.permute.xlu0 %3079 }
 0x827   : > { %5348 = vmatmul.mubr.msk.f32.gmra.mrb[124].mxu0 %vm3697_vm5, %v3675_v2 }
 0x828   : > { %vm3548_vm6 = vcmp.ge.f32.partialorder %v3414_v19, 0.0  ;;  %v3612_v8 = vmul.f32 0.2, %v3414_v19 }
 0x829   : > { %v3418_v34 = vpop.f32.mrb[134].mxu1 }
 0x82a   : > { %v3419_v12 = vadd.f32 %v3418_v34, %v3035_v10  ;;  %v3420_v11 = vpop.f32.mrb[135].mxu1  ;;  %v3676_v6 = vsel %vm3548_vm6, %v3414_v19, %v3612_v8  ;;  %v3085_v10 = vpop.permute.xlu1 %3084 }
 0x82b   : > { %5350 = vmatprep.mubr.msk.f32.mxu0 %vm3697_vm5, %v3676_v6 }
 0x82c   : > { %vm3549_vm7 = vcmp.ge.f32.partialorder %v3419_v12, 0.0  ;;  %v3613_v13 = vmul.f32 0.2, %v3419_v12 }
 0x82d   : > { %v3423_v17 = vpop.f32.mrb[136].mxu1 }
 0x82e   : > { %v3424_v60 = vadd.f32 %v3423_v17, %v3040_v14  ;;  %v3425_v37 = vpop.f32.mrb[137].mxu1  ;;  %v3677_v29 = vsel %vm3549_vm7, %v3419_v12, %v3613_v13  ;;  %v3090_v14 = vpop.permute.xlu0 %3089 }
 0x82f   : > { %5351 = vmatmul.mubr.msk.f32.gmra.mrb[126].mxu0 %vm3697_vm5, %v3677_v29 }
 0x830   : > { %vm3550_vm8 = vcmp.ge.f32.partialorder %v3424_v60, 0.0  ;;  %v3614_v16 = vmul.f32 0.2, %v3424_v60 }
 0x831   : > { %v3428_v63 = vpop.f32.mrb[138].mxu1 }
 0x832   : > { %v3429_v0 = vadd.f32 %v3428_v63, %v3045_v57  ;;  %v3430_v9 = vpop.f32.mrb[139].mxu1  ;;  %v3678_v18 = vsel %vm3550_vm8, %v3424_v60, %v3614_v16  ;;  %v3095_v57 = vpop.permute.xlu1 %3094 }
 0x833   : > { %5353 = vmatprep.mubr.msk.f32.mxu0 %vm3697_vm5, %v3678_v18 }
 0x834   : > { %vm3551_vm9 = vcmp.ge.f32.partialorder %v3429_v0, 0.0  ;;  %v3615_v41 = vmul.f32 0.2, %v3429_v0 }
 0x835   : > { %v3433_v22 = vpop.f32.mrb[140].mxu1 }
 0x836   : > { %v3434_v1 = vadd.f32 %v3433_v22, %v3050_v21  ;;  %v3435_v26 = vpop.f32.mrb[141].mxu1  ;;  %v3679_v27 = vsel %vm3551_vm9, %v3429_v0, %v3615_v41  ;;  %v3100_v21 = vpop.permute.xlu0 %3099  ;;  %vm4452_vm9 = vcmask 196608  }
 0x837   : > { %5354 = vmatmul.mubr.msk.f32.gmra.mrb[128].mxu0 %vm3697_vm5, %v3679_v27 }
 0x838   : > { %vm3552_vm10 = vcmp.ge.f32.partialorder %v3434_v1, 0.0  ;;  %v3616_v45 = vmul.f32 0.2, %v3434_v1 }
 0x839   : > { %v3438_v20 = vpop.f32.mrb[142].mxu1 }
 0x83a   : > { %v3439_v32 = vadd.f32 %v3438_v20, %v3055_v15  ;;  %v3440_v36 = vpop.f32.mrb[143].mxu1  ;;  %v3680_v40 = vsel %vm3552_vm10, %v3434_v1, %v3616_v45  ;;  %v3105_v15 = vpop.permute.xlu1 %3104 }
 0x83b   : > { %5356 = vmatprep.mubr.msk.f32.mxu0 %vm3697_vm5, %v3680_v40 }
 0x83c   : > { %vm3553_vm11 = vcmp.ge.f32.partialorder %v3439_v32, 0.0  ;;  %v3617_v24 = vmul.f32 0.2, %v3439_v32 }
 0x83d   : > { %v3443_v48 = vpop.f32.mrb[144].mxu1 }
 0x83e   : > { %v3444_v28 = vadd.f32 %v3443_v48, %v3060_v43  ;;  %v3445_v44 = vpop.f32.mrb[145].mxu1  ;;  %v3681_v25 = vsel %vm3553_vm11, %v3439_v32, %v3617_v24  ;;  %v3110_v43 = vpop.permute.xlu0 %3109 }
 0x83f   : > { %5357 = vmatmul.mubr.msk.f32.gmra.mrb[130].mxu0 %vm3697_vm5, %v3681_v25 }
 0x840   : > { %vm3554_vm12 = vcmp.ge.f32.partialorder %v3444_v28, 0.0  ;;  %v3618_v47 = vmul.f32 0.2, %v3444_v28 }
 0x841   : > { %v3448_v51 = vpop.f32.mrb[146].mxu1 }
 0x842   : > { %v3449_v31 = vadd.f32 %v3448_v51, %v3065_v49  ;;  %v3450_v38 = vpop.f32.mrb[147].mxu1  ;;  %v3682_v35 = vsel %vm3554_vm12, %v3444_v28, %v3618_v47  ;;  %v3115_v49 = vpop.permute.xlu1 %3114 }
 0x843   : > { %5359 = vmatprep.mubr.msk.f32.mxu0 %vm3697_vm5, %v3682_v35 }
 0x844   : > { %vm3555_vm13 = vcmp.ge.f32.partialorder %v3449_v31, 0.0  ;;  %v3619_v52 = vmul.f32 0.2, %v3449_v31 }
 0x845   : > { %v3453_v53 = vpop.f32.mrb[148].mxu1 }
 0x846   : > { %v3454_v54 = vadd.f32 %v3453_v53, %v3070_v61  ;;  %v3455_v55 = vpop.f32.mrb[149].mxu1  ;;  %v3683_v50 = vsel %vm3555_vm13, %v3449_v31, %v3619_v52  ;;  %v7423_v31 = vld [vmem:[#allocation8] sm:$0xf] }
 0x847   : > { %5360 = vmatmul.mubr.msk.f32.gmra.mrb[132].mxu0 %vm3697_vm5, %v3683_v50  ;;  %v4296_v50 = vrot.slane %v7423_v31, %v6280_v46 }
 0x848   : > { %vm3556_vm14 = vcmp.ge.f32.partialorder %v3454_v54, 0.0  ;;  %v3620_v56 = vmul.f32 0.2, %v3454_v54 }
 0x849   : > { %v3458_v59 = vpop.f32.mrb[150].mxu1 }
 0x84a   : > { %v3459_v58 = vadd.f32 %v3458_v59, %v3075_v23  ;;  %v3460_v62 = vpop.f32.mrb[151].mxu1  ;;  %v3684_v3 = vsel %vm3556_vm14, %v3454_v54, %v3620_v56 }
 0x84b   : > { %5362 = vmatprep.mubr.msk.f32.mxu0 %vm3697_vm5, %v3684_v3 }
 0x84c   : > { %vm3557_vm15 = vcmp.ge.f32.partialorder %v3459_v58, 0.0  ;;  %v3621_v30 = vmul.f32 0.2, %v3459_v58 }
 0x84d   : > { %v3463_v7 = vpop.f32.mrb[152].mxu1 }
 0x84e   : > { %v3464_v19 = vadd.f32 %v3463_v7, %v3080_v4  ;;  %v3465_v5 = vpop.f32.mrb[153].mxu1  ;;  %v3685_v2 = vsel %vm3557_vm15, %v3459_v58, %v3621_v30 }
 0x84f   : > { %5363 = vmatmul.mubr.msk.f32.gmra.mrb[134].mxu0 %vm3697_vm5, %v3685_v2 }
 0x850   : > { %vm3558_vm2 = vcmp.ge.f32.partialorder %v3464_v19, 0.0  ;;  %v3622_v8 = vmul.f32 0.2, %v3464_v19 }
 0x851   : > { %v3468_v34 = vpop.f32.mrb[154].mxu1 }
 0x852   : > { %v3469_v12 = vadd.f32 %v3468_v34, %v3085_v10  ;;  %v3470_v11 = vpop.f32.mrb[155].mxu1  ;;  %v3686_v6 = vsel %vm3558_vm2, %v3464_v19, %v3622_v8 }
 0x853   : > { %5365 = vmatprep.mubr.msk.f32.mxu0 %vm3697_vm5, %v3686_v6 }
 0x854   : > { %vm3559_vm3 = vcmp.ge.f32.partialorder %v3469_v12, 0.0  ;;  %v3623_v13 = vmul.f32 0.2, %v3469_v12 }
 0x855   : > { %v3473_v17 = vpop.f32.mrb[156].mxu1 }
 0x856   : > { %v3474_v60 = vadd.f32 %v3473_v17, %v3090_v14  ;;  %v3475_v37 = vpop.f32.mrb[157].mxu1  ;;  %v3687_v29 = vsel %vm3559_vm3, %v3469_v12, %v3623_v13 }
 0x857   : > { %5366 = vmatmul.mubr.msk.f32.gmra.mrb[136].mxu0 %vm3697_vm5, %v3687_v29 }
 0x858   : > { %vm3560_vm1 = vcmp.ge.f32.partialorder %v3474_v60, 0.0  ;;  %v3624_v16 = vmul.f32 0.2, %v3474_v60 }
 0x859   : > { %v3478_v63 = vpop.f32.mrb[158].mxu1 }
 0x85a   : > { %v3479_v0 = vadd.f32 %v3478_v63, %v3095_v57  ;;  %v3480_v9 = vpop.f32.mrb[159].mxu1  ;;  %v3688_v18 = vsel %vm3560_vm1, %v3474_v60, %v3624_v16 }
 0x85b   : > { %5368 = vmatprep.mubr.msk.f32.mxu0 %vm3697_vm5, %v3688_v18 }
 0x85c   : > { %vm3561_vm4 = vcmp.ge.f32.partialorder %v3479_v0, 0.0  ;;  %v3625_v41 = vmul.f32 0.2, %v3479_v0 }
 0x85d   : > { %v3483_v22 = vpop.f32.mrb[160].mxu1 }
 0x85e   : > { %v3484_v1 = vadd.f32 %v3483_v22, %v3100_v21  ;;  %v3485_v26 = vpop.f32.mrb[161].mxu1  ;;  %v3689_v27 = vsel %vm3561_vm4, %v3479_v0, %v3625_v41 }
 0x85f   : > { %5369 = vmatmul.mubr.msk.f32.gmra.mrb[138].mxu0 %vm3697_vm5, %v3689_v27 }
 0x860   : > { %vm3562_vm0 = vcmp.ge.f32.partialorder %v3484_v1, 0.0  ;;  %v3626_v45 = vmul.f32 0.2, %v3484_v1 }
 0x861   : > { %v3488_v20 = vpop.f32.mrb[162].mxu1 }
 0x862   : > { %v3489_v32 = vadd.f32 %v3488_v20, %v3105_v15  ;;  %v3490_v36 = vpop.f32.mrb[163].mxu1  ;;  %v3690_v40 = vsel %vm3562_vm0, %v3484_v1, %v3626_v45 }
 0x863   : > { %5371 = vmatprep.mubr.msk.f32.mxu0 %vm3697_vm5, %v3690_v40 }
 0x864   : > { %vm3563_vm6 = vcmp.ge.f32.partialorder %v3489_v32, 0.0  ;;  %v3627_v24 = vmul.f32 0.2, %v3489_v32 }
 0x865   : > { %v3493_v48 = vpop.f32.mrb[164].mxu1 }
 0x866   : > { %v3494_v28 = vadd.f32 %v3493_v48, %v3110_v43  ;;  %v3495_v44 = vpop.f32.mrb[165].mxu1  ;;  %v3691_v25 = vsel %vm3563_vm6, %v3489_v32, %v3627_v24 }
 0x867   : > { %5372 = vmatmul.mubr.msk.f32.gmra.mrb[140].mxu0 %vm3697_vm5, %v3691_v25  ;;  %v4292_v44 = vrot.slane %v7423_v31, %v6266_v39 }
 0x868   : > { %vm3564_vm7 = vcmp.ge.f32.partialorder %v3494_v28, 0.0  ;;  %v3628_v47 = vmul.f32 0.2, %v3494_v28 }
 0x869   : > { %v3498_v51 = vpop.f32.mrb[166].mxu1 }
 0x86a   : > { %v3499_v38 = vadd.f32 %v3498_v51, %v3115_v49  ;;  %v3500_v35 = vpop.f32.mrb[167].mxu1  ;;  %v5283_v52 = vpop.f32.mrb[80].mxu0  ;;  %v3692_v61 = vsel %vm3564_vm7, %v3494_v28, %v3628_v47  ;;  %v4303_v28 = vsub.s32 3, %v6253_v33 }
 0x86b   : > { %v3959_v53 = vpop.f32.mrb[81].mxu0  ;;  %5374 = vmatprep.mubr.msk.f32.mxu0 %vm3697_vm5, %v3692_v61 }
 0x86c   : > { %vm3565_vm8 = vcmp.ge.f32.partialorder %v3499_v38, 0.0  ;;  %v3629_v54 = vmul.f32 0.2, %v3499_v38  ;;  %v5545_v55 = vpack.c.bf16 %v5283_v52, %v3959_v53  ;;  %v4304_v25 = vrot.slane %v7423_v31, %v4303_v28 }
 0x86e   : > { %v3693_v56 = vsel %vm3565_vm8, %v3499_v38, %v3629_v54 }
 0x86f   : > { %5375 = vmatmul.mubr.msk.f32.gmra.mrb[142].mxu0 %vm3697_vm5, %v3693_v56 }
 0x870   : > { %4373 = vmatprep.mubr.f32.mxu0 %v4296_v50 }
 0x872   : > { %v5286_v23 = vpop.f32.mrb[82].mxu0 }
 0x873   : > { %v3969_v59 = vpop.f32.mrb[83].mxu0 }
 0x874   : > { %v5549_v58 = vpack.c.bf16 %v5286_v23, %v3969_v59 }
 0x87a   : > { %v5289_v62 = vpop.f32.mrb[84].mxu0 }
 0x87b   : > { %v3979_v3 = vpop.f32.mrb[85].mxu0 }
 0x87c   : > { %v5553_v30 = vpack.c.bf16 %v5289_v62, %v3979_v3 }
 0x882   : > { %v5292_v4 = vpop.f32.mrb[86].mxu0 }
 0x883   : > { %v3989_v7 = vpop.f32.mrb[87].mxu0 }
 0x884   : > { %v5557_v19 = vpack.c.bf16 %v5292_v4, %v3989_v7 }
 0x886   : > { %v5295_v5 = vpop.f32.mrb[88].mxu0 }
 0x887   : > { %v3999_v2 = vpop.f32.mrb[89].mxu0 }
 0x888   : > { %v5561_v8 = vpack.c.bf16 %v5295_v5, %v3999_v2 }
 0x88a   : > { %v5298_v10 = vpop.f32.mrb[90].mxu0 }
 0x88b   : > { %v4009_v34 = vpop.f32.mrb[91].mxu0 }
 0x88c   : > { %v5565_v12 = vpack.c.bf16 %v5298_v10, %v4009_v34 }
 0x88e   : > { %v5301_v46 = vpop.f32.mrb[92].mxu0 }
 0x88f   : > { %v4019_v11 = vpop.f32.mrb[93].mxu0 }
 0x890   : > { %v5569_v6 = vpack.c.bf16 %v5301_v46, %v4019_v11 }
 0x892   : > { %v5304_v13 = vpop.f32.mrb[94].mxu0 }
 0x893   : > { %v4029_v14 = vpop.f32.mrb[95].mxu0 }
 0x894   : > { %v5573_v17 = vpack.c.bf16 %v5304_v13, %v4029_v14 }
 0x896   : > { %v5307_v60 = vpop.f32.mrb[96].mxu0 }
 0x897   : > { %v4039_v37 = vpop.f32.mrb[97].mxu0 }
 0x898   : > { %v5543_v29 = vpack.c.bf16 %v5307_v60, %v4039_v37 }
 0x89a   : > { %v5310_v16 = vpop.f32.mrb[98].mxu0  ;;  %5544 = vmatprep.subr.bf16.mxu0 %v5543_v29 }
 0x89b   : > { %v4049_v57 = vpop.f32.mrb[99].mxu0  ;;  %5546 = vmatpush3.bf16.msra.mxu0 %v5545_v55 }
 0x89c   : > { %v5547_v63 = vpack.c.bf16 %v5310_v16, %v4049_v57 }
 0x89e   : > { %v5313_v0 = vpop.f32.mrb[100].mxu0  ;;  %5548 = vmatprep.subr.bf16.mxu0 %v5547_v63 }
 0x89f   : > { %v4059_v9 = vpop.f32.mrb[101].mxu0  ;;  %5550 = vmatpush3.bf16.msra.mxu0 %v5549_v58 }
 0x8a0   : > { %v5551_v18 = vpack.c.bf16 %v5313_v0, %v4059_v9 }
 0x8a2   : > { %v5316_v41 = vpop.f32.mrb[102].mxu0  ;;  %5552 = vmatprep.subr.bf16.mxu0 %v5551_v18 }
 0x8a3   : > { %v4069_v21 = vpop.f32.mrb[103].mxu0  ;;  %5554 = vmatpush3.bf16.msra.mxu0 %v5553_v30 }
 0x8a4   : > { %v5555_v22 = vpack.c.bf16 %v5316_v41, %v4069_v21 }
 0x8a6   : > { %5556 = vmatprep.subr.bf16.mxu0 %v5555_v22 }
 0x8a7   : > { %5558 = vmatpush3.bf16.msra.mxu0 %v5557_v19 }
 0x8aa   : > { %v5319_v1 = vpop.f32.mrb[104].mxu0 }
 0x8ab   : > { %v4079_v26 = vpop.f32.mrb[105].mxu0 }
 0x8ac   : > { %v5559_v27 = vpack.c.bf16 %v5319_v1, %v4079_v26 }
 0x8ae   : > { %5560 = vmatprep.subr.bf16.mxu0 %v5559_v27  ;;  %v4300_v27 = vrot.slane %v7423_v31, %v6273_v42 }
 0x8af   : > { %5562 = vmatpush3.bf16.msra.mxu0 %v5561_v8 }
 0x8b2   : > { %v5322_v45 = vpop.f32.mrb[106].mxu0 }
 0x8b3   : > { %v4089_v15 = vpop.f32.mrb[107].mxu0 }
 0x8b4   : > { %v5563_v20 = vpack.c.bf16 %v5322_v45, %v4089_v15 }
 0x8b6   : > { %5564 = vmatprep.subr.bf16.mxu0 %v5563_v20 }
 0x8b7   : > { %5566 = vmatpush3.bf16.msra.mxu0 %v5565_v12 }
 0x8ba   : > { %v5325_v32 = vpop.f32.mrb[108].mxu0 }
 0x8bb   : > { %v4099_v36 = vpop.f32.mrb[109].mxu0 }
 0x8bc   : > { %v5567_v40 = vpack.c.bf16 %v5325_v32, %v4099_v36  ;;  %v4282_v32 = vpop.permute.xlu0 %4281 }
 0x8bd   : > { %v4287_v36 = vrot.slane %v4282_v32, %v6266_v39 }
 0x8be   : > { %5568 = vmatprep.subr.bf16.mxu0 %v5567_v40 }
 0x8bf   : > { %5570 = vmatpush3.bf16.msra.mxu0 %v5569_v6 }
 0x8c2   : > { %v5328_v24 = vpop.f32.mrb[110].mxu0 }
 0x8c3   : > { %v4109_v43 = vpop.f32.mrb[111].mxu0 }
 0x8c4   : > { %v5571_v48 = vpack.c.bf16 %v5328_v24, %v4109_v43 }
 0x8c6   : > { %5572 = vmatprep.subr.bf16.mxu0 %v5571_v48 }
 0x8c7   : > { %5574 = vmatpush3.bf16.msra.mxu0 %v5573_v17 }
 0x8ca   : > { %v5331_v47 = vpop.f32.mrb[112].mxu0  ;;  %4374 = vmatmul.mubr.f32.vlgmr.msra.gmra.mrb[144].mxu0 %v4292_v44 }
 0x8cb   : > { %v4119_v49 = vpop.f32.mrb[113].mxu0  ;;  %4443 = vmatprep.mubr.f32.mxu0 %v4304_v25 }
 0x8cc   : > { %v5577_v51 = vpack.c.bf16 %v5331_v47, %v4119_v49 }
 0x8d2   : > { %v5334_v38 = vpop.f32.mrb[114].mxu0 }
 0x8d3   : > { %v4129_v35 = vpop.f32.mrb[115].mxu0 }
 0x8d4   : > { %v5581_v52 = vpack.c.bf16 %v5334_v38, %v4129_v35 }
 0x8da   : > { %v5337_v61 = vpop.f32.mrb[116].mxu0 }
 0x8db   : > { %v4139_v53 = vpop.f32.mrb[117].mxu0 }
 0x8dc   : > { %v5585_v54 = vpack.c.bf16 %v5337_v61, %v4139_v53 }
 0x8e2   : > { %v5340_v55 = vpop.f32.mrb[118].mxu0 }
 0x8e3   : > { %v4149_v33 = vpop.f32.mrb[119].mxu0 }
 0x8e4   : > { %v5589_v50 = vpack.c.bf16 %v5340_v55, %v4149_v33 }
 0x8ea   : > { %v5343_v56 = vpop.f32.mrb[120].mxu0 }
 0x8eb   : > { %v4159_v23 = vpop.f32.mrb[121].mxu0 }
 0x8ec   : > { %v5593_v59 = vpack.c.bf16 %v5343_v56, %v4159_v23 }
 0x8f2   : > { %v5346_v58 = vpop.f32.mrb[122].mxu0 }
 0x8f3   : > { %v4169_v62 = vpop.f32.mrb[123].mxu0 }
 0x8f4   : > { %v5597_v3 = vpack.c.bf16 %v5346_v58, %v4169_v62 }
 0x8fa   : > { %v5349_v30 = vpop.f32.mrb[124].mxu0 }
 0x8fb   : > { %v4179_v4 = vpop.f32.mrb[125].mxu0 }
 0x8fc   : > { %v5601_v7 = vpack.c.bf16 %v5349_v30, %v4179_v4 }
 0x902   : > { %v5352_v19 = vpop.f32.mrb[126].mxu0 }
 0x903   : > { %v4189_v5 = vpop.f32.mrb[127].mxu0 }
 0x904   : > { %v5605_v2 = vpack.c.bf16 %v5352_v19, %v4189_v5 }
 0x90a   : > { %v5355_v8 = vpop.f32.mrb[128].mxu0 }
 0x90b   : > { %v4199_v10 = vpop.f32.mrb[129].mxu0 }
 0x90c   : > { %v5575_v34 = vpack.c.bf16 %v5355_v8, %v4199_v10 }
 0x90e   : > { %5576 = vmatprep.subr.bf16.mxu0 %v5575_v34 }
 0x90f   : > { %5578 = vmatpush3.bf16.msra.mxu0 %v5577_v51 }
 0x912   : > { %v5358_v12 = vpop.f32.mrb[130].mxu0 }
 0x913   : > { %v4209_v46 = vpop.f32.mrb[131].mxu0 }
 0x914   : > { %v5579_v11 = vpack.c.bf16 %v5358_v12, %v4209_v46 }
 0x916   : > { %5580 = vmatprep.subr.bf16.mxu0 %v5579_v11 }
 0x917   : > { %5582 = vmatpush3.bf16.msra.mxu0 %v5581_v52 }
 0x91a   : > { %v5361_v6 = vpop.f32.mrb[132].mxu0 }
 0x91b   : > { %v4219_v13 = vpop.f32.mrb[133].mxu0 }
 0x91c   : > { %v5583_v14 = vpack.c.bf16 %v5361_v6, %v4219_v13 }
 0x91e   : > { %5584 = vmatprep.subr.bf16.mxu0 %v5583_v14 }
 0x91f   : > { %5586 = vmatpush3.bf16.msra.mxu0 %v5585_v54 }
 0x922   : > { %v5364_v17 = vpop.f32.mrb[134].mxu0 }
 0x923   : > { %v4229_v60 = vpop.f32.mrb[135].mxu0 }
 0x924   : > { %v5587_v37 = vpack.c.bf16 %v5364_v17, %v4229_v60 }
 0x926   : > { %5588 = vmatprep.subr.bf16.mxu0 %v5587_v37 }
 0x927   : > { %5590 = vmatpush3.bf16.msra.mxu0 %v5589_v50 }
 0x92a   : > { %v5367_v29 = vpop.f32.mrb[136].mxu0 }
 0x92b   : > { %v4239_v16 = vpop.f32.mrb[137].mxu0 }
 0x92c   : > { %v5591_v57 = vpack.c.bf16 %v5367_v29, %v4239_v16 }
 0x92e   : > { %5592 = vmatprep.subr.bf16.mxu0 %v5591_v57 }
 0x92f   : > { %5594 = vmatpush3.bf16.msra.mxu0 %v5593_v59 }
 0x932   : > { %v5370_v63 = vpop.f32.mrb[138].mxu0 }
 0x933   : > { %v4249_v0 = vpop.f32.mrb[139].mxu0 }
 0x934   : > { %v5595_v9 = vpack.c.bf16 %v5370_v63, %v4249_v0 }
 0x936   : > { %5596 = vmatprep.subr.bf16.mxu0 %v5595_v9 }
 0x937   : > { %5598 = vmatpush3.bf16.msra.mxu0 %v5597_v3 }
 0x93a   : > { %v5373_v18 = vpop.f32.mrb[140].mxu0 }
 0x93b   : > { %v4259_v41 = vpop.f32.mrb[141].mxu0 }
 0x93c   : > { %v5599_v21 = vpack.c.bf16 %v5373_v18, %v4259_v41 }
 0x93e   : > { %5600 = vmatprep.subr.bf16.mxu0 %v5599_v21 }
 0x93f   : > { %5602 = vmatpush3.bf16.msra.mxu0 %v5601_v7 }
 0x942   : > { %v5376_v22 = vpop.f32.mrb[142].mxu0 }
 0x943   : > { %v4269_v1 = vpop.f32.mrb[143].mxu0 }
 0x944   : > { %v5603_v26 = vpack.c.bf16 %v5376_v22, %v4269_v1 }
 0x946   : > { %5604 = vmatprep.subr.bf16.mxu0 %v5603_v26 }
 0x947   : > { %5606 = vmatpush3.bf16.msra.mxu0 %v5605_v2 }
 0x94a   : > { %4444 = vmatmul.mubr.f32.vlgmr.msra.gmra.mrb[146].mxu0 %v4300_v27 }
 0x99d   : > { %v4999_v45 = vpop.f32.mrb[144].mxu0 }
 0x99e   : > { %v5000_v15 = vpop.f32.mrb[145].mxu0 }
 0x99f   : > { %v5001_v20 = vadd.f32 %v5000_v15, %v4999_v45 }
 0x9a1   : > { %v4376_v43 = vadd.f32 %v5001_v20, %v4287_v36 }
 0xa1d   : > { %v5034_v40 = vpop.f32.mrb[146].mxu0 }
 0xa1e   : > { %v5035_v24 = vpop.f32.mrb[147].mxu0 }
 0xa1f   : > { %v5036_v48 = vadd.f32 %v5035_v24, %v5034_v40 }
 0xa21   : > { %v4446_v28 = vadd.f32 %v5036_v48, %v4376_v43 }
 0xa23   : > { %vm4449_vm5 = vcmp.ge.f32.partialorder %v4446_v28, 0.0  ;;  %v4450_v44 = vmul.f32 0.2, %v4446_v28 }
 0xa25   : > { %v4451_v42 = vsel %vm4449_vm5, %v4446_v28, %v4450_v44 }
 0xa26   : > { %4453 = vst.msk [vmem:[%s576_s17] sm:$0x1] %vm4452_vm9, %v4451_v42 }
 0xa27 PF: > { %s7484_s19 = sld [smem:[#allocation13_spill]] }
 0xa2d   : > { %s31_s23 = sadd.s32 1, %s7484_s19  }
 0xa2e   : > { %p28_p6 = scmp.ge.s32.totalorder %s31_s23, 4  }
 0xa30   :  { %30 = sbr.rel (!%p28_p6) target bundleno = 8 (0x8), region = 131 }
 0xa37   :  { %4471 = vsyncpa [#allocation4], 1 }
 0xa38   :  { %4473 = vsyncpa [#allocation4 + $0x1], 1 }
 0xa39   :  { %4474 = vsyncpa [#allocation6], 1 }
 0xa3a   :  { %4475 = vsyncpa [#allocation9], 1 }

</bundles_post_ra>
